<compile_context>
chip_gen: v7x
topology: tpu7x:2x2x1
jax: 0.10.0
libtpu: 0.0.40
codegen_flags: <defaults>
</compile_context>

<pallas_src>
import functools

import jax
import jax.numpy as jnp
import numpy as np
from jax.experimental import pallas as pl
from jax.experimental.pallas import tpu as pltpu


def _round_up(x, m):
    return ((x + m - 1) // m) * m


def _sa_kernel(src_list_ref, counts_ref,             # scalar prefetch (SMEM)
               feat_ref, el_ref, er_ref, em_ref,     # VMEM inputs
               out_ref,                               # VMEM output (src-resident)
               m_ref,                                 # VMEM scratch: running max
               *, num_heads, ones_row, negative_slope):
    """One (dst-tile, src-tile) step of edge-softmax graph attention.

    src_list_ref : SMEM (nd, ns)   compacted non-empty src-tile ids per dst tile
    counts_ref   : SMEM (nd,)      number of non-empty src tiles per dst tile
    feat_ref     : VMEM (H, Fp, TS) src features + ones row (matmul layout)
    el_ref       : VMEM (H, TS, 1) precomputed src attention term
    er_ref       : VMEM (H, 1, TD) precomputed dst attention term
    em_ref       : VMEM (H, TS, TD) mask-folded, attn_m-contracted edge term
    out_ref      : VMEM (H, Fp, TD) f32 accumulator / lane-dense output slab
    m_ref        : VMEM (H, 1, TD) online-softmax running max
    """
    H = num_heads
    d_idx = pl.program_id(0)
    s_idx = pl.program_id(1)
    n_src_blocks = pl.num_programs(1)

    @pl.when(s_idx == 0)
    def _init():
        # -1e30 (not -inf) so fully-masked columns never produce inf - inf = nan.
        m_ref[...] = jnp.full(m_ref.shape, -1e30, dtype=m_ref.dtype)
        out_ref[...] = jnp.zeros(out_ref.shape, dtype=out_ref.dtype)

    @pl.when(s_idx < counts_ref[d_idx])                # skip empty (src, dst) tiles
    def _compute():
        for h in range(H):                             # H is small; unrolled
            # attention logits: el[src] + em[edge] + er[dst]  (mask folded into em)
            e_h = el_ref[h] + er_ref[h] + em_ref[h].astype(jnp.float32)  # (TS, TD)
            e_h = jnp.where(e_h > 0, e_h, negative_slope * e_h)          # leaky_relu

            # online (flash-style) softmax over the src axis
            m_prev = m_ref[h]                                            # (1, TD)
            m_new = jnp.maximum(m_prev, jnp.max(e_h, axis=0, keepdims=True))
            alpha = jnp.exp(m_prev - m_new)                              # (1, TD)
            p = jnp.exp(e_h - m_new)                                     # (TS, TD)

            # message passing: (Fp, TS) @ (TS, TD); the ones row of feat makes
            # output row `ones_row` the softmax denominator (l update == rescale).
            feat_h = feat_ref[h]
            out_ref[h] = alpha * out_ref[h] + jnp.dot(
                feat_h, p.astype(feat_h.dtype), preferred_element_type=jnp.float32)
            m_ref[h] = m_new

    @pl.when(s_idx == n_src_blocks - 1)
    def _finalize():
        for h in range(H):
            vals = out_ref[h]                                            # (Fp, TD)
            denom = vals[ones_row:ones_row + 1, :]                       # (1, TD)
            # zero-in-degree / padded columns guard: avoid 0 * inf.
            denom = jnp.where(denom > 0.0, denom, 1.0)
            inv = pl.reciprocal(denom, approx=True)                      # EUP fast path
            inv = inv * (2.0 - denom * inv)                              # Newton -> ~f32 exact
            out_ref[h] = vals * inv


def _select_tiles(n_nodes, tile_dst, tile_src):
    n128 = _round_up(max(n_nodes, 1), 128)
    if tile_dst is None:
        tile_dst = 128                          # keep >= 2 dst blocks for megacore
        for cand in (512, 256):
            if n128 >= 2 * cand:
                tile_dst = cand
                break
    if tile_src is None:
        tile_src = min(256, n128)
    return tile_dst, tile_src


def _vmem_limit_bytes(H, Fp, ts, td, stream_bytes):
    """Derive a tight VMEM budget from the padded per-block footprints."""
    em_b = H * _round_up(ts, 8) * _round_up(td, 128) * stream_bytes
    feat_b = H * _round_up(Fp, 8) * _round_up(ts, 128) * stream_bytes
    el_b = H * _round_up(ts, 8) * 128 * 4        # (H, TS, 1) pads lanes to 128
    er_b = H * 8 * _round_up(td, 128) * 4
    out_b = H * _round_up(Fp, 8) * _round_up(td, 128) * 4
    m_b = H * 8 * _round_up(td, 128) * 4
    total = 2 * (em_b + feat_b + el_b + er_b + out_b) + m_b
    return int(min(40 * 1024 * 1024, max(8 * 1024 * 1024, 2 * total)))


def sa_layer_forward(feat, edge_feat_dense, adj, attn_l, attn_r, attn_m, *,
                     num_heads, out_feats, negative_slope=0.2,
                     stream_dtype=jnp.bfloat16, tile_dst=None, tile_src=None):
    """feat: (N, H*F); edge_feat_dense: (N_dst, N_src, E); adj: (N_dst, N_src);
    attn_l/attn_r: (1, H, F); attn_m: (1, H, E).  Returns (N, H, F) float32."""
    N = feat.shape[0]
    H, F = num_heads, out_feats
    E = edge_feat_dense.shape[-1]

    feat3 = feat.reshape(N, H, F).astype(jnp.float32)
    al = attn_l.reshape(H, F).astype(jnp.float32)
    ar = attn_r.reshape(H, F).astype(jnp.float32)
    am = attn_m.reshape(H, E).astype(jnp.float32)

    # Hoisted per-node attention terms (tiny one-shot XLA reductions).
    el = jnp.einsum('nhf,hf->hn', feat3, al)                 # (H, N) src term
    er = jnp.einsum('nhf,hf->hn', feat3, ar)                 # (H, N) dst term
    # Pre-contract edge features with attn_m (H <= E): em[h, s, d].
    em = jnp.einsum('dse,he->hsd', edge_feat_dense.astype(jnp.float32), am)

    td, ts = _select_tiles(N, tile_dst, tile_src)
    nd_pad = _round_up(N, td)
    ns_pad = _round_up(N, ts)
    n_dst_blocks = nd_pad // td
    n_src_blocks = ns_pad // ts

    # Lane-dense layouts; the mask is folded into em (non-edges -> -1e30).
    adj_t = jnp.pad(adj.T.astype(jnp.float32),
                    ((0, ns_pad - N), (0, nd_pad - N)))                      # (ns, nd)
    em = jnp.pad(em, ((0, 0), (0, ns_pad - N), (0, nd_pad - N)))
    em_m = jnp.where(adj_t[None] > 0.0, em, -1e30).astype(stream_dtype)      # (H, ns, nd)

    # Source features with an appended "ones" row (softmax denom via the MXU),
    # padded to a multiple of 8 sublanes.
    Fp = _round_up(F + 1, 8)
    feat_t = jnp.transpose(feat3, (1, 2, 0))                                 # (H, F, N)
    feat_t = jnp.pad(feat_t, ((0, 0), (0, 0), (0, ns_pad - N)))
    pieces = [feat_t, jnp.ones((H, 1, ns_pad), jnp.float32)]
    if Fp > F + 1:
        pieces.append(jnp.zeros((H, Fp - F - 1, ns_pad), jnp.float32))
    feat_aug = jnp.concatenate(pieces, axis=1).astype(stream_dtype)          # (H, Fp, ns)

    el3 = jnp.pad(el, ((0, 0), (0, ns_pad - N)))[:, :, None]                 # (H, ns, 1)
    er3 = jnp.pad(er, ((0, 0), (0, nd_pad - N)))[:, None, :]                 # (H, 1, nd)

    # Block-sparsity schedule (scalar prefetch): per dst tile, the compacted
    # list of src tiles containing at least one edge + its length.
    adj_blk = adj_t.reshape(n_src_blocks, ts, n_dst_blocks, td)
    has_edge = jnp.any(adj_blk > 0.0, axis=(1, 3)).T                         # (nd, ns)
    counts = jnp.sum(has_edge, axis=1).astype(jnp.int32)                     # (nd,)
    s_ids = jnp.arange(n_src_blocks, dtype=jnp.int32)[None, :]
    key = jnp.where(has_edge, s_ids, s_ids + n_src_blocks)
    order = (jnp.sort(key, axis=1) % n_src_blocks).astype(jnp.int32)         # edges first
    last = jnp.maximum(counts - 1, 0)[:, None]
    fallback = jnp.take_along_axis(order, last, axis=1)                      # repeat last
    src_list = jnp.where(s_ids < counts[:, None], order, fallback).astype(jnp.int32)

    kernel = functools.partial(_sa_kernel, num_heads=H, ones_row=F,
                               negative_slope=float(negative_slope))

    vmem_limit = _vmem_limit_bytes(H, Fp, ts, td, jnp.dtype(stream_dtype).itemsize)

    grid_spec = pltpu.PrefetchScalarGridSpec(
        num_scalar_prefetch=2,
        grid=(n_dst_blocks, n_src_blocks),
        in_specs=[
            pl.BlockSpec((H, Fp, ts), lambda d, s, lst, cnt: (0, 0, lst[d, s])),  # feat
            pl.BlockSpec((H, ts, 1), lambda d, s, lst, cnt: (0, lst[d, s], 0)),   # el
            pl.BlockSpec((H, 1, td), lambda d, s, lst, cnt: (0, 0, d)),           # er
            pl.BlockSpec((H, ts, td), lambda d, s, lst, cnt: (0, lst[d, s], d)),  # em
        ],
        out_specs=pl.BlockSpec((H, Fp, td), lambda d, s, lst, cnt: (0, 0, d)),
        scratch_shapes=[pltpu.VMEM((H, 1, td), jnp.float32)],                # running max
    )

    out_slab = pl.pallas_call(
        kernel,
        out_shape=jax.ShapeDtypeStruct((H, Fp, nd_pad), jnp.float32),
        grid_spec=grid_spec,
        compiler_params=pltpu.CompilerParams(
            dimension_semantics=("parallel", "arbitrary"),
            vmem_limit_bytes=vmem_limit),
    )(src_list, counts, feat_aug, el3, er3, em_m)

    # Layout plumbing back to the module's (N, H, F); drop ones/zero rows.
    out = jnp.transpose(out_slab, (2, 0, 1))[:N, :, :F]
    # Zero-in-degree nodes receive no messages -> exact 0 (matches edge_softmax).
    in_deg = jnp.sum(adj, axis=1)
    return jnp.where(in_deg[:, None, None] > 0.0, out, 0.0)


def _reference(feat3, efeat, adj, al, ar, am, negative_slope):
    el = jnp.einsum('nhf,hf->nh', feat3, al)                 # (N, H)
    er = jnp.einsum('nhf,hf->nh', feat3, ar)                 # (N, H)
    em = jnp.einsum('dse,he->dsh', efeat, am)                # (N, N, H)
    e = el[None, :, :] + em + er[:, None, :]
    e = jnp.where(e > 0, e, negative_slope * e)
    mask = adj[:, :, None] > 0
    e = jnp.where(mask, e, -1e30)
    a = jax.nn.softmax(e, axis=1)
    a = jnp.where(mask, a, 0.0)
    return jnp.einsum('dsh,shf->dhf', a, feat3)


def _xavier_normal(key, shape, gain):
    # PyTorch fan convention for a (1, H, D) tensor: fan_in = H*D, fan_out = D.
    fan_in = shape[1] * shape[2]
    fan_out = shape[0] * shape[2]
    std = gain * np.sqrt(2.0 / (fan_in + fan_out))
    return std * jax.random.normal(key, shape, dtype=jnp.float32)


if __name__ == "__main__":
    # Small, module-consistent shapes.  With 128-wide tiles this gives a 2x2
    # node-tile grid, one completely empty (dst, src) tile (exercises the
    # scalar-prefetch tile skip) and one zero-in-degree node (exercises the
    # guard), plus the default auto-tile / bf16 path.
    N = 256
    num_heads = 4
    out_feats = 8
    in_feats = num_heads * out_feats      # feat.view(-1, H, F) requires this
    edge_dim = 8
    negative_slope = 0.2

    key = jax.random.PRNGKey(0)
    k_feat, k_edge, k_adj, k_l, k_r, k_m = jax.random.split(key, 6)

    feat = jax.random.normal(k_feat, (N, in_feats), dtype=jnp.float32)
    edge_feat_dense = jax.random.normal(k_edge, (N, N, edge_dim), dtype=jnp.float32)
    # Random directed graph + self-loops.
    adj = (jax.random.uniform(k_adj, (N, N)) < 0.1).astype(jnp.float32)
    adj = jnp.maximum(adj, jnp.eye(N, dtype=jnp.float32))
    # Empty (dst-tile 0, src-tile 1) block -> block-sparse skip path is exercised.
    adj = adj.at[:128, 128:].set(0.0)
    # One zero-in-degree node -> zero-output guard is exercised.
    adj = adj.at[5, :].set(0.0)

    gain = float(np.sqrt(2.0))            # nn.init.calculate_gain('relu')
    attn_l = _xavier_normal(k_l, (1, num_heads, out_feats), gain)
    attn_r = _xavier_normal(k_r, (1, num_heads, out_feats), gain)
    attn_m = _xavier_normal(k_m, (1, num_heads, edge_dim), gain)

    ref = _reference(feat.reshape(N, num_heads, out_feats),
                     edge_feat_dense, adj,
                     attn_l.reshape(num_heads, out_feats),
                     attn_r.reshape(num_heads, out_feats),
                     attn_m.reshape(num_heads, edge_dim),
                     negative_slope)

    fwd = jax.jit(sa_layer_forward,
                  static_argnames=("num_heads", "out_feats", "negative_slope",
                                   "stream_dtype", "tile_dst", "tile_src"))

    # f32 streaming path, 128-tiles (correctness gate; multi-block src reduction).
    out = fwd(feat, edge_feat_dense, adj, attn_l, attn_r, attn_m,
              num_heads=num_heads, out_feats=out_feats,
              negative_slope=negative_slope,
              stream_dtype=jnp.float32, tile_dst=128, tile_src=128)
    out = jax.block_until_ready(out)
    np.testing.assert_allclose(np.asarray(out), np.asarray(ref),
                               rtol=1e-4, atol=1e-4)
    assert out.shape == (N, num_heads, out_feats)

    # Default path: bf16 streaming + auto tile selection (loose tolerance since
    # em/feat are rounded to bf16 before the kernel).
    out_bf16 = fwd(feat, edge_feat_dense, adj, attn_l, attn_r, attn_m,
                   num_heads=num_heads, out_feats=out_feats,
                   negative_slope=negative_slope)
    out_bf16 = jax.block_until_ready(out_bf16)
    np.testing.assert_allclose(np.asarray(out_bf16), np.asarray(ref),
                               rtol=1e-1, atol=1e-1)

    print("KERNEL_OK")
</pallas_src>

<mosaic_0001>
module attributes {stable_mosaic.version = 11 : i64} {
  func.func @_sa_kernel(%arg0: i32, %arg1: i32, %arg2: memref<2x2xi32, #tpu.memory_space<smem>>, %arg3: memref<2xi32, #tpu.memory_space<smem>>, %arg4: memref<4x16x128xf32, #tpu.memory_space<vmem>>, %arg5: memref<4x128x1xf32, #tpu.memory_space<vmem>>, %arg6: memref<4x1x128xf32, #tpu.memory_space<vmem>>, %arg7: memref<4x128x128xf32, #tpu.memory_space<vmem>>, %arg8: memref<4x16x128xf32, #tpu.memory_space<vmem>>, %arg9: memref<4x1x128xf32, #tpu.memory_space<vmem>>) attributes {dimension_semantics = [#tpu.dimension_semantics<parallel>, #tpu.dimension_semantics<arbitrary>], iteration_bounds = array<i64: 2, 2>, scalar_prefetch = 2 : i64, scratch_operands = 1 : i64, tpu.core_type = #tpu.core_type<tc>, window_params = [{transform_indices = @transform_0, window_bounds = array<i64: 4, 16, 128>}, {transform_indices = @transform_1, window_bounds = array<i64: 4, 128, 1>}, {transform_indices = @transform_2, window_bounds = array<i64: 4, 1, 128>}, {transform_indices = @transform_3, window_bounds = array<i64: 4, 128, 128>}, {transform_indices = @transform_4, window_bounds = array<i64: 4, 16, 128>}]} {
    %c0_i32 = arith.constant 0 : i32
    %0 = arith.cmpi eq, %arg1, %c0_i32 : i32
    %1 = arith.extui %0 : i1 to i32
    %c0_i32_0 = arith.constant 0 : i32
    %2 = arith.cmpi ne, %1, %c0_i32_0 : i32
    scf.if %2 {
      %cst = arith.constant -1.000000e+30 : f32
      %11 = vector.broadcast %cst : f32 to vector<4x1x128xf32>
      %c0 = arith.constant 0 : index
      %c0_3 = arith.constant 0 : index
      %c0_4 = arith.constant 0 : index
      %12 = vector.load %arg9[%c0, %c0_3, %c0_4] : memref<4x1x128xf32, #tpu.memory_space<vmem>>, vector<4x1x128xf32>
      tpu.vector_store %arg9[%c0, %c0_3, %c0_4], %11 {strides = array<i32>} : memref<4x1x128xf32, #tpu.memory_space<vmem>>, vector<4x1x128xf32>,
      %cst_5 = arith.constant 0.000000e+00 : f32
      %13 = vector.broadcast %cst_5 : f32 to vector<4x16x128xf32>
      %c0_6 = arith.constant 0 : index
      %c0_7 = arith.constant 0 : index
      %c0_8 = arith.constant 0 : index
      %14 = vector.load %arg8[%c0_6, %c0_7, %c0_8] : memref<4x16x128xf32, #tpu.memory_space<vmem>>, vector<4x16x128xf32>
      tpu.vector_store %arg8[%c0_6, %c0_7, %c0_8], %13 {strides = array<i32>} : memref<4x16x128xf32, #tpu.memory_space<vmem>>, vector<4x16x128xf32>,
    } else {
    }
    %3 = arith.index_cast %arg0 : i32 to index
    %4 = memref.load %arg3[%3] : memref<2xi32, #tpu.memory_space<smem>>
    %5 = arith.cmpi slt, %arg1, %4 : i32
    %6 = arith.extui %5 : i1 to i32
    %c0_i32_1 = arith.constant 0 : i32
    %7 = arith.cmpi ne, %6, %c0_i32_1 : i32
    scf.if %7 {
      %c0 = arith.constant 0 : index
      %c0_3 = arith.constant 0 : index
      %c0_4 = arith.constant 0 : index
      %11 = vector.load %arg5[%c0, %c0_3, %c0_4] : memref<4x128x1xf32, #tpu.memory_space<vmem>>, vector<1x128x1xf32>
      %12 = vector.shape_cast %11 : vector<1x128x1xf32> to vector<128x1xf32>
      %c0_5 = arith.constant 0 : index
      %c0_6 = arith.constant 0 : index
      %c0_7 = arith.constant 0 : index
      %13 = vector.load %arg6[%c0_5, %c0_6, %c0_7] : memref<4x1x128xf32, #tpu.memory_space<vmem>>, vector<1x1x128xf32>
      %14 = vector.shape_cast %13 : vector<1x1x128xf32> to vector<1x128xf32>
      %15 = vector.broadcast %12 : vector<128x1xf32> to vector<128x128xf32>
      %16 = vector.broadcast %14 : vector<1x128xf32> to vector<128x128xf32>
      %17 = arith.addf %15, %16 : vector<128x128xf32>
      %c0_8 = arith.constant 0 : index
      %c0_9 = arith.constant 0 : index
      %c0_10 = arith.constant 0 : index
      %18 = vector.load %arg7[%c0_8, %c0_9, %c0_10] : memref<4x128x128xf32, #tpu.memory_space<vmem>>, vector<1x128x128xf32>
      %19 = vector.shape_cast %18 : vector<1x128x128xf32> to vector<128x128xf32>
      %20 = arith.addf %17, %19 : vector<128x128xf32>
      %cst = arith.constant 0.000000e+00 : f32
      %21 = vector.broadcast %cst : f32 to vector<128x128xf32>
      %22 = arith.cmpf ogt, %20, %21 : vector<128x128xf32>
      %cst_11 = arith.constant 2.000000e-01 : f32
      %23 = vector.broadcast %cst_11 : f32 to vector<128x128xf32>
      %24 = arith.mulf %23, %20 : vector<128x128xf32>
      %25 = arith.select %22, %20, %24 : vector<128x128xi1>, vector<128x128xf32>
      %c0_12 = arith.constant 0 : index
      %c0_13 = arith.constant 0 : index
      %c0_14 = arith.constant 0 : index
      %26 = vector.load %arg9[%c0_12, %c0_13, %c0_14] : memref<4x1x128xf32, #tpu.memory_space<vmem>>, vector<1x1x128xf32>
      %27 = vector.shape_cast %26 : vector<1x1x128xf32> to vector<1x128xf32>
      %cst_15 = arith.constant dense<0xFF800000> : vector<128xf32>
      %28 = vector.multi_reduction <maximumf>, %25, %cst_15 [0] : vector<128x128xf32> to vector<128xf32>
      %29 = vector.shape_cast %28 : vector<128xf32> to vector<1x128xf32>
      %30 = arith.maximumf %27, %29 : vector<1x128xf32>
      %31 = arith.subf %27, %30 : vector<1x128xf32>
      %32 = math.exp %31 : vector<1x128xf32>
      %33 = vector.broadcast %30 : vector<1x128xf32> to vector<128x128xf32>
      %34 = arith.subf %25, %33 : vector<128x128xf32>
      %35 = math.exp %34 : vector<128x128xf32>
      %c0_16 = arith.constant 0 : index
      %c0_17 = arith.constant 0 : index
      %c0_18 = arith.constant 0 : index
      %36 = vector.load %arg4[%c0_16, %c0_17, %c0_18] : memref<4x16x128xf32, #tpu.memory_space<vmem>>, vector<1x16x128xf32>
      %37 = vector.shape_cast %36 : vector<1x16x128xf32> to vector<16x128xf32>
      %c0_19 = arith.constant 0 : index
      %c0_20 = arith.constant 0 : index
      %c0_21 = arith.constant 0 : index
      %38 = vector.load %arg8[%c0_19, %c0_20, %c0_21] : memref<4x16x128xf32, #tpu.memory_space<vmem>>, vector<1x16x128xf32>
      %39 = vector.shape_cast %38 : vector<1x16x128xf32> to vector<16x128xf32>
      %40 = vector.broadcast %32 : vector<1x128xf32> to vector<16x128xf32>
      %41 = arith.mulf %40, %39 : vector<16x128xf32>
      %cst_22 = arith.constant dense<0.000000e+00> : vector<16x128xf32>
      %42 = tpu.matmul %37, %35, %cst_22 {dimension_numbers = #tpu.dot_dimension_numbers<[1], [0], [0], [1], [0, 0, 1, 1], [], []>} : vector<16x128xf32>, vector<128x128xf32>, vector<16x128xf32> -> vector<16x128xf32>
      %43 = arith.addf %41, %42 : vector<16x128xf32>
      %c0_23 = arith.constant 0 : index
      %c0_24 = arith.constant 0 : index
      %c0_25 = arith.constant 0 : index
      %44 = vector.load %arg8[%c0_23, %c0_24, %c0_25] : memref<4x16x128xf32, #tpu.memory_space<vmem>>, vector<1x16x128xf32>
      %45 = vector.shape_cast %44 : vector<1x16x128xf32> to vector<16x128xf32>
      %46 = vector.shape_cast %43 : vector<16x128xf32> to vector<1x16x128xf32>
      tpu.vector_store %arg8[%c0_23, %c0_24, %c0_25], %46 {strides = array<i32>} : memref<4x16x128xf32, #tpu.memory_space<vmem>>, vector<1x16x128xf32>,
      %c0_26 = arith.constant 0 : index
      %c0_27 = arith.constant 0 : index
      %c0_28 = arith.constant 0 : index
      %47 = vector.load %arg9[%c0_26, %c0_27, %c0_28] : memref<4x1x128xf32, #tpu.memory_space<vmem>>, vector<1x1x128xf32>
      %48 = vector.shape_cast %47 : vector<1x1x128xf32> to vector<1x128xf32>
      %49 = vector.shape_cast %30 : vector<1x128xf32> to vector<1x1x128xf32>
      tpu.vector_store %arg9[%c0_26, %c0_27, %c0_28], %49 {strides = array<i32>} : memref<4x1x128xf32, #tpu.memory_space<vmem>>, vector<1x1x128xf32>,
      %c1 = arith.constant 1 : index
      %c0_29 = arith.constant 0 : index
      %c0_30 = arith.constant 0 : index
      %50 = vector.load %arg5[%c1, %c0_29, %c0_30] : memref<4x128x1xf32, #tpu.memory_space<vmem>>, vector<1x128x1xf32>
      %51 = vector.shape_cast %50 : vector<1x128x1xf32> to vector<128x1xf32>
      %c1_31 = arith.constant 1 : index
      %c0_32 = arith.constant 0 : index
      %c0_33 = arith.constant 0 : index
      %52 = vector.load %arg6[%c1_31, %c0_32, %c0_33] : memref<4x1x128xf32, #tpu.memory_space<vmem>>, vector<1x1x128xf32>
      %53 = vector.shape_cast %52 : vector<1x1x128xf32> to vector<1x128xf32>
      %54 = vector.broadcast %51 : vector<128x1xf32> to vector<128x128xf32>
      %55 = vector.broadcast %53 : vector<1x128xf32> to vector<128x128xf32>
      %56 = arith.addf %54, %55 : vector<128x128xf32>
      %c1_34 = arith.constant 1 : index
      %c0_35 = arith.constant 0 : index
      %c0_36 = arith.constant 0 : index
      %57 = vector.load %arg7[%c1_34, %c0_35, %c0_36] : memref<4x128x128xf32, #tpu.memory_space<vmem>>, vector<1x128x128xf32>
      %58 = vector.shape_cast %57 : vector<1x128x128xf32> to vector<128x128xf32>
      %59 = arith.addf %56, %58 : vector<128x128xf32>
      %cst_37 = arith.constant 0.000000e+00 : f32
      %60 = vector.broadcast %cst_37 : f32 to vector<128x128xf32>
      %61 = arith.cmpf ogt, %59, %60 : vector<128x128xf32>
      %cst_38 = arith.constant 2.000000e-01 : f32
      %62 = vector.broadcast %cst_38 : f32 to vector<128x128xf32>
      %63 = arith.mulf %62, %59 : vector<128x128xf32>
      %64 = arith.select %61, %59, %63 : vector<128x128xi1>, vector<128x128xf32>
      %c1_39 = arith.constant 1 : index
      %c0_40 = arith.constant 0 : index
      %c0_41 = arith.constant 0 : index
      %65 = vector.load %arg9[%c1_39, %c0_40, %c0_41] : memref<4x1x128xf32, #tpu.memory_space<vmem>>, vector<1x1x128xf32>
      %66 = vector.shape_cast %65 : vector<1x1x128xf32> to vector<1x128xf32>
      %cst_42 = arith.constant dense<0xFF800000> : vector<128xf32>
      %67 = vector.multi_reduction <maximumf>, %64, %cst_42 [0] : vector<128x128xf32> to vector<128xf32>
      %68 = vector.shape_cast %67 : vector<128xf32> to vector<1x128xf32>
      %69 = arith.maximumf %66, %68 : vector<1x128xf32>
      %70 = arith.subf %66, %69 : vector<1x128xf32>
      %71 = math.exp %70 : vector<1x128xf32>
      %72 = vector.broadcast %69 : vector<1x128xf32> to vector<128x128xf32>
      %73 = arith.subf %64, %72 : vector<128x128xf32>
      %74 = math.exp %73 : vector<128x128xf32>
      %c1_43 = arith.constant 1 : index
      %c0_44 = arith.constant 0 : index
      %c0_45 = arith.constant 0 : index
      %75 = vector.load %arg4[%c1_43, %c0_44, %c0_45] : memref<4x16x128xf32, #tpu.memory_space<vmem>>, vector<1x16x128xf32>
      %76 = vector.shape_cast %75 : vector<1x16x128xf32> to vector<16x128xf32>
      %c1_46 = arith.constant 1 : index
      %c0_47 = arith.constant 0 : index
      %c0_48 = arith.constant 0 : index
      %77 = vector.load %arg8[%c1_46, %c0_47, %c0_48] : memref<4x16x128xf32, #tpu.memory_space<vmem>>, vector<1x16x128xf32>
      %78 = vector.shape_cast %77 : vector<1x16x128xf32> to vector<16x128xf32>
      %79 = vector.broadcast %71 : vector<1x128xf32> to vector<16x128xf32>
      %80 = arith.mulf %79, %78 : vector<16x128xf32>
      %cst_49 = arith.constant dense<0.000000e+00> : vector<16x128xf32>
      %81 = tpu.matmul %76, %74, %cst_49 {dimension_numbers = #tpu.dot_dimension_numbers<[1], [0], [0], [1], [0, 0, 1, 1], [], []>} : vector<16x128xf32>, vector<128x128xf32>, vector<16x128xf32> -> vector<16x128xf32>
      %82 = arith.addf %80, %81 : vector<16x128xf32>
      %c1_50 = arith.constant 1 : index
      %c0_51 = arith.constant 0 : index
      %c0_52 = arith.constant 0 : index
      %83 = vector.load %arg8[%c1_50, %c0_51, %c0_52] : memref<4x16x128xf32, #tpu.memory_space<vmem>>, vector<1x16x128xf32>
      %84 = vector.shape_cast %83 : vector<1x16x128xf32> to vector<16x128xf32>
      %85 = vector.shape_cast %82 : vector<16x128xf32> to vector<1x16x128xf32>
      tpu.vector_store %arg8[%c1_50, %c0_51, %c0_52], %85 {strides = array<i32>} : memref<4x16x128xf32, #tpu.memory_space<vmem>>, vector<1x16x128xf32>,
      %c1_53 = arith.constant 1 : index
      %c0_54 = arith.constant 0 : index
      %c0_55 = arith.constant 0 : index
      %86 = vector.load %arg9[%c1_53, %c0_54, %c0_55] : memref<4x1x128xf32, #tpu.memory_space<vmem>>, vector<1x1x128xf32>
      %87 = vector.shape_cast %86 : vector<1x1x128xf32> to vector<1x128xf32>
      %88 = vector.shape_cast %69 : vector<1x128xf32> to vector<1x1x128xf32>
      tpu.vector_store %arg9[%c1_53, %c0_54, %c0_55], %88 {strides = array<i32>} : memref<4x1x128xf32, #tpu.memory_space<vmem>>, vector<1x1x128xf32>,
      %c2 = arith.constant 2 : index
      %c0_56 = arith.constant 0 : index
      %c0_57 = arith.constant 0 : index
      %89 = vector.load %arg5[%c2, %c0_56, %c0_57] : memref<4x128x1xf32, #tpu.memory_space<vmem>>, vector<1x128x1xf32>
      %90 = vector.shape_cast %89 : vector<1x128x1xf32> to vector<128x1xf32>
      %c2_58 = arith.constant 2 : index
      %c0_59 = arith.constant 0 : index
      %c0_60 = arith.constant 0 : index
      %91 = vector.load %arg6[%c2_58, %c0_59, %c0_60] : memref<4x1x128xf32, #tpu.memory_space<vmem>>, vector<1x1x128xf32>
      %92 = vector.shape_cast %91 : vector<1x1x128xf32> to vector<1x128xf32>
      %93 = vector.broadcast %90 : vector<128x1xf32> to vector<128x128xf32>
      %94 = vector.broadcast %92 : vector<1x128xf32> to vector<128x128xf32>
      %95 = arith.addf %93, %94 : vector<128x128xf32>
      %c2_61 = arith.constant 2 : index
      %c0_62 = arith.constant 0 : index
      %c0_63 = arith.constant 0 : index
      %96 = vector.load %arg7[%c2_61, %c0_62, %c0_63] : memref<4x128x128xf32, #tpu.memory_space<vmem>>, vector<1x128x128xf32>
      %97 = vector.shape_cast %96 : vector<1x128x128xf32> to vector<128x128xf32>
      %98 = arith.addf %95, %97 : vector<128x128xf32>
      %cst_64 = arith.constant 0.000000e+00 : f32
      %99 = vector.broadcast %cst_64 : f32 to vector<128x128xf32>
      %100 = arith.cmpf ogt, %98, %99 : vector<128x128xf32>
      %cst_65 = arith.constant 2.000000e-01 : f32
      %101 = vector.broadcast %cst_65 : f32 to vector<128x128xf32>
      %102 = arith.mulf %101, %98 : vector<128x128xf32>
      %103 = arith.select %100, %98, %102 : vector<128x128xi1>, vector<128x128xf32>
      %c2_66 = arith.constant 2 : index
      %c0_67 = arith.constant 0 : index
      %c0_68 = arith.constant 0 : index
      %104 = vector.load %arg9[%c2_66, %c0_67, %c0_68] : memref<4x1x128xf32, #tpu.memory_space<vmem>>, vector<1x1x128xf32>
      %105 = vector.shape_cast %104 : vector<1x1x128xf32> to vector<1x128xf32>
      %cst_69 = arith.constant dense<0xFF800000> : vector<128xf32>
      %106 = vector.multi_reduction <maximumf>, %103, %cst_69 [0] : vector<128x128xf32> to vector<128xf32>
      %107 = vector.shape_cast %106 : vector<128xf32> to vector<1x128xf32>
      %108 = arith.maximumf %105, %107 : vector<1x128xf32>
      %109 = arith.subf %105, %108 : vector<1x128xf32>
      %110 = math.exp %109 : vector<1x128xf32>
      %111 = vector.broadcast %108 : vector<1x128xf32> to vector<128x128xf32>
      %112 = arith.subf %103, %111 : vector<128x128xf32>
      %113 = math.exp %112 : vector<128x128xf32>
      %c2_70 = arith.constant 2 : index
      %c0_71 = arith.constant 0 : index
      %c0_72 = arith.constant 0 : index
      %114 = vector.load %arg4[%c2_70, %c0_71, %c0_72] : memref<4x16x128xf32, #tpu.memory_space<vmem>>, vector<1x16x128xf32>
      %115 = vector.shape_cast %114 : vector<1x16x128xf32> to vector<16x128xf32>
      %c2_73 = arith.constant 2 : index
      %c0_74 = arith.constant 0 : index
      %c0_75 = arith.constant 0 : index
      %116 = vector.load %arg8[%c2_73, %c0_74, %c0_75] : memref<4x16x128xf32, #tpu.memory_space<vmem>>, vector<1x16x128xf32>
      %117 = vector.shape_cast %116 : vector<1x16x128xf32> to vector<16x128xf32>
      %118 = vector.broadcast %110 : vector<1x128xf32> to vector<16x128xf32>
      %119 = arith.mulf %118, %117 : vector<16x128xf32>
      %cst_76 = arith.constant dense<0.000000e+00> : vector<16x128xf32>
      %120 = tpu.matmul %115, %113, %cst_76 {dimension_numbers = #tpu.dot_dimension_numbers<[1], [0], [0], [1], [0, 0, 1, 1], [], []>} : vector<16x128xf32>, vector<128x128xf32>, vector<16x128xf32> -> vector<16x128xf32>
      %121 = arith.addf %119, %120 : vector<16x128xf32>
      %c2_77 = arith.constant 2 : index
      %c0_78 = arith.constant 0 : index
      %c0_79 = arith.constant 0 : index
      %122 = vector.load %arg8[%c2_77, %c0_78, %c0_79] : memref<4x16x128xf32, #tpu.memory_space<vmem>>, vector<1x16x128xf32>
      %123 = vector.shape_cast %122 : vector<1x16x128xf32> to vector<16x128xf32>
      %124 = vector.shape_cast %121 : vector<16x128xf32> to vector<1x16x128xf32>
      tpu.vector_store %arg8[%c2_77, %c0_78, %c0_79], %124 {strides = array<i32>} : memref<4x16x128xf32, #tpu.memory_space<vmem>>, vector<1x16x128xf32>,
      %c2_80 = arith.constant 2 : index
      %c0_81 = arith.constant 0 : index
      %c0_82 = arith.constant 0 : index
      %125 = vector.load %arg9[%c2_80, %c0_81, %c0_82] : memref<4x1x128xf32, #tpu.memory_space<vmem>>, vector<1x1x128xf32>
      %126 = vector.shape_cast %125 : vector<1x1x128xf32> to vector<1x128xf32>
      %127 = vector.shape_cast %108 : vector<1x128xf32> to vector<1x1x128xf32>
      tpu.vector_store %arg9[%c2_80, %c0_81, %c0_82], %127 {strides = array<i32>} : memref<4x1x128xf32, #tpu.memory_space<vmem>>, vector<1x1x128xf32>,
      %c3 = arith.constant 3 : index
      %c0_83 = arith.constant 0 : index
      %c0_84 = arith.constant 0 : index
      %128 = vector.load %arg5[%c3, %c0_83, %c0_84] : memref<4x128x1xf32, #tpu.memory_space<vmem>>, vector<1x128x1xf32>
      %129 = vector.shape_cast %128 : vector<1x128x1xf32> to vector<128x1xf32>
      %c3_85 = arith.constant 3 : index
      %c0_86 = arith.constant 0 : index
      %c0_87 = arith.constant 0 : index
      %130 = vector.load %arg6[%c3_85, %c0_86, %c0_87] : memref<4x1x128xf32, #tpu.memory_space<vmem>>, vector<1x1x128xf32>
      %131 = vector.shape_cast %130 : vector<1x1x128xf32> to vector<1x128xf32>
      %132 = vector.broadcast %129 : vector<128x1xf32> to vector<128x128xf32>
      %133 = vector.broadcast %131 : vector<1x128xf32> to vector<128x128xf32>
      %134 = arith.addf %132, %133 : vector<128x128xf32>
      %c3_88 = arith.constant 3 : index
      %c0_89 = arith.constant 0 : index
      %c0_90 = arith.constant 0 : index
      %135 = vector.load %arg7[%c3_88, %c0_89, %c0_90] : memref<4x128x128xf32, #tpu.memory_space<vmem>>, vector<1x128x128xf32>
      %136 = vector.shape_cast %135 : vector<1x128x128xf32> to vector<128x128xf32>
      %137 = arith.addf %134, %136 : vector<128x128xf32>
      %cst_91 = arith.constant 0.000000e+00 : f32
      %138 = vector.broadcast %cst_91 : f32 to vector<128x128xf32>
      %139 = arith.cmpf ogt, %137, %138 : vector<128x128xf32>
      %cst_92 = arith.constant 2.000000e-01 : f32
      %140 = vector.broadcast %cst_92 : f32 to vector<128x128xf32>
      %141 = arith.mulf %140, %137 : vector<128x128xf32>
      %142 = arith.select %139, %137, %141 : vector<128x128xi1>, vector<128x128xf32>
      %c3_93 = arith.constant 3 : index
      %c0_94 = arith.constant 0 : index
      %c0_95 = arith.constant 0 : index
      %143 = vector.load %arg9[%c3_93, %c0_94, %c0_95] : memref<4x1x128xf32, #tpu.memory_space<vmem>>, vector<1x1x128xf32>
      %144 = vector.shape_cast %143 : vector<1x1x128xf32> to vector<1x128xf32>
      %cst_96 = arith.constant dense<0xFF800000> : vector<128xf32>
      %145 = vector.multi_reduction <maximumf>, %142, %cst_96 [0] : vector<128x128xf32> to vector<128xf32>
      %146 = vector.shape_cast %145 : vector<128xf32> to vector<1x128xf32>
      %147 = arith.maximumf %144, %146 : vector<1x128xf32>
      %148 = arith.subf %144, %147 : vector<1x128xf32>
      %149 = math.exp %148 : vector<1x128xf32>
      %150 = vector.broadcast %147 : vector<1x128xf32> to vector<128x128xf32>
      %151 = arith.subf %142, %150 : vector<128x128xf32>
      %152 = math.exp %151 : vector<128x128xf32>
      %c3_97 = arith.constant 3 : index
      %c0_98 = arith.constant 0 : index
      %c0_99 = arith.constant 0 : index
      %153 = vector.load %arg4[%c3_97, %c0_98, %c0_99] : memref<4x16x128xf32, #tpu.memory_space<vmem>>, vector<1x16x128xf32>
      %154 = vector.shape_cast %153 : vector<1x16x128xf32> to vector<16x128xf32>
      %c3_100 = arith.constant 3 : index
      %c0_101 = arith.constant 0 : index
      %c0_102 = arith.constant 0 : index
      %155 = vector.load %arg8[%c3_100, %c0_101, %c0_102] : memref<4x16x128xf32, #tpu.memory_space<vmem>>, vector<1x16x128xf32>
      %156 = vector.shape_cast %155 : vector<1x16x128xf32> to vector<16x128xf32>
      %157 = vector.broadcast %149 : vector<1x128xf32> to vector<16x128xf32>
      %158 = arith.mulf %157, %156 : vector<16x128xf32>
      %cst_103 = arith.constant dense<0.000000e+00> : vector<16x128xf32>
      %159 = tpu.matmul %154, %152, %cst_103 {dimension_numbers = #tpu.dot_dimension_numbers<[1], [0], [0], [1], [0, 0, 1, 1], [], []>} : vector<16x128xf32>, vector<128x128xf32>, vector<16x128xf32> -> vector<16x128xf32>
      %160 = arith.addf %158, %159 : vector<16x128xf32>
      %c3_104 = arith.constant 3 : index
      %c0_105 = arith.constant 0 : index
      %c0_106 = arith.constant 0 : index
      %161 = vector.load %arg8[%c3_104, %c0_105, %c0_106] : memref<4x16x128xf32, #tpu.memory_space<vmem>>, vector<1x16x128xf32>
      %162 = vector.shape_cast %161 : vector<1x16x128xf32> to vector<16x128xf32>
      %163 = vector.shape_cast %160 : vector<16x128xf32> to vector<1x16x128xf32>
      tpu.vector_store %arg8[%c3_104, %c0_105, %c0_106], %163 {strides = array<i32>} : memref<4x16x128xf32, #tpu.memory_space<vmem>>, vector<1x16x128xf32>,
      %c3_107 = arith.constant 3 : index
      %c0_108 = arith.constant 0 : index
      %c0_109 = arith.constant 0 : index
      %164 = vector.load %arg9[%c3_107, %c0_108, %c0_109] : memref<4x1x128xf32, #tpu.memory_space<vmem>>, vector<1x1x128xf32>
      %165 = vector.shape_cast %164 : vector<1x1x128xf32> to vector<1x128xf32>
      %166 = vector.shape_cast %147 : vector<1x128xf32> to vector<1x1x128xf32>
      tpu.vector_store %arg9[%c3_107, %c0_108, %c0_109], %166 {strides = array<i32>} : memref<4x1x128xf32, #tpu.memory_space<vmem>>, vector<1x1x128xf32>,
    } else {
    }
    %c1_i32 = arith.constant 1 : i32
    %8 = arith.cmpi eq, %arg1, %c1_i32 : i32
    %9 = arith.extui %8 : i1 to i32
    %c0_i32_2 = arith.constant 0 : i32
    %10 = arith.cmpi ne, %9, %c0_i32_2 : i32
    scf.if %10 {
      %c0 = arith.constant 0 : index
      %c0_3 = arith.constant 0 : index
      %c0_4 = arith.constant 0 : index
      %11 = vector.load %arg8[%c0, %c0_3, %c0_4] : memref<4x16x128xf32, #tpu.memory_space<vmem>>, vector<1x16x128xf32>
      %12 = vector.shape_cast %11 : vector<1x16x128xf32> to vector<16x128xf32>
      %13 = vector.extract_strided_slice %12 {offsets = [8, 0], sizes = [1, 128], strides = [1, 1]} : vector<16x128xf32> to vector<1x128xf32>
      %cst = arith.constant 0.000000e+00 : f32
      %14 = vector.broadcast %cst : f32 to vector<1x128xf32>
      %15 = arith.cmpf ogt, %13, %14 : vector<1x128xf32>
      %cst_5 = arith.constant 1.000000e+00 : f32
      %16 = vector.broadcast %cst_5 : f32 to vector<1x128xf32>
      %17 = arith.select %15, %13, %16 : vector<1x128xi1>, vector<1x128xf32>
      %18 = tpu.reciprocal %17 {approx = true} : vector<1x128xf32> -> vector<1x128xf32>
      %19 = arith.mulf %17, %18 : vector<1x128xf32>
      %cst_6 = arith.constant 2.000000e+00 : f32
      %20 = vector.broadcast %cst_6 : f32 to vector<1x128xf32>
      %21 = arith.subf %20, %19 : vector<1x128xf32>
      %22 = arith.mulf %18, %21 : vector<1x128xf32>
      %23 = vector.broadcast %22 : vector<1x128xf32> to vector<16x128xf32>
      %24 = arith.mulf %12, %23 : vector<16x128xf32>
      %c0_7 = arith.constant 0 : index
      %c0_8 = arith.constant 0 : index
      %c0_9 = arith.constant 0 : index
      %25 = vector.load %arg8[%c0_7, %c0_8, %c0_9] : memref<4x16x128xf32, #tpu.memory_space<vmem>>, vector<1x16x128xf32>
      %26 = vector.shape_cast %25 : vector<1x16x128xf32> to vector<16x128xf32>
      %27 = vector.shape_cast %24 : vector<16x128xf32> to vector<1x16x128xf32>
      tpu.vector_store %arg8[%c0_7, %c0_8, %c0_9], %27 {strides = array<i32>} : memref<4x16x128xf32, #tpu.memory_space<vmem>>, vector<1x16x128xf32>,
      %c1 = arith.constant 1 : index
      %c0_10 = arith.constant 0 : index
      %c0_11 = arith.constant 0 : index
      %28 = vector.load %arg8[%c1, %c0_10, %c0_11] : memref<4x16x128xf32, #tpu.memory_space<vmem>>, vector<1x16x128xf32>
      %29 = vector.shape_cast %28 : vector<1x16x128xf32> to vector<16x128xf32>
      %30 = vector.extract_strided_slice %29 {offsets = [8, 0], sizes = [1, 128], strides = [1, 1]} : vector<16x128xf32> to vector<1x128xf32>
      %cst_12 = arith.constant 0.000000e+00 : f32
      %31 = vector.broadcast %cst_12 : f32 to vector<1x128xf32>
      %32 = arith.cmpf ogt, %30, %31 : vector<1x128xf32>
      %cst_13 = arith.constant 1.000000e+00 : f32
      %33 = vector.broadcast %cst_13 : f32 to vector<1x128xf32>
      %34 = arith.select %32, %30, %33 : vector<1x128xi1>, vector<1x128xf32>
      %35 = tpu.reciprocal %34 {approx = true} : vector<1x128xf32> -> vector<1x128xf32>
      %36 = arith.mulf %34, %35 : vector<1x128xf32>
      %cst_14 = arith.constant 2.000000e+00 : f32
      %37 = vector.broadcast %cst_14 : f32 to vector<1x128xf32>
      %38 = arith.subf %37, %36 : vector<1x128xf32>
      %39 = arith.mulf %35, %38 : vector<1x128xf32>
      %40 = vector.broadcast %39 : vector<1x128xf32> to vector<16x128xf32>
      %41 = arith.mulf %29, %40 : vector<16x128xf32>
      %c1_15 = arith.constant 1 : index
      %c0_16 = arith.constant 0 : index
      %c0_17 = arith.constant 0 : index
      %42 = vector.load %arg8[%c1_15, %c0_16, %c0_17] : memref<4x16x128xf32, #tpu.memory_space<vmem>>, vector<1x16x128xf32>
      %43 = vector.shape_cast %42 : vector<1x16x128xf32> to vector<16x128xf32>
      %44 = vector.shape_cast %41 : vector<16x128xf32> to vector<1x16x128xf32>
      tpu.vector_store %arg8[%c1_15, %c0_16, %c0_17], %44 {strides = array<i32>} : memref<4x16x128xf32, #tpu.memory_space<vmem>>, vector<1x16x128xf32>,
      %c2 = arith.constant 2 : index
      %c0_18 = arith.constant 0 : index
      %c0_19 = arith.constant 0 : index
      %45 = vector.load %arg8[%c2, %c0_18, %c0_19] : memref<4x16x128xf32, #tpu.memory_space<vmem>>, vector<1x16x128xf32>
      %46 = vector.shape_cast %45 : vector<1x16x128xf32> to vector<16x128xf32>
      %47 = vector.extract_strided_slice %46 {offsets = [8, 0], sizes = [1, 128], strides = [1, 1]} : vector<16x128xf32> to vector<1x128xf32>
      %cst_20 = arith.constant 0.000000e+00 : f32
      %48 = vector.broadcast %cst_20 : f32 to vector<1x128xf32>
      %49 = arith.cmpf ogt, %47, %48 : vector<1x128xf32>
      %cst_21 = arith.constant 1.000000e+00 : f32
      %50 = vector.broadcast %cst_21 : f32 to vector<1x128xf32>
      %51 = arith.select %49, %47, %50 : vector<1x128xi1>, vector<1x128xf32>
      %52 = tpu.reciprocal %51 {approx = true} : vector<1x128xf32> -> vector<1x128xf32>
      %53 = arith.mulf %51, %52 : vector<1x128xf32>
      %cst_22 = arith.constant 2.000000e+00 : f32
      %54 = vector.broadcast %cst_22 : f32 to vector<1x128xf32>
      %55 = arith.subf %54, %53 : vector<1x128xf32>
      %56 = arith.mulf %52, %55 : vector<1x128xf32>
      %57 = vector.broadcast %56 : vector<1x128xf32> to vector<16x128xf32>
      %58 = arith.mulf %46, %57 : vector<16x128xf32>
      %c2_23 = arith.constant 2 : index
      %c0_24 = arith.constant 0 : index
      %c0_25 = arith.constant 0 : index
      %59 = vector.load %arg8[%c2_23, %c0_24, %c0_25] : memref<4x16x128xf32, #tpu.memory_space<vmem>>, vector<1x16x128xf32>
      %60 = vector.shape_cast %59 : vector<1x16x128xf32> to vector<16x128xf32>
      %61 = vector.shape_cast %58 : vector<16x128xf32> to vector<1x16x128xf32>
      tpu.vector_store %arg8[%c2_23, %c0_24, %c0_25], %61 {strides = array<i32>} : memref<4x16x128xf32, #tpu.memory_space<vmem>>, vector<1x16x128xf32>,
      %c3 = arith.constant 3 : index
      %c0_26 = arith.constant 0 : index
      %c0_27 = arith.constant 0 : index
      %62 = vector.load %arg8[%c3, %c0_26, %c0_27] : memref<4x16x128xf32, #tpu.memory_space<vmem>>, vector<1x16x128xf32>
      %63 = vector.shape_cast %62 : vector<1x16x128xf32> to vector<16x128xf32>
      %64 = vector.extract_strided_slice %63 {offsets = [8, 0], sizes = [1, 128], strides = [1, 1]} : vector<16x128xf32> to vector<1x128xf32>
      %cst_28 = arith.constant 0.000000e+00 : f32
      %65 = vector.broadcast %cst_28 : f32 to vector<1x128xf32>
      %66 = arith.cmpf ogt, %64, %65 : vector<1x128xf32>
      %cst_29 = arith.constant 1.000000e+00 : f32
      %67 = vector.broadcast %cst_29 : f32 to vector<1x128xf32>
      %68 = arith.select %66, %64, %67 : vector<1x128xi1>, vector<1x128xf32>
      %69 = tpu.reciprocal %68 {approx = true} : vector<1x128xf32> -> vector<1x128xf32>
      %70 = arith.mulf %68, %69 : vector<1x128xf32>
      %cst_30 = arith.constant 2.000000e+00 : f32
      %71 = vector.broadcast %cst_30 : f32 to vector<1x128xf32>
      %72 = arith.subf %71, %70 : vector<1x128xf32>
      %73 = arith.mulf %69, %72 : vector<1x128xf32>
      %74 = vector.broadcast %73 : vector<1x128xf32> to vector<16x128xf32>
      %75 = arith.mulf %63, %74 : vector<16x128xf32>
      %c3_31 = arith.constant 3 : index
      %c0_32 = arith.constant 0 : index
      %c0_33 = arith.constant 0 : index
      %76 = vector.load %arg8[%c3_31, %c0_32, %c0_33] : memref<4x16x128xf32, #tpu.memory_space<vmem>>, vector<1x16x128xf32>
      %77 = vector.shape_cast %76 : vector<1x16x128xf32> to vector<16x128xf32>
      %78 = vector.shape_cast %75 : vector<16x128xf32> to vector<1x16x128xf32>
      tpu.vector_store %arg8[%c3_31, %c0_32, %c0_33], %78 {strides = array<i32>} : memref<4x16x128xf32, #tpu.memory_space<vmem>>, vector<1x16x128xf32>,
    } else {
    }
    return
  }
  func.func @transform_0(%arg0: i32, %arg1: i32, %arg2: memref<2x2xi32, #tpu.memory_space<smem>>, %arg3: memref<2xi32, #tpu.memory_space<smem>>) -> (i32, i32, i32) {
    %0 = arith.index_cast %arg0 : i32 to index
    %1 = arith.index_cast %arg1 : i32 to index
    %2 = memref.load %arg2[%0, %1] : memref<2x2xi32, #tpu.memory_space<smem>>
    %c0_i32 = arith.constant 0 : i32
    %c0_i32_0 = arith.constant 0 : i32
    %c0_i32_1 = arith.constant 0 : i32
    return %c0_i32, %c0_i32_0, %2 : i32, i32, i32
  }
  func.func @transform_1(%arg0: i32, %arg1: i32, %arg2: memref<2x2xi32, #tpu.memory_space<smem>>, %arg3: memref<2xi32, #tpu.memory_space<smem>>) -> (i32, i32, i32) {
    %0 = arith.index_cast %arg0 : i32 to index
    %1 = arith.index_cast %arg1 : i32 to index
    %2 = memref.load %arg2[%0, %1] : memref<2x2xi32, #tpu.memory_space<smem>>
    %c0_i32 = arith.constant 0 : i32
    %c0_i32_0 = arith.constant 0 : i32
    %c0_i32_1 = arith.constant 0 : i32
    return %c0_i32, %2, %c0_i32_0 : i32, i32, i32
  }
  func.func @transform_2(%arg0: i32, %arg1: i32, %arg2: memref<2x2xi32, #tpu.memory_space<smem>>, %arg3: memref<2xi32, #tpu.memory_space<smem>>) -> (i32, i32, i32) {
    %c0_i32 = arith.constant 0 : i32
    %c0_i32_0 = arith.constant 0 : i32
    %c0_i32_1 = arith.constant 0 : i32
    return %c0_i32, %c0_i32_0, %arg0 : i32, i32, i32
  }
  func.func @transform_3(%arg0: i32, %arg1: i32, %arg2: memref<2x2xi32, #tpu.memory_space<smem>>, %arg3: memref<2xi32, #tpu.memory_space<smem>>) -> (i32, i32, i32) {
    %0 = arith.index_cast %arg0 : i32 to index
    %1 = arith.index_cast %arg1 : i32 to index
    %2 = memref.load %arg2[%0, %1] : memref<2x2xi32, #tpu.memory_space<smem>>
    %c0_i32 = arith.constant 0 : i32
    %c0_i32_0 = arith.constant 0 : i32
    return %c0_i32, %2, %arg0 : i32, i32, i32
  }
  func.func @transform_4(%arg0: i32, %arg1: i32, %arg2: memref<2x2xi32, #tpu.memory_space<smem>>, %arg3: memref<2xi32, #tpu.memory_space<smem>>) -> (i32, i32, i32) {
    %c0_i32 = arith.constant 0 : i32
    %c0_i32_0 = arith.constant 0 : i32
    %c0_i32_1 = arith.constant 0 : i32
    return %c0_i32, %c0_i32_0, %arg0 : i32, i32, i32
  }
}

</mosaic_0001>

<bundles_post_ra>
// kernel: sa_layer_forward.1
= control target key start
LH: loop header
LB: loop body
LE: loop exit
PB: predicated region body
PF: predicated region fallthrough
CT: control target
= control target key end

     0   :  { %s5006_s0 = inlined_call_operand.vmem [shape: s32[2,2], index: 0, kind: input, shape index: {}]   ;;  %s5007_s2 = inlined_call_operand.vmem [shape: f32[4,16,256], index: 2, kind: input, shape index: {}]   ;;  %s5008_s3 = inlined_call_operand.vmem [shape: f32[4,256,1], index: 3, kind: input, shape index: {}]   ;;  %s5009_s4 = inlined_call_operand.vmem [shape: f32[4,1,256], index: 4, kind: input, shape index: {}]   ;;  %s5010_s5 = inlined_call_operand.vmem [shape: f32[4,256,256], index: 5, kind: input, shape index: {}]   ;;  %s5011_s6 = inlined_call_operand.vmem [shape: f32[4,16,256], index: 6, kind: output, shape index: {}]   ;;  %s5012_s1 = inlined_call_operand.vmem [shape: s32[2], index: 1, kind: input, shape index: {}]  }
   0x1   :  { %5035 = sst [smem:[#allocation37_spill]] %s5010_s5  ;;  %s11_s23 = sshll.u32 %s5006_s0, 4  ;;  %s12_s23 = int_to_ptr.vmem [resolvable:$true] %s11_s23 }
   0x2   :  { %5036 = sst [smem:[#allocation38_spill]] %s5011_s6  ;;  %s15_s26 = sshll.u32 %s5012_s1, 4  ;;  %s16_s26 = int_to_ptr.vmem [resolvable:$true] %s15_s26 }
   0x3   :  { %s3610_s27 = scalar_lea.vmem %s12_s23, 32  ;;  %p3615_p1 = scmp.lt.s32.totalorder %s12_s23, %s12_s23 }
   0x4   :  { %p3611_p0 = scmp.ne.s32.totalorder %s12_s23, %s3610_s27  ;;  %p3616_p2 = scmp.lt.s32.totalorder %s3610_s27, %s3610_s27 }
   0x6   :  { %p3617_p3 = por %p3616_p2, %p3615_p1 }
   0x8   :  { %p3618_p4 = pnand %p3617_p3, %p3611_p0 }
   0xa   :  { %3621 = shalt.err (!%p3618_p4)  }
   0xb   :  { %s3740_s28 = smov [#allocation4]   ;;  %s3622_s29 = scalar_lea.vmem %s16_s26, 16 }
   0xc   :  { %14 = dma.vmem_to_smem %s12_s23, 32, %s3740_s28, [#allocation3] }
   0xd   :  { %p3623_p5 = scmp.ne.s32.totalorder %s16_s26, %s3622_s29  ;;  %p3627_p6 = scmp.lt.s32.totalorder %s16_s26, %s16_s26 }
   0xe   :  { %p3628_p7 = scmp.lt.s32.totalorder %s3622_s29, %s3622_s29 }
  0x10   :  { %p3629_p8 = por %p3628_p7, %p3627_p6 }
  0x12   :  { %p3630_p9 = pnand %p3629_p8, %p3623_p5 }
  0x14   :  { %3633 = shalt.err (!%p3630_p9)  }
  0x15   :  { %s3741_s0 = smov [#allocation5]  }
  0x16   :  { %18 = dma.vmem_to_smem %s16_s26, 16, %s3741_s0, [#allocation3] }
  0x17   :  { %3686 = dma.done.wait [#allocation3], 48 }
  0x18   :  { %3687 = vsyncadd [#allocation3], 4294967248 }
  0x19   :  { %20 = sfence }
  0x1a   :  { %s3786_s1 = smov 0   ;;  %s3788_s30 = smov 0  }
  0x1b   :  { %s3790_s7 = smov 0   ;;  %s3792_s8 = smov 0  }
  0x1c   :  { %s3794_s9 = smov 0   ;;  %s3796_s10 = smov 0  }
  0x1d   :  { %s3798_s11 = smov 0   ;;  %s3800_s12 = smov 0  }
  0x1e   :  { %s3802_s13 = smov 0   ;;  %s3804_s14 = smov 0  }
  0x1f   :  { %s3806_s15 = smov 0   ;;  %s3808_s16 = smov 0  }
  0x20   :  { %s3810_s17 = smov 0  }
  0x21 LB: > { %5037 = sst [smem:[#allocation12_spill]] %s3706_s9  ;;  %s35_s19 = sadd.s32 1, %s3730_s15  ;;  %s3738_s17 = sphi %s3810_s17, %s26_s17   ;;  %s3734_s16 = sphi %s3808_s16, %s5109_s16   ;;  %s3730_s15 = sphi %s3806_s15, %s5108_s15   ;;  %s3726_s14 = sphi %s3804_s14, %s5107_s14   ;;  %s3722_s13 = sphi %s3802_s13, %s5096_s13   ;;  %s3718_s12 = sphi %s3800_s12, %s5106_s12   ;;  %s3714_s11 = sphi %s3798_s11, %s5105_s11   ;;  %s3710_s10 = sphi %s3796_s10, %s5104_s10   ;;  %s3706_s9 = sphi %s3794_s9, %s5103_s9   ;;  %s3702_s8 = sphi %s3792_s8, %s5102_s8   ;;  %s3698_s7 = sphi %s3790_s7, %s5101_s7   ;;  %s3694_s30 = sphi %s3788_s30, %s5100_s30   ;;  %s3690_s1 = sphi %s3786_s1, %s5099_s1  }
  0x22   : > { %5038 = sst [smem:[#allocation13_spill]] %s3714_s11  ;;  %p36_p10 = scmp.ge.s32.totalorder %s35_s19, 2 }
  0x23   : > { %5039 = sst [smem:[#allocation14_spill]] %s3722_s13  ;;  %s38_s20 = sadd.s32 1, %s3734_s16 }
  0x24   : > { %5040 = sst [smem:[#allocation15_spill]] %s3726_s14  ;;  %s42_s21 = sshra.s32 %s3730_s15, 7 }
  0x25   : > { %5041 = sst [smem:[#allocation16_spill]] %s3730_s15  ;;  %s47_s22 = sand.u32 127, %s3730_s15 }
  0x26   : > { %s5111_s19 = smov (%p36_p10, %s35_s19), 0  ;;  %s5113_s20 = smov (!%p36_p10, %s38_s20), %s3734_s16 }
  0x27   : > { %5042 = sst [smem:[#allocation17_spill]] %s5111_s19  ;;  %s44_s23 = sadd.s32 %s3734_s16, %s42_s21 }
  0x28   : > { %s50_s24 = sshra.s32 %s5111_s19, 7  ;;  %p40_p11 = scmp.ge.s32.totalorder %s5113_s20, 2 }
  0x29   : > { %s2846_s25 = sshll.u32 %s44_s23, 7  ;;  %s55_s27 = sand.u32 127, %s5111_s19 }
  0x2a   : > { %s3861_s26 = sadd.s32 %s2846_s25, %s47_s22  ;;  %s5115_s20 = smov (%p40_p11, %s5113_s20), 0 }
  0x2b   : > { %5043 = sst [smem:[#allocation18_spill]] %s5115_s20  ;;  %s61_s29 = sadd.s32 1, %s3718_s12 }
  0x2c   : > { %s49_s28 = sld [smem:[#allocation4 + %s3861_s26]]  ;;  %s52_s0 = sadd.s32 %s50_s24, %s5115_s20 }
  0x2d   : > { %p68_p12 = scmp.ne.s32.totalorder %s3718_s12, %s3714_s11  ;;  %s2847_s21 = sshll.u32 %s52_s0, 7 }
  0x2e   : > { %p69_p13 = scmp.eq.s32.totalorder %s3738_s17, 0  ;;  %s56_s22 = sadd.s32 %s2847_s21, %s55_s27 }
  0x2f   : > { %s91_s23 = sld [smem:[#allocation4 + %s3861_s26]]  ;;  %s103_s24 = sadd.s32 1, %s3710_s10 }
  0x30   : > { %s57_s25 = sld [smem:[#allocation4 + %s56_s22]]  ;;  %p3875_p0 = por %p69_p13, %p68_p12 }
  0x31   : > { %s99_s19 = sld [smem:[#allocation4 + %s56_s22]]  ;;  %p110_p1 = scmp.ne.s32.totalorder %s3710_s10, %s3706_s9 }
  0x32   : > { %s126_s0 = ssub.s32 %s3734_s16, %s5115_s20  ;;  %s129_s27 = sadd.s32 1, %s3702_s8 }
  0x33   : > { %p127_p2 = scmp.eq.s32.totalorder %s126_s0, 0  ;;  %p3887_p3 = por %p110_p1, %p69_p13 }
  0x34   : > { %p136_p4 = scmp.ne.s32.totalorder %s3702_s8, %s3698_s7  ;;  %s159_s13 = sld [smem:[#allocation4 + %s3861_s26]] }
  0x35   : > { %s3894_s15 = scalar_select %p127_p2, %s3702_s8, %s129_s27  }
  0x36   : > { %s58_s6 = ssub.s32 %s49_s28, %s57_s25  ;;  %p3901_p5 = por %p136_p4, %p69_p13 }
  0x37   : > { %p59_p6 = scmp.eq.s32.totalorder %s58_s6, 0  ;;  %s100_s14 = ssub.s32 %s91_s23, %s99_s19 }
  0x38   : > { %p101_p7 = scmp.eq.s32.totalorder %s100_s14, 0  ;;  %s167_s5 = sld [smem:[#allocation4 + %s56_s22]] }
  0x39   : > { %s3907_s9 = scalar_select %p59_p6, %s3718_s12, %s61_s29  }
  0x3a   : > { %s3910_s11 = scalar_select %p101_p7, %s3710_s10, %s103_s24  }
  0x3b   : > { %5047 = sst [smem:[#allocation19_spill]] %s3907_s9  ;;  %p180_p8 = scmp.ne.s32.totalorder %s3694_s30, %s3690_s1 }
  0x3c   : > { %5048 = sst [smem:[#allocation20_spill]] %s3910_s11  ;;  %s5049_s27 = sadd.s32 4294967295, %s3738_s17  }
  0x3d   : > { %p210_p9 = scmp.eq.s32.totalorder %s5049_s27, 3  ;;  %p3918_p10 = por %p180_p8, %p69_p13 }
  0x3e   : > { %s168_s6 = ssub.s32 %s159_s13, %s167_s5  ;;  %s173_s19 = sadd.s32 1, %s3694_s30 }
  0x3f   : > { %p3925_p11 = por %p210_p9, %p136_p4  ;;  %s170_s14 = sor.u32 %s168_s6, %s126_s0 }
  0x40   : > { %p171_p12 = scmp.eq.s32.totalorder %s170_s14, 0  ;;  %p2853_p1 = scmp.ge.s32.totalorder %s3738_s17, 4 }
  0x42   : > { %s3931_s29 = scalar_select %p171_p12, %s3694_s30, %s173_s19  }
  0x43   : > { %232 = sbr.rel (%p2853_p1) target bundleno = 180 (0xb4), region = 16 }
  0x4a   : > { %235 = sbr.rel (!%p3875_p0) target bundleno = 88 (0x58), region = 20  ;;  %s237_s22 = sand.u32 (%p3875_p0), 1, %s3718_s12  }
  0x4b   : > { %s247_s23 = sld [smem:[#allocation4 + %s3861_s26]] (%p3875_p0)  ;;  %s2854_s24 = sshll.u32 (%p3875_p0), %s237_s22, 6 }
  0x4c   : > { %s239_s13 = scalar_lea.vmem (%p3875_p0), [#allocation6], %s2854_s24 }
  0x51   : > { %s2856_s27 = sshll.u32 %s247_s23, 3 }
  0x52   : > { %s249_s5 = scalar_lea.vmem %s5007_s2, %s2856_s27 }
  0x53   : > { %v291_v0 = vld [vmem:[%s249_s5] sm:$0xff]  ;;  %v293_v1 = vld [vmem:[%s249_s5 + $0x10] sm:$0xff] }
  0x54   : > { %v295_v2 = vld [vmem:[%s249_s5 + $0x20] sm:$0xff]  ;;  %292 = vst [vmem:[%s239_s13] sm:$0xff] %v291_v0  ;;  %294 = vst [vmem:[%s239_s13 + $0x8] sm:$0xff] %v293_v1  ;;  %v297_v3 = vld [vmem:[%s249_s5 + $0x30] sm:$0xff] }
  0x55   : > { %296 = vst [vmem:[%s239_s13 + $0x10] sm:$0xff] %v295_v2  ;;  %v299_v4 = vld [vmem:[%s249_s5 + $0x40] sm:$0xff]  ;;  %v301_v5 = vld [vmem:[%s249_s5 + $0x50] sm:$0xff]  ;;  %298 = vst [vmem:[%s239_s13 + $0x18] sm:$0xff] %v297_v3 }
  0x56   : > { %300 = vst [vmem:[%s239_s13 + $0x20] sm:$0xff] %v299_v4  ;;  %302 = vst [vmem:[%s239_s13 + $0x28] sm:$0xff] %v301_v5  ;;  %v303_v6 = vld [vmem:[%s249_s5 + $0x60] sm:$0xff]  ;;  %v305_v7 = vld [vmem:[%s249_s5 + $0x70] sm:$0xff] }
  0x57   : > { %304 = vst [vmem:[%s239_s13 + $0x30] sm:$0xff] %v303_v6  ;;  %306 = vst [vmem:[%s239_s13 + $0x38] sm:$0xff] %v305_v7 }
  0x58 PF: > { %312 = sbr.rel (!%p3887_p3) target bundleno = 130 (0x82), region = 58  ;;  %s314_s9 = sand.u32 (%p3887_p3), 1, %s3710_s10  }
  0x59   : > { %s324_s11 = sld [smem:[#allocation4 + %s3861_s26]] (%p3887_p3)  ;;  %s2857_s18 = sshll.u32 (%p3887_p3), %s314_s9, 9 }
  0x5a   : > { %s3953_s21 = scalar_lea.vmem (%p3887_p3), [#allocation7], %s2857_s18 }
  0x5f   : > { %s3013_s0 = sshll.u32 %s324_s11, 7 }
  0x60   : > { %s3948_s19 = scalar_lea.vmem %s5008_s3, %s3013_s0 }
  0x61   : > { %v481_v8 = vld [vmem:[%s3948_s19] sm:$0xff]  ;;  %v483_v9 = vld [vmem:[%s3948_s19 + $0x8] sm:$0xff]  ;;  %v485_v10 = vld [vmem:[%s3948_s19 + $0x10] sm:$0xff] }
  0x62   : > { %482 = vst [vmem:[%s3953_s21] sm:$0xff] %v481_v8  ;;  %484 = vst [vmem:[%s3953_s21 + $0x8] sm:$0xff] %v483_v9  ;;  %v487_v11 = vld [vmem:[%s3948_s19 + $0x18] sm:$0xff]  ;;  %v489_v12 = vld [vmem:[%s3948_s19 + $0x20] sm:$0xff] }
  0x63   : > { %486 = vst [vmem:[%s3953_s21 + $0x10] sm:$0xff] %v485_v10  ;;  %v491_v13 = vld [vmem:[%s3948_s19 + $0x28] sm:$0xff]  ;;  %488 = vst [vmem:[%s3953_s21 + $0x18] sm:$0xff] %v487_v11  ;;  %v493_v14 = vld [vmem:[%s3948_s19 + $0x30] sm:$0xff] }
  0x64   : > { %490 = vst [vmem:[%s3953_s21 + $0x20] sm:$0xff] %v489_v12  ;;  %492 = vst [vmem:[%s3953_s21 + $0x28] sm:$0xff] %v491_v13  ;;  %v495_v15 = vld [vmem:[%s3948_s19 + $0x38] sm:$0xff]  ;;  %v497_v16 = vld [vmem:[%s3948_s19 + $0x40] sm:$0xff] }
  0x65   : > { %494 = vst [vmem:[%s3953_s21 + $0x30] sm:$0xff] %v493_v14  ;;  %496 = vst [vmem:[%s3953_s21 + $0x38] sm:$0xff] %v495_v15  ;;  %v499_v17 = vld [vmem:[%s3948_s19 + $0x48] sm:$0xff]  ;;  %v501_v18 = vld [vmem:[%s3948_s19 + $0x50] sm:$0xff] }
  0x66   : > { %498 = vst [vmem:[%s3953_s21 + $0x40] sm:$0xff] %v497_v16  ;;  %v503_v19 = vld [vmem:[%s3948_s19 + $0x58] sm:$0xff]  ;;  %500 = vst [vmem:[%s3953_s21 + $0x48] sm:$0xff] %v499_v17  ;;  %v505_v20 = vld [vmem:[%s3948_s19 + $0x60] sm:$0xff] }
  0x67   : > { %502 = vst [vmem:[%s3953_s21 + $0x50] sm:$0xff] %v501_v18  ;;  %504 = vst [vmem:[%s3953_s21 + $0x58] sm:$0xff] %v503_v19  ;;  %v507_v21 = vld [vmem:[%s3948_s19 + $0x68] sm:$0xff]  ;;  %v509_v22 = vld [vmem:[%s3948_s19 + $0x70] sm:$0xff] }
  0x68   : > { %506 = vst [vmem:[%s3953_s21 + $0x60] sm:$0xff] %v505_v20  ;;  %508 = vst [vmem:[%s3953_s21 + $0x68] sm:$0xff] %v507_v21  ;;  %v511_v23 = vld [vmem:[%s3948_s19 + $0x78] sm:$0xff]  ;;  %v513_v24 = vld [vmem:[%s3948_s19 + $0x100] sm:$0xff] }
  0x69   : > { %510 = vst [vmem:[%s3953_s21 + $0x70] sm:$0xff] %v509_v22  ;;  %v515_v25 = vld [vmem:[%s3948_s19 + $0x108] sm:$0xff]  ;;  %512 = vst [vmem:[%s3953_s21 + $0x78] sm:$0xff] %v511_v23  ;;  %v517_v26 = vld [vmem:[%s3948_s19 + $0x110] sm:$0xff] }
  0x6a   : > { %514 = vst [vmem:[%s3953_s21 + $0x80] sm:$0xff] %v513_v24  ;;  %516 = vst [vmem:[%s3953_s21 + $0x88] sm:$0xff] %v515_v25  ;;  %v519_v27 = vld [vmem:[%s3948_s19 + $0x118] sm:$0xff]  ;;  %v521_v28 = vld [vmem:[%s3948_s19 + $0x120] sm:$0xff] }
  0x6b   : > { %518 = vst [vmem:[%s3953_s21 + $0x90] sm:$0xff] %v517_v26  ;;  %520 = vst [vmem:[%s3953_s21 + $0x98] sm:$0xff] %v519_v27  ;;  %v523_v29 = vld [vmem:[%s3948_s19 + $0x128] sm:$0xff]  ;;  %v525_v30 = vld [vmem:[%s3948_s19 + $0x130] sm:$0xff] }
  0x6c   : > { %522 = vst [vmem:[%s3953_s21 + $0xa0] sm:$0xff] %v521_v28  ;;  %v527_v31 = vld [vmem:[%s3948_s19 + $0x138] sm:$0xff]  ;;  %524 = vst [vmem:[%s3953_s21 + $0xa8] sm:$0xff] %v523_v29  ;;  %v529_v32 = vld [vmem:[%s3948_s19 + $0x140] sm:$0xff] }
  0x6d   : > { %526 = vst [vmem:[%s3953_s21 + $0xb0] sm:$0xff] %v525_v30  ;;  %528 = vst [vmem:[%s3953_s21 + $0xb8] sm:$0xff] %v527_v31  ;;  %v531_v33 = vld [vmem:[%s3948_s19 + $0x148] sm:$0xff]  ;;  %v533_v34 = vld [vmem:[%s3948_s19 + $0x150] sm:$0xff] }
  0x6e   : > { %530 = vst [vmem:[%s3953_s21 + $0xc0] sm:$0xff] %v529_v32  ;;  %532 = vst [vmem:[%s3953_s21 + $0xc8] sm:$0xff] %v531_v33  ;;  %v535_v35 = vld [vmem:[%s3948_s19 + $0x158] sm:$0xff]  ;;  %v537_v36 = vld [vmem:[%s3948_s19 + $0x160] sm:$0xff] }
  0x6f   : > { %534 = vst [vmem:[%s3953_s21 + $0xd0] sm:$0xff] %v533_v34  ;;  %v539_v37 = vld [vmem:[%s3948_s19 + $0x168] sm:$0xff]  ;;  %536 = vst [vmem:[%s3953_s21 + $0xd8] sm:$0xff] %v535_v35  ;;  %v541_v38 = vld [vmem:[%s3948_s19 + $0x170] sm:$0xff] }
  0x70   : > { %538 = vst [vmem:[%s3953_s21 + $0xe0] sm:$0xff] %v537_v36  ;;  %540 = vst [vmem:[%s3953_s21 + $0xe8] sm:$0xff] %v539_v37  ;;  %v543_v39 = vld [vmem:[%s3948_s19 + $0x178] sm:$0xff]  ;;  %v545_v40 = vld [vmem:[%s3948_s19 + $0x200] sm:$0xff] }
  0x71   : > { %542 = vst [vmem:[%s3953_s21 + $0xf0] sm:$0xff] %v541_v38  ;;  %544 = vst [vmem:[%s3953_s21 + $0xf8] sm:$0xff] %v543_v39  ;;  %v547_v41 = vld [vmem:[%s3948_s19 + $0x208] sm:$0xff]  ;;  %v549_v42 = vld [vmem:[%s3948_s19 + $0x210] sm:$0xff] }
  0x72   : > { %546 = vst [vmem:[%s3953_s21 + $0x100] sm:$0xff] %v545_v40  ;;  %v551_v43 = vld [vmem:[%s3948_s19 + $0x218] sm:$0xff]  ;;  %548 = vst [vmem:[%s3953_s21 + $0x108] sm:$0xff] %v547_v41  ;;  %v553_v44 = vld [vmem:[%s3948_s19 + $0x220] sm:$0xff] }
  0x73   : > { %550 = vst [vmem:[%s3953_s21 + $0x110] sm:$0xff] %v549_v42  ;;  %552 = vst [vmem:[%s3953_s21 + $0x118] sm:$0xff] %v551_v43  ;;  %v555_v45 = vld [vmem:[%s3948_s19 + $0x228] sm:$0xff]  ;;  %v557_v46 = vld [vmem:[%s3948_s19 + $0x230] sm:$0xff] }
  0x74   : > { %554 = vst [vmem:[%s3953_s21 + $0x120] sm:$0xff] %v553_v44  ;;  %556 = vst [vmem:[%s3953_s21 + $0x128] sm:$0xff] %v555_v45  ;;  %v559_v47 = vld [vmem:[%s3948_s19 + $0x238] sm:$0xff]  ;;  %v561_v48 = vld [vmem:[%s3948_s19 + $0x240] sm:$0xff] }
  0x75   : > { %558 = vst [vmem:[%s3953_s21 + $0x130] sm:$0xff] %v557_v46  ;;  %v563_v49 = vld [vmem:[%s3948_s19 + $0x248] sm:$0xff]  ;;  %560 = vst [vmem:[%s3953_s21 + $0x138] sm:$0xff] %v559_v47  ;;  %v565_v50 = vld [vmem:[%s3948_s19 + $0x250] sm:$0xff] }
  0x76   : > { %562 = vst [vmem:[%s3953_s21 + $0x140] sm:$0xff] %v561_v48  ;;  %564 = vst [vmem:[%s3953_s21 + $0x148] sm:$0xff] %v563_v49  ;;  %v567_v51 = vld [vmem:[%s3948_s19 + $0x258] sm:$0xff]  ;;  %v569_v52 = vld [vmem:[%s3948_s19 + $0x260] sm:$0xff] }
  0x77   : > { %566 = vst [vmem:[%s3953_s21 + $0x150] sm:$0xff] %v565_v50  ;;  %568 = vst [vmem:[%s3953_s21 + $0x158] sm:$0xff] %v567_v51  ;;  %v571_v53 = vld [vmem:[%s3948_s19 + $0x268] sm:$0xff]  ;;  %v573_v54 = vld [vmem:[%s3948_s19 + $0x270] sm:$0xff] }
  0x78   : > { %570 = vst [vmem:[%s3953_s21 + $0x160] sm:$0xff] %v569_v52  ;;  %v575_v55 = vld [vmem:[%s3948_s19 + $0x278] sm:$0xff]  ;;  %572 = vst [vmem:[%s3953_s21 + $0x168] sm:$0xff] %v571_v53  ;;  %v577_v56 = vld [vmem:[%s3948_s19 + $0x300] sm:$0xff] }
  0x79   : > { %574 = vst [vmem:[%s3953_s21 + $0x170] sm:$0xff] %v573_v54  ;;  %576 = vst [vmem:[%s3953_s21 + $0x178] sm:$0xff] %v575_v55  ;;  %v579_v57 = vld [vmem:[%s3948_s19 + $0x308] sm:$0xff]  ;;  %v581_v58 = vld [vmem:[%s3948_s19 + $0x310] sm:$0xff] }
  0x7a   : > { %578 = vst [vmem:[%s3953_s21 + $0x180] sm:$0xff] %v577_v56  ;;  %580 = vst [vmem:[%s3953_s21 + $0x188] sm:$0xff] %v579_v57  ;;  %v583_v59 = vld [vmem:[%s3948_s19 + $0x318] sm:$0xff]  ;;  %v585_v60 = vld [vmem:[%s3948_s19 + $0x320] sm:$0xff] }
  0x7b   : > { %582 = vst [vmem:[%s3953_s21 + $0x190] sm:$0xff] %v581_v58  ;;  %v587_v61 = vld [vmem:[%s3948_s19 + $0x328] sm:$0xff]  ;;  %584 = vst [vmem:[%s3953_s21 + $0x198] sm:$0xff] %v583_v59  ;;  %v589_v62 = vld [vmem:[%s3948_s19 + $0x330] sm:$0xff] }
  0x7c   : > { %586 = vst [vmem:[%s3953_s21 + $0x1a0] sm:$0xff] %v585_v60  ;;  %588 = vst [vmem:[%s3953_s21 + $0x1a8] sm:$0xff] %v587_v61  ;;  %v591_v63 = vld [vmem:[%s3948_s19 + $0x338] sm:$0xff]  ;;  %v593_v0 = vld [vmem:[%s3948_s19 + $0x340] sm:$0xff] }
  0x7d   : > { %590 = vst [vmem:[%s3953_s21 + $0x1b0] sm:$0xff] %v589_v62  ;;  %592 = vst [vmem:[%s3953_s21 + $0x1b8] sm:$0xff] %v591_v63  ;;  %v595_v1 = vld [vmem:[%s3948_s19 + $0x348] sm:$0xff]  ;;  %v597_v2 = vld [vmem:[%s3948_s19 + $0x350] sm:$0xff] }
  0x7e   : > { %594 = vst [vmem:[%s3953_s21 + $0x1c0] sm:$0xff] %v593_v0  ;;  %v599_v3 = vld [vmem:[%s3948_s19 + $0x358] sm:$0xff]  ;;  %596 = vst [vmem:[%s3953_s21 + $0x1c8] sm:$0xff] %v595_v1  ;;  %v601_v4 = vld [vmem:[%s3948_s19 + $0x360] sm:$0xff] }
  0x7f   : > { %598 = vst [vmem:[%s3953_s21 + $0x1d0] sm:$0xff] %v597_v2  ;;  %600 = vst [vmem:[%s3953_s21 + $0x1d8] sm:$0xff] %v599_v3  ;;  %v603_v5 = vld [vmem:[%s3948_s19 + $0x368] sm:$0xff]  ;;  %v605_v6 = vld [vmem:[%s3948_s19 + $0x370] sm:$0xff] }
  0x80   : > { %602 = vst [vmem:[%s3953_s21 + $0x1e0] sm:$0xff] %v601_v4  ;;  %604 = vst [vmem:[%s3953_s21 + $0x1e8] sm:$0xff] %v603_v5  ;;  %v607_v7 = vld [vmem:[%s3948_s19 + $0x378] sm:$0xff] }
  0x81   : > { %606 = vst [vmem:[%s3953_s21 + $0x1f0] sm:$0xff] %v605_v6  ;;  %608 = vst [vmem:[%s3953_s21 + $0x1f8] sm:$0xff] %v607_v7 }
  0x82 PF: > { %614 = sbr.rel (!%p3901_p5) target bundleno = 137 (0x89), region = 96  ;;  %s616_s22 = sand.u32 (%p3901_p5), 1, %s3702_s8  }
  0x83   : > { %s619_s27 = scalar_lea.vmem (%p3901_p5), %s5009_s4, %s3734_s16  ;;  %s2861_s5 = sshll.u32 (%p3901_p5), %s616_s22, 2 }
  0x84   : > { %v635_v8 = vld [vmem:[%s619_s27] sm:$0x1] (%p3901_p5)  ;;  %v637_v9 = vld [vmem:[%s619_s27 + $0x2] sm:$0x1] (%p3901_p5)  ;;  %v639_v10 = vld [vmem:[%s619_s27 + $0x4] sm:$0x1] (%p3901_p5) }
  0x85   : > { %v641_v11 = vld [vmem:[%s619_s27 + $0x6] sm:$0x1] (%p3901_p5)  ;;  %s618_s13 = scalar_lea.vmem (%p3901_p5), [#allocation8], %s2861_s5 }
  0x86   : > { %636 = vst [vmem:[%s618_s13] sm:$0x1] (%p3901_p5), %v635_v8  ;;  %638 = vst [vmem:[%s618_s13 + $0x1] sm:$0x1] (%p3901_p5), %v637_v9 }
  0x87   : > { %640 = vst [vmem:[%s618_s13 + $0x2] sm:$0x1] (%p3901_p5), %v639_v10  ;;  %642 = vst [vmem:[%s618_s13 + $0x3] sm:$0x1] (%p3901_p5), %v641_v11 }
  0x89 PF: > { %665 = sbr.rel (!%p3918_p10) target bundleno = 180 (0xb4), region = 130  ;;  %s677_s20 = sld [smem:[#allocation4 + %s3861_s26]] (%p3918_p10) }
  0x8a   : > { %s667_s9 = sand.u32 (%p3918_p10), 1, %s3694_s30   ;;  %s5052_s21 = sld [smem:[#allocation37_spill]] (%p3918_p10) }
  0x8b   : > { %s2862_s11 = sshll.u32 (%p3918_p10), %s667_s9, 9 }
  0x8c   : > { %s4100_s26 = scalar_lea.vmem (%p3918_p10), [#allocation9], %s2862_s11 }
  0x8f   : > { %s3014_s18 = sshll.u32 (%p3918_p10), %s677_s20, 5 }
  0x90   : > { %s680_s0 = sadd.s32 %s3734_s16, %s3014_s18 }
  0x91   : > { %s2866_s6 = sshll.u32 %s680_s0, 3 }
  0x92   : > { %s4095_s22 = scalar_lea.vmem %s5052_s21, %s2866_s6 }
  0x93   : > { %v836_v12 = vld [vmem:[%s4095_s22] sm:$0xff]  ;;  %v838_v13 = vld [vmem:[%s4095_s22 + $0x10] sm:$0xff] }
  0x94   : > { %v840_v14 = vld [vmem:[%s4095_s22 + $0x20] sm:$0xff]  ;;  %837 = vst [vmem:[%s4100_s26] sm:$0xff] %v836_v12  ;;  %839 = vst [vmem:[%s4100_s26 + $0x8] sm:$0xff] %v838_v13  ;;  %v842_v15 = vld [vmem:[%s4095_s22 + $0x30] sm:$0xff] }
  0x95   : > { %841 = vst [vmem:[%s4100_s26 + $0x10] sm:$0xff] %v840_v14  ;;  %v844_v16 = vld [vmem:[%s4095_s22 + $0x40] sm:$0xff]  ;;  %v846_v17 = vld [vmem:[%s4095_s22 + $0x50] sm:$0xff]  ;;  %843 = vst [vmem:[%s4100_s26 + $0x18] sm:$0xff] %v842_v15 }
  0x96   : > { %845 = vst [vmem:[%s4100_s26 + $0x20] sm:$0xff] %v844_v16  ;;  %847 = vst [vmem:[%s4100_s26 + $0x28] sm:$0xff] %v846_v17  ;;  %v848_v18 = vld [vmem:[%s4095_s22 + $0x60] sm:$0xff]  ;;  %v850_v19 = vld [vmem:[%s4095_s22 + $0x70] sm:$0xff] }
  0x97   : > { %v852_v20 = vld [vmem:[%s4095_s22 + $0x80] sm:$0xff]  ;;  %849 = vst [vmem:[%s4100_s26 + $0x30] sm:$0xff] %v848_v18  ;;  %851 = vst [vmem:[%s4100_s26 + $0x38] sm:$0xff] %v850_v19  ;;  %v854_v21 = vld [vmem:[%s4095_s22 + $0x90] sm:$0xff] }
  0x98   : > { %853 = vst [vmem:[%s4100_s26 + $0x40] sm:$0xff] %v852_v20  ;;  %v856_v22 = vld [vmem:[%s4095_s22 + $0xa0] sm:$0xff]  ;;  %v858_v23 = vld [vmem:[%s4095_s22 + $0xb0] sm:$0xff]  ;;  %855 = vst [vmem:[%s4100_s26 + $0x48] sm:$0xff] %v854_v21 }
  0x99   : > { %857 = vst [vmem:[%s4100_s26 + $0x50] sm:$0xff] %v856_v22  ;;  %859 = vst [vmem:[%s4100_s26 + $0x58] sm:$0xff] %v858_v23  ;;  %v860_v24 = vld [vmem:[%s4095_s22 + $0xc0] sm:$0xff]  ;;  %v862_v25 = vld [vmem:[%s4095_s22 + $0xd0] sm:$0xff] }
  0x9a   : > { %v864_v26 = vld [vmem:[%s4095_s22 + $0xe0] sm:$0xff]  ;;  %861 = vst [vmem:[%s4100_s26 + $0x60] sm:$0xff] %v860_v24  ;;  %863 = vst [vmem:[%s4100_s26 + $0x68] sm:$0xff] %v862_v25  ;;  %v866_v27 = vld [vmem:[%s4095_s22 + $0xf0] sm:$0xff] }
  0x9b   : > { %865 = vst [vmem:[%s4100_s26 + $0x70] sm:$0xff] %v864_v26  ;;  %v868_v28 = vld [vmem:[%s4095_s22 + $0x200] sm:$0xff]  ;;  %v870_v29 = vld [vmem:[%s4095_s22 + $0x210] sm:$0xff]  ;;  %867 = vst [vmem:[%s4100_s26 + $0x78] sm:$0xff] %v866_v27 }
  0x9c   : > { %869 = vst [vmem:[%s4100_s26 + $0x80] sm:$0xff] %v868_v28  ;;  %871 = vst [vmem:[%s4100_s26 + $0x88] sm:$0xff] %v870_v29  ;;  %v872_v30 = vld [vmem:[%s4095_s22 + $0x220] sm:$0xff]  ;;  %v874_v31 = vld [vmem:[%s4095_s22 + $0x230] sm:$0xff] }
  0x9d   : > { %v876_v32 = vld [vmem:[%s4095_s22 + $0x240] sm:$0xff]  ;;  %873 = vst [vmem:[%s4100_s26 + $0x90] sm:$0xff] %v872_v30  ;;  %875 = vst [vmem:[%s4100_s26 + $0x98] sm:$0xff] %v874_v31  ;;  %v878_v33 = vld [vmem:[%s4095_s22 + $0x250] sm:$0xff] }
  0x9e   : > { %877 = vst [vmem:[%s4100_s26 + $0xa0] sm:$0xff] %v876_v32  ;;  %v880_v34 = vld [vmem:[%s4095_s22 + $0x260] sm:$0xff]  ;;  %v882_v35 = vld [vmem:[%s4095_s22 + $0x270] sm:$0xff]  ;;  %879 = vst [vmem:[%s4100_s26 + $0xa8] sm:$0xff] %v878_v33 }
  0x9f   : > { %881 = vst [vmem:[%s4100_s26 + $0xb0] sm:$0xff] %v880_v34  ;;  %883 = vst [vmem:[%s4100_s26 + $0xb8] sm:$0xff] %v882_v35  ;;  %v884_v36 = vld [vmem:[%s4095_s22 + $0x280] sm:$0xff]  ;;  %v886_v37 = vld [vmem:[%s4095_s22 + $0x290] sm:$0xff] }
  0xa0   : > { %v888_v38 = vld [vmem:[%s4095_s22 + $0x2a0] sm:$0xff]  ;;  %885 = vst [vmem:[%s4100_s26 + $0xc0] sm:$0xff] %v884_v36  ;;  %887 = vst [vmem:[%s4100_s26 + $0xc8] sm:$0xff] %v886_v37  ;;  %v890_v39 = vld [vmem:[%s4095_s22 + $0x2b0] sm:$0xff] }
  0xa1   : > { %889 = vst [vmem:[%s4100_s26 + $0xd0] sm:$0xff] %v888_v38  ;;  %v892_v40 = vld [vmem:[%s4095_s22 + $0x2c0] sm:$0xff]  ;;  %v894_v41 = vld [vmem:[%s4095_s22 + $0x2d0] sm:$0xff]  ;;  %891 = vst [vmem:[%s4100_s26 + $0xd8] sm:$0xff] %v890_v39 }
  0xa2   : > { %893 = vst [vmem:[%s4100_s26 + $0xe0] sm:$0xff] %v892_v40  ;;  %895 = vst [vmem:[%s4100_s26 + $0xe8] sm:$0xff] %v894_v41  ;;  %v896_v42 = vld [vmem:[%s4095_s22 + $0x2e0] sm:$0xff]  ;;  %v898_v43 = vld [vmem:[%s4095_s22 + $0x2f0] sm:$0xff] }
  0xa3   : > { %v900_v44 = vld [vmem:[%s4095_s22 + $0x400] sm:$0xff]  ;;  %897 = vst [vmem:[%s4100_s26 + $0xf0] sm:$0xff] %v896_v42  ;;  %899 = vst [vmem:[%s4100_s26 + $0xf8] sm:$0xff] %v898_v43  ;;  %v902_v45 = vld [vmem:[%s4095_s22 + $0x410] sm:$0xff] }
  0xa4   : > { %901 = vst [vmem:[%s4100_s26 + $0x100] sm:$0xff] %v900_v44  ;;  %v904_v46 = vld [vmem:[%s4095_s22 + $0x420] sm:$0xff]  ;;  %v906_v47 = vld [vmem:[%s4095_s22 + $0x430] sm:$0xff]  ;;  %903 = vst [vmem:[%s4100_s26 + $0x108] sm:$0xff] %v902_v45 }
  0xa5   : > { %905 = vst [vmem:[%s4100_s26 + $0x110] sm:$0xff] %v904_v46  ;;  %907 = vst [vmem:[%s4100_s26 + $0x118] sm:$0xff] %v906_v47  ;;  %v908_v48 = vld [vmem:[%s4095_s22 + $0x440] sm:$0xff]  ;;  %v910_v49 = vld [vmem:[%s4095_s22 + $0x450] sm:$0xff] }
  0xa6   : > { %v912_v50 = vld [vmem:[%s4095_s22 + $0x460] sm:$0xff]  ;;  %909 = vst [vmem:[%s4100_s26 + $0x120] sm:$0xff] %v908_v48  ;;  %911 = vst [vmem:[%s4100_s26 + $0x128] sm:$0xff] %v910_v49  ;;  %v914_v51 = vld [vmem:[%s4095_s22 + $0x470] sm:$0xff] }
  0xa7   : > { %913 = vst [vmem:[%s4100_s26 + $0x130] sm:$0xff] %v912_v50  ;;  %v916_v52 = vld [vmem:[%s4095_s22 + $0x480] sm:$0xff]  ;;  %v918_v53 = vld [vmem:[%s4095_s22 + $0x490] sm:$0xff]  ;;  %915 = vst [vmem:[%s4100_s26 + $0x138] sm:$0xff] %v914_v51 }
  0xa8   : > { %917 = vst [vmem:[%s4100_s26 + $0x140] sm:$0xff] %v916_v52  ;;  %919 = vst [vmem:[%s4100_s26 + $0x148] sm:$0xff] %v918_v53  ;;  %v920_v54 = vld [vmem:[%s4095_s22 + $0x4a0] sm:$0xff]  ;;  %v922_v55 = vld [vmem:[%s4095_s22 + $0x4b0] sm:$0xff] }
  0xa9   : > { %v924_v56 = vld [vmem:[%s4095_s22 + $0x4c0] sm:$0xff]  ;;  %921 = vst [vmem:[%s4100_s26 + $0x150] sm:$0xff] %v920_v54  ;;  %923 = vst [vmem:[%s4100_s26 + $0x158] sm:$0xff] %v922_v55  ;;  %v926_v57 = vld [vmem:[%s4095_s22 + $0x4d0] sm:$0xff] }
  0xaa   : > { %925 = vst [vmem:[%s4100_s26 + $0x160] sm:$0xff] %v924_v56  ;;  %v928_v58 = vld [vmem:[%s4095_s22 + $0x4e0] sm:$0xff]  ;;  %v930_v59 = vld [vmem:[%s4095_s22 + $0x4f0] sm:$0xff]  ;;  %927 = vst [vmem:[%s4100_s26 + $0x168] sm:$0xff] %v926_v57 }
  0xab   : > { %929 = vst [vmem:[%s4100_s26 + $0x170] sm:$0xff] %v928_v58  ;;  %931 = vst [vmem:[%s4100_s26 + $0x178] sm:$0xff] %v930_v59  ;;  %v932_v60 = vld [vmem:[%s4095_s22 + $0x600] sm:$0xff]  ;;  %v934_v61 = vld [vmem:[%s4095_s22 + $0x610] sm:$0xff] }
  0xac   : > { %v936_v62 = vld [vmem:[%s4095_s22 + $0x620] sm:$0xff]  ;;  %933 = vst [vmem:[%s4100_s26 + $0x180] sm:$0xff] %v932_v60  ;;  %935 = vst [vmem:[%s4100_s26 + $0x188] sm:$0xff] %v934_v61  ;;  %v938_v63 = vld [vmem:[%s4095_s22 + $0x630] sm:$0xff] }
  0xad   : > { %937 = vst [vmem:[%s4100_s26 + $0x190] sm:$0xff] %v936_v62  ;;  %v940_v0 = vld [vmem:[%s4095_s22 + $0x640] sm:$0xff]  ;;  %v942_v1 = vld [vmem:[%s4095_s22 + $0x650] sm:$0xff]  ;;  %939 = vst [vmem:[%s4100_s26 + $0x198] sm:$0xff] %v938_v63 }
  0xae   : > { %941 = vst [vmem:[%s4100_s26 + $0x1a0] sm:$0xff] %v940_v0  ;;  %943 = vst [vmem:[%s4100_s26 + $0x1a8] sm:$0xff] %v942_v1  ;;  %v944_v2 = vld [vmem:[%s4095_s22 + $0x660] sm:$0xff]  ;;  %v946_v3 = vld [vmem:[%s4095_s22 + $0x670] sm:$0xff] }
  0xaf   : > { %v948_v4 = vld [vmem:[%s4095_s22 + $0x680] sm:$0xff]  ;;  %945 = vst [vmem:[%s4100_s26 + $0x1b0] sm:$0xff] %v944_v2  ;;  %947 = vst [vmem:[%s4100_s26 + $0x1b8] sm:$0xff] %v946_v3  ;;  %v950_v5 = vld [vmem:[%s4095_s22 + $0x690] sm:$0xff] }
  0xb0   : > { %949 = vst [vmem:[%s4100_s26 + $0x1c0] sm:$0xff] %v948_v4  ;;  %v952_v6 = vld [vmem:[%s4095_s22 + $0x6a0] sm:$0xff]  ;;  %v954_v7 = vld [vmem:[%s4095_s22 + $0x6b0] sm:$0xff]  ;;  %951 = vst [vmem:[%s4100_s26 + $0x1c8] sm:$0xff] %v950_v5 }
  0xb1   : > { %953 = vst [vmem:[%s4100_s26 + $0x1d0] sm:$0xff] %v952_v6  ;;  %955 = vst [vmem:[%s4100_s26 + $0x1d8] sm:$0xff] %v954_v7  ;;  %v956_v8 = vld [vmem:[%s4095_s22 + $0x6c0] sm:$0xff]  ;;  %v958_v9 = vld [vmem:[%s4095_s22 + $0x6d0] sm:$0xff] }
  0xb2   : > { %v960_v10 = vld [vmem:[%s4095_s22 + $0x6e0] sm:$0xff]  ;;  %957 = vst [vmem:[%s4100_s26 + $0x1e0] sm:$0xff] %v956_v8  ;;  %959 = vst [vmem:[%s4100_s26 + $0x1e8] sm:$0xff] %v958_v9  ;;  %v962_v11 = vld [vmem:[%s4095_s22 + $0x6f0] sm:$0xff] }
  0xb3   : > { %961 = vst [vmem:[%s4100_s26 + $0x1f0] sm:$0xff] %v960_v10  ;;  %963 = vst [vmem:[%s4100_s26 + $0x1f8] sm:$0xff] %v962_v11 }
  0xb4 PF: > { %p2867_p13 = scmp.ge.s32.totalorder %s3738_s17, 1  ;;  %p968_p0 = scmp.lt.s32.totalorder %s3738_s17, 5 }
  0xb6   : > { %p969_p2 = pnand %p2867_p13, %p968_p0 }
  0xb7   : > { %s5053_s28 = sld [smem:[#allocation13_spill]] (!%p969_p2)  ;;  %s5054_s23 = sld [smem:[#allocation12_spill]] (!%p969_p2) }
  0xb8   : > { %972 = sbr.rel (%p969_p2) target bundleno = 832 (0x340), region = 168  ;;  %s989_s20 = sand.u32 (!%p969_p2), 1, %s3698_s7  }
  0xb9   : > { %s996_s9 = sand.u32 (!%p969_p2), 1, %s3690_s1   ;;  %s2870_s11 = sshll.u32 (!%p969_p2), %s989_s20, 2 }
  0xba   : > { %s2871_s18 = sshll.u32 (!%p969_p2), %s996_s9, 9  ;;  %s2872_s0 = sshll.u32 (!%p969_p2), %s989_s20, 6 }
  0xbb   : > { %s4237_s19 = scalar_lea.vmem (!%p969_p2), [#allocation8], %s2870_s11  ;;  %s4239_s21 = scalar_lea.vmem (!%p969_p2), [#allocation9], %s2871_s18 }
  0xbc   : > { %s4241_s22 = scalar_lea.vmem (!%p969_p2), [#allocation10], %s2872_s0  ;;  %s5055_s26 = sld [smem:[#allocation14_spill]] (!%p969_p2) }
  0xbd   : > { %s975_s24 = sand.u32 (!%p969_p2), 1, %s5053_s28   ;;  %s982_s27 = sand.u32 (!%p969_p2), 1, %s5054_s23  }
  0xbe   : > { %s2868_s5 = sshll.u32 (!%p969_p2), %s975_s24, 6  ;;  %s2869_s13 = sshll.u32 (!%p969_p2), %s982_s27, 9 }
  0xbf   : > { %s4233_s6 = scalar_lea.vmem [#allocation6], %s2868_s5  ;;  %s4235_s14 = scalar_lea.vmem [#allocation7], %s2869_s13 }
  0xc2   : > { %p2873_p3 = scmp.ne.s32.totalorder %s5055_s26, 0 }
  0xc3   : > { %v3742_v12 = vmov (!%p2873_p3), -1e+30   ;;  %v3743_v13 = vmov (!%p2873_p3), 0.0  }
  0xc4   : > { %1061 = sbr.rel (%p2873_p3) target bundleno = 203 (0xcb), region = 188  ;;  %1062 = vst [vmem:[#allocation2] sm:$0x1] (!%p2873_p3), %v3742_v12  ;;  %1063 = vst [vmem:[#allocation2 + $0x1] sm:$0x1] (!%p2873_p3), %v3742_v12 }
  0xc5   : > { %1064 = vst [vmem:[#allocation2 + $0x2] sm:$0x1] (!%p2873_p3), %v3742_v12  ;;  %1065 = vst [vmem:[#allocation2 + $0x3] sm:$0x1] (!%p2873_p3), %v3742_v12 }
  0xc6   : > { %1066 = vst [vmem:[%s4241_s22] sm:$0xff] (!%p2873_p3), %v3743_v13  ;;  %1067 = vst [vmem:[%s4241_s22 + $0x8] sm:$0xff] (!%p2873_p3), %v3743_v13 }
  0xc7   : > { %1068 = vst [vmem:[%s4241_s22 + $0x10] sm:$0xff] (!%p2873_p3), %v3743_v13  ;;  %1069 = vst [vmem:[%s4241_s22 + $0x18] sm:$0xff] (!%p2873_p3), %v3743_v13 }
  0xc8   : > { %1070 = vst [vmem:[%s4241_s22 + $0x20] sm:$0xff] (!%p2873_p3), %v3743_v13  ;;  %1071 = vst [vmem:[%s4241_s22 + $0x28] sm:$0xff] (!%p2873_p3), %v3743_v13 }
  0xc9   : > { %1072 = vst [vmem:[%s4241_s22 + $0x30] sm:$0xff] (!%p2873_p3), %v3743_v13  ;;  %1073 = vst [vmem:[%s4241_s22 + $0x38] sm:$0xff] (!%p2873_p3), %v3743_v13 }
  0xcb PF: > { %s5056_s1 = sld [smem:[#allocation15_spill]]  ;;  %s5057_s28 = sld [smem:[#allocation14_spill]] }
  0xd1   : > { %s1074_s7 = sld [smem:[#allocation5 + %s5056_s1]] }
  0xd7   : > { %p2874_p4 = scmp.ge.s32.totalorder %s5057_s28, %s1074_s7 }
  0xd9   : > { %1078 = sbr.rel (%p2874_p4) target bundleno = 785 (0x311), region = 192 }
  0xe0   : > { %v1081_v14 = vld [vmem:[%s4235_s14 + $0x10] sm:$0xff]  ;;  %v1079_v15 = vld [vmem:[%s4235_s14] sm:$0xff]  ;;  %v3744_v16 = vmov 0   ;;  %v1082_v17 = vld [vmem:[%s4235_s14 + $0x18] sm:$0xff] }
  0xe1   : > { %3465 = vset.pattern.permute.xlu1 %v3744_v16  ;;  %3464 = vset.pattern.permute.xlu0 %v3744_v16  ;;  %v1080_v18 = vld [vmem:[%s4235_s14 + $0x8] sm:$0xff]  ;;  %v1083_v20 = vld [vmem:[%s4235_s14 + $0x20] sm:$0xff]  ;;  %v1086_v21 = vld [vmem:[%s4235_s14 + $0x38] sm:$0xff] }
  0xe2   : > { %1108 = vperm.xlu1 %3465, %v1081_v14   ;;  %1098 = vperm.xlu0 %3464, %v1079_v15   ;;  %v1084_v19 = vld [vmem:[%s4235_s14 + $0x28] sm:$0xff]  ;;  %v1085_v22 = vld [vmem:[%s4235_s14 + $0x30] sm:$0xff]  ;;  %v2876_v24 = vld [vmem:[%s4235_s14 + $0x80] sm:$0xff] }
  0xe3   : > { %v2877_v23 = vld [vmem:[%s4235_s14 + $0x88] sm:$0xff]  ;;  %v2879_v25 = vld [vmem:[%s4235_s14 + $0x98] sm:$0xff]  ;;  %v2878_v26 = vld [vmem:[%s4235_s14 + $0x90] sm:$0xff] }
  0xe4   : > { %v2881_v27 = vld [vmem:[%s4235_s14 + $0xa8] sm:$0xff]  ;;  %v2880_v28 = vld [vmem:[%s4235_s14 + $0xa0] sm:$0xff]  ;;  %v2883_v29 = vld [vmem:[%s4235_s14 + $0xb8] sm:$0xff] }
  0xe5   : > { %v2882_v30 = vld [vmem:[%s4235_s14 + $0xb0] sm:$0xff]  ;;  %v1088_v31 = vld [vmem:[%s4235_s14 + $0x48] sm:$0xff]  ;;  %v1087_v32 = vld [vmem:[%s4235_s14 + $0x40] sm:$0xff] }
  0xe6   : > { %1113 = vperm.xlu1 %3465, %v1082_v17   ;;  %1103 = vperm.xlu0 %3464, %v1080_v18   ;;  %v1090_v33 = vld [vmem:[%s4235_s14 + $0x58] sm:$0xff]  ;;  %v1089_v34 = vld [vmem:[%s4235_s14 + $0x50] sm:$0xff]  ;;  %v2885_v35 = vld [vmem:[%s4235_s14 + $0xc8] sm:$0xff] }
  0xe7   : > { %v2884_v36 = vld [vmem:[%s4235_s14 + $0xc0] sm:$0xff]  ;;  %v2887_v37 = vld [vmem:[%s4235_s14 + $0xd8] sm:$0xff]  ;;  %v2886_v38 = vld [vmem:[%s4235_s14 + $0xd0] sm:$0xff] }
  0xe8   : > { %v1092_v39 = vld [vmem:[%s4235_s14 + $0x68] sm:$0xff]  ;;  %v1091_v40 = vld [vmem:[%s4235_s14 + $0x60] sm:$0xff]  ;;  %v1094_v41 = vld [vmem:[%s4235_s14 + $0x78] sm:$0xff] }
  0xe9   : > { %v1093_v42 = vld [vmem:[%s4235_s14 + $0x70] sm:$0xff]  ;;  %v2889_v43 = vld [vmem:[%s4235_s14 + $0xe8] sm:$0xff]  ;;  %v2888_v44 = vld [vmem:[%s4235_s14 + $0xe0] sm:$0xff] }
  0xea   : > { %1123 = vperm.xlu1 %3465, %v1084_v19   ;;  %1118 = vperm.xlu0 %3464, %v1083_v20   ;;  %v2891_v45 = vld [vmem:[%s4235_s14 + $0xf8] sm:$0xff]  ;;  %v2890_v46 = vld [vmem:[%s4235_s14 + $0xf0] sm:$0xff]  ;;  %v2917_v47 = vld [vmem:[%s4235_s14 + $0x108] sm:$0xff] }
  0xeb   : > { %v2916_v48 = vld [vmem:[%s4235_s14 + $0x100] sm:$0xff]  ;;  %v2919_v49 = vld [vmem:[%s4235_s14 + $0x118] sm:$0xff]  ;;  %v2918_v50 = vld [vmem:[%s4235_s14 + $0x110] sm:$0xff] }
  0xec   : > { %v2921_v51 = vld [vmem:[%s4235_s14 + $0x128] sm:$0xff]  ;;  %v2920_v52 = vld [vmem:[%s4235_s14 + $0x120] sm:$0xff]  ;;  %v2923_v53 = vld [vmem:[%s4235_s14 + $0x138] sm:$0xff] }
  0xed   : > { %v2922_v54 = vld [vmem:[%s4235_s14 + $0x130] sm:$0xff]  ;;  %v2957_v55 = vld [vmem:[%s4235_s14 + $0x188] sm:$0xff]  ;;  %v2956_v56 = vld [vmem:[%s4235_s14 + $0x180] sm:$0xff] }
  0xee   : > { %1133 = vperm.xlu1 %3465, %v1086_v21   ;;  %1128 = vperm.xlu0 %3464, %v1085_v22   ;;  %v2959_v57 = vld [vmem:[%s4235_s14 + $0x198] sm:$0xff]  ;;  %v2958_v58 = vld [vmem:[%s4235_s14 + $0x190] sm:$0xff]  ;;  %v2961_v59 = vld [vmem:[%s4235_s14 + $0x1a8] sm:$0xff] }
  0xef   : > { %v2960_v60 = vld [vmem:[%s4235_s14 + $0x1a0] sm:$0xff]  ;;  %v2963_v61 = vld [vmem:[%s4235_s14 + $0x1b8] sm:$0xff]  ;;  %v2962_v62 = vld [vmem:[%s4235_s14 + $0x1b0] sm:$0xff] }
  0xf0   : > { %v2925_v63 = vld [vmem:[%s4235_s14 + $0x148] sm:$0xff]  ;;  %v2924_v0 = vld [vmem:[%s4235_s14 + $0x140] sm:$0xff]  ;;  %v2927_v1 = vld [vmem:[%s4235_s14 + $0x158] sm:$0xff] }
  0xf1   : > { %v2926_v2 = vld [vmem:[%s4235_s14 + $0x150] sm:$0xff]  ;;  %v2965_v3 = vld [vmem:[%s4235_s14 + $0x1c8] sm:$0xff]  ;;  %v2964_v4 = vld [vmem:[%s4235_s14 + $0x1c0] sm:$0xff] }
  0xf2   : > { %1476 = vperm.xlu1 %3465, %v2877_v23   ;;  %1471 = vperm.xlu0 %3464, %v2876_v24   ;;  %v2967_v5 = vld [vmem:[%s4235_s14 + $0x1d8] sm:$0xff]  ;;  %v2966_v6 = vld [vmem:[%s4235_s14 + $0x1d0] sm:$0xff]  ;;  %v2929_v7 = vld [vmem:[%s4235_s14 + $0x168] sm:$0xff] }
  0xf3   : > { %v2928_v8 = vld [vmem:[%s4235_s14 + $0x160] sm:$0xff]  ;;  %v2931_v9 = vld [vmem:[%s4235_s14 + $0x178] sm:$0xff]  ;;  %v2930_v10 = vld [vmem:[%s4235_s14 + $0x170] sm:$0xff] }
  0xf4   : > { %v2969_v11 = vld [vmem:[%s4235_s14 + $0x1e8] sm:$0xff]  ;;  %v2968_v12 = vld [vmem:[%s4235_s14 + $0x1e0] sm:$0xff]  ;;  %v2971_v13 = vld [vmem:[%s4235_s14 + $0x1f8] sm:$0xff] }
  0xf5   : > { %v2970_v14 = vld [vmem:[%s4235_s14 + $0x1f0] sm:$0xff]  ;;  %v4319_v23 = vld [vmem:[%s4237_s19] ss:$0 sm:$0xff] }
  0xf6   : > { %1486 = vperm.xlu1 %3465, %v2879_v25   ;;  %1481 = vperm.xlu0 %3464, %v2878_v26  }
  0xfa   : > { %1496 = vperm.xlu1 %3465, %v2881_v27   ;;  %1491 = vperm.xlu0 %3464, %v2880_v28   ;;  %v1200_v28 = vld [vmem:[%s4239_s21 + $0x10] sm:$0xff] }
  0xfe   : > { %1506 = vperm.xlu1 %3465, %v2883_v29   ;;  %1501 = vperm.xlu0 %3464, %v2882_v30   ;;  %v1198_v29 = vld [vmem:[%s4239_s21] sm:$0xff] }
 0x102   : > { %1143 = vperm.xlu1 %3465, %v1088_v31   ;;  %1138 = vperm.xlu0 %3464, %v1087_v32   ;;  %v1203_v32 = vld [vmem:[%s4239_s21 + $0x28] sm:$0xff] }
 0x106   : > { %1153 = vperm.xlu1 %3465, %v1090_v33   ;;  %1148 = vperm.xlu0 %3464, %v1089_v34   ;;  %v1202_v33 = vld [vmem:[%s4239_s21 + $0x20] sm:$0xff] }
 0x10a   : > { %1516 = vperm.xlu1 %3465, %v2885_v35   ;;  %1511 = vperm.xlu0 %3464, %v2884_v36  }
 0x10e   : > { %1526 = vperm.xlu1 %3465, %v2887_v37   ;;  %1521 = vperm.xlu0 %3464, %v2886_v38   ;;  %v1205_v38 = vld [vmem:[%s4239_s21 + $0x38] sm:$0xff] }
 0x112   : > { %1163 = vperm.xlu1 %3465, %v1092_v39   ;;  %1158 = vperm.xlu0 %3464, %v1091_v40   ;;  %v1204_v39 = vld [vmem:[%s4239_s21 + $0x30] sm:$0xff] }
 0x116   : > { %1173 = vperm.xlu1 %3465, %v1094_v41   ;;  %1168 = vperm.xlu0 %3464, %v1093_v42  }
 0x11a   : > { %1536 = vperm.xlu1 %3465, %v2889_v43   ;;  %1531 = vperm.xlu0 %3464, %v2888_v44   ;;  %v1201_v44 = vld [vmem:[%s4239_s21 + $0x18] sm:$0xff] }
 0x11e   : > { %1546 = vperm.xlu1 %3465, %v2891_v45   ;;  %1541 = vperm.xlu0 %3464, %v2890_v46   ;;  %v1199_v45 = vld [vmem:[%s4239_s21 + $0x8] sm:$0xff] }
 0x122   : > { %1853 = vperm.xlu1 %3465, %v2917_v47   ;;  %1848 = vperm.xlu0 %3464, %v2916_v48  }
 0x126   : > { %1863 = vperm.xlu1 %3465, %v2919_v49   ;;  %1858 = vperm.xlu0 %3464, %v2918_v50   ;;  %v4338_v50 = vld [vmem:[%s4237_s19 + $0x1] ss:$0 sm:$0xff] }
 0x12a   : > { %1873 = vperm.xlu1 %3465, %v2921_v51   ;;  %1868 = vperm.xlu0 %3464, %v2920_v52  }
 0x12e   : > { %1883 = vperm.xlu1 %3465, %v2923_v53   ;;  %1878 = vperm.xlu0 %3464, %v2922_v54  }
 0x132   : > { %2230 = vperm.xlu1 %3465, %v2957_v55   ;;  %2225 = vperm.xlu0 %3464, %v2956_v56   ;;  %v1305_v55 = vlaneseq }
 0x136   : > { %2240 = vperm.xlu1 %3465, %v2959_v57   ;;  %2235 = vperm.xlu0 %3464, %v2958_v58  }
 0x13a   : > { %2250 = vperm.xlu1 %3465, %v2961_v59   ;;  %2245 = vperm.xlu0 %3464, %v2960_v60   ;;  %v2895_v60 = vld [vmem:[%s4239_s21 + $0x88] sm:$0xff] }
 0x13e   : > { %2260 = vperm.xlu1 %3465, %v2963_v61   ;;  %2255 = vperm.xlu0 %3464, %v2962_v62   ;;  %v2894_v62 = vld [vmem:[%s4239_s21 + $0x80] sm:$0xff] }
 0x142   : > { %1893 = vperm.xlu1 %3465, %v2925_v63   ;;  %1888 = vperm.xlu0 %3464, %v2924_v0  }
 0x146   : > { %1903 = vperm.xlu1 %3465, %v2927_v1   ;;  %1898 = vperm.xlu0 %3464, %v2926_v2  }
 0x14a   : > { %2270 = vperm.xlu1 %3465, %v2965_v3   ;;  %2265 = vperm.xlu0 %3464, %v2964_v4  }
 0x14e   : > { %2280 = vperm.xlu1 %3465, %v2967_v5   ;;  %2275 = vperm.xlu0 %3464, %v2966_v6  }
 0x152   : > { %1913 = vperm.xlu1 %3465, %v2929_v7   ;;  %1908 = vperm.xlu0 %3464, %v2928_v8  }
 0x156   : > { %1923 = vperm.xlu1 %3465, %v2931_v9   ;;  %1918 = vperm.xlu0 %3464, %v2930_v10  }
 0x15a   : > { %2290 = vperm.xlu1 %3465, %v2969_v11   ;;  %2285 = vperm.xlu0 %3464, %v2968_v12   ;;  %v2899_v12 = vld [vmem:[%s4239_s21 + $0xa8] sm:$0xff] }
 0x15e   : > { %2300 = vperm.xlu1 %3465, %v2971_v13   ;;  %2295 = vperm.xlu0 %3464, %v2970_v14   ;;  %v2898_v13 = vld [vmem:[%s4239_s21 + $0xa0] sm:$0xff] }
 0x161   : > { %v1109_v15 = vpop.permute.xlu1 %1108  ;;  %v1099_v16 = vpop.permute.xlu0 %1098 }
 0x162   : > { %v1184_v26 = vadd.f32 %v4319_v23, %v1109_v15  ;;  %v1182_v27 = vadd.f32 %v4319_v23, %v1099_v16 }
 0x164   : > { %v1216_v42 = vadd.f32 %v1200_v28, %v1184_v26  ;;  %v1214_v43 = vadd.f32 %v1198_v29, %v1182_v27 }
 0x165   : > { %v1114_v17 = vpop.permute.xlu1 %1113  ;;  %v1104_v18 = vpop.permute.xlu0 %1103 }
 0x166   : > { %v1185_v36 = vadd.f32 %v4319_v23, %v1114_v17  ;;  %v1183_v37 = vadd.f32 %v4319_v23, %v1104_v18  ;;  %vm1232_vm0 = vcmp.gt.f32.partialorder %v1216_v42, 0.0  ;;  %v1248_v56 = vmul.f32 0.2, %v1216_v42 }
 0x167   : > { %vm1230_vm1 = vcmp.gt.f32.partialorder %v1214_v43, 0.0  ;;  %v1246_v57 = vmul.f32 0.2, %v1214_v43 }
 0x168   : > { %v1217_v51 = vadd.f32 %v1201_v44, %v1185_v36  ;;  %v1215_v52 = vadd.f32 %v1199_v45, %v1183_v37  ;;  %v4359_v18 = vsel %vm1232_vm0, %v1216_v42, %v1248_v56 }
 0x169   : > { %v1124_v19 = vpop.permute.xlu1 %1123  ;;  %v1119_v20 = vpop.permute.xlu0 %1118 }
 0x16a   : > { %v1187_v30 = vadd.f32 %v4319_v23, %v1124_v19  ;;  %v1186_v31 = vadd.f32 %v4319_v23, %v1119_v20  ;;  %v1249_v2 = vmul.f32 0.2, %v1217_v51  ;;  %v1247_v3 = vmul.f32 0.2, %v1215_v52 }
 0x16b   : > { %vm1233_vm6 = vcmp.gt.f32.partialorder %v1217_v51, 0.0  ;;  %vm1231_vm7 = vcmp.gt.f32.partialorder %v1215_v52, 0.0  ;;  %v4362_v19 = vsel %vm1230_vm1, %v1214_v43, %v1246_v57  ;;  %v1206_v43 = vld [vmem:[%s4239_s21 + $0x40] sm:$0xff] }
 0x16c   : > { %v1219_v46 = vadd.f32 %v1203_v32, %v1187_v30  ;;  %v1218_v47 = vadd.f32 %v1202_v33, %v1186_v31  ;;  %v4365_v20 = vsel %vm1233_vm6, %v1217_v51, %v1249_v2 }
 0x16d   : > { %v1134_v21 = vpop.permute.xlu1 %1133  ;;  %v1129_v22 = vpop.permute.xlu0 %1128 }
 0x16e   : > { %v1189_v34 = vadd.f32 %v4319_v23, %v1134_v21  ;;  %v1188_v35 = vadd.f32 %v4319_v23, %v1129_v22  ;;  %v1251_v58 = vmul.f32 0.2, %v1219_v46  ;;  %v1250_v59 = vmul.f32 0.2, %v1218_v47  ;;  %v2897_v22 = vld [vmem:[%s4239_s21 + $0x98] sm:$0xff] }
 0x16f   : > { %vm1235_vm2 = vcmp.gt.f32.partialorder %v1219_v46, 0.0  ;;  %vm1234_vm3 = vcmp.gt.f32.partialorder %v1218_v47, 0.0  ;;  %v4368_v21 = vsel %vm1231_vm7, %v1215_v52, %v1247_v3  ;;  %v2903_v3 = vld [vmem:[%s4239_s21 + $0xc8] sm:$0xff] }
 0x170   : > { %v1221_v48 = vadd.f32 %v1205_v38, %v1189_v34  ;;  %v1220_v49 = vadd.f32 %v1204_v39, %v1188_v35  ;;  %v4346_v8 = vsel %vm1235_vm2, %v1219_v46, %v1251_v58  ;;  %v4348_v9 = vsel %vm1234_vm3, %v1218_v47, %v1250_v59  ;;  %v2901_v39 = vld [vmem:[%s4239_s21 + $0xb8] sm:$0xff] }
 0x171   : > { %v1477_v24 = vpop.permute.xlu1 %1476  ;;  %v1472_v25 = vpop.permute.xlu0 %1471  ;;  %v1280_v27 = vmax.f32 %v4368_v21, %v4346_v8  ;;  %v1279_v28 = vmax.f32 %v4362_v19, %v4348_v9  ;;  %v1209_v59 = vld [vmem:[%s4239_s21 + $0x58] sm:$0xff] }
 0x172   : > { %v1556_v61 = vadd.f32 %v4338_v50, %v1477_v24  ;;  %v1555_v63 = vadd.f32 %v4338_v50, %v1472_v25  ;;  %v1253_v0 = vmul.f32 0.2, %v1221_v48  ;;  %v1252_v1 = vmul.f32 0.2, %v1220_v49  ;;  %v2896_v24 = vld [vmem:[%s4239_s21 + $0x90] sm:$0xff] }
 0x173   : > { %vm1237_vm4 = vcmp.gt.f32.partialorder %v1221_v48, 0.0  ;;  %vm1236_vm5 = vcmp.gt.f32.partialorder %v1220_v49, 0.0 }
 0x174   : > { %v1589_v10 = vadd.f32 %v2895_v60, %v1556_v61  ;;  %v1588_v11 = vadd.f32 %v2894_v62, %v1555_v63  ;;  %v4352_v14 = vsel %vm1237_vm4, %v1221_v48, %v1253_v0  ;;  %v4354_v15 = vsel %vm1236_vm5, %v1220_v49, %v1252_v1  ;;  %v1208_v60 = vld [vmem:[%s4239_s21 + $0x50] sm:$0xff] }
 0x175   : > { %v1487_v40 = vpop.permute.xlu1 %1486  ;;  %v1482_v41 = vpop.permute.xlu0 %1481  ;;  %v1282_v31 = vmax.f32 %v4365_v20, %v4352_v14  ;;  %v1281_v32 = vmax.f32 %v4359_v18, %v4354_v15 }
 0x176   : > { %v1558_v16 = vadd.f32 %v4338_v50, %v1487_v40  ;;  %v1557_v17 = vadd.f32 %v4338_v50, %v1482_v41  ;;  %v1621_v35 = vmul.f32 0.2, %v1589_v10  ;;  %v1620_v36 = vmul.f32 0.2, %v1588_v11  ;;  %v2900_v40 = vld [vmem:[%s4239_s21 + $0xb0] sm:$0xff]  ;;  %v1207_v41 = vld [vmem:[%s4239_s21 + $0x48] sm:$0xff] }
 0x177   : > { %vm1605_vm8 = vcmp.gt.f32.partialorder %v1589_v10, 0.0  ;;  %vm1604_vm9 = vcmp.gt.f32.partialorder %v1588_v11, 0.0 }
 0x178   : > { %v1591_v37 = vadd.f32 %v2897_v22, %v1558_v16  ;;  %v1590_v38 = vadd.f32 %v2896_v24, %v1557_v17  ;;  %v4394_v56 = vsel %vm1604_vm9, %v1588_v11, %v1620_v36  ;;  %v1358_v17 = vld [vmem:[%s4233_s6] sm:$0xff]  ;;  %v2910_v22 = vld [vmem:[%s4233_s6 + $0x10] sm:$0xff] }
 0x179   : > { %v1497_v53 = vpop.permute.xlu1 %1496  ;;  %v1492_v54 = vpop.permute.xlu0 %1491  ;;  %3119 = vmatprep.mubr.f32.mxu0 %v1358_v17  ;;  %3154 = vmatprep.mubr.f32.mxu1 %v2910_v22  ;;  %v1212_v22 = vld [vmem:[%s4239_s21 + $0x70] sm:$0xff] }
 0x17a   : > { %v1560_v6 = vadd.f32 %v4338_v50, %v1497_v53  ;;  %v1559_v7 = vadd.f32 %v4338_v50, %v1492_v54  ;;  %v4391_v54 = vsel %vm1605_vm8, %v1589_v10, %v1621_v35  ;;  %v1623_v57 = vmul.f32 0.2, %v1591_v37 }
 0x17b   : > { %v1622_v58 = vmul.f32 0.2, %v1590_v38  ;;  %vm1607_vm12 = vcmp.gt.f32.partialorder %v1591_v37, 0.0  ;;  %vm1606_vm13 = vcmp.gt.f32.partialorder %v1590_v38, 0.0 }
 0x17c   : > { %v1593_v29 = vadd.f32 %v2899_v12, %v1560_v6  ;;  %v1592_v30 = vadd.f32 %v2898_v13, %v1559_v7  ;;  %v4409_v13 = vsel %vm1607_vm12, %v1591_v37, %v1623_v57 }
 0x17d   : > { %v1507_v4 = vpop.permute.xlu1 %1506  ;;  %v1502_v5 = vpop.permute.xlu0 %1501  ;;  %v4412_v16 = vsel %vm1606_vm13, %v1590_v38, %v1622_v58 }
 0x17e   : > { %v1562_v33 = vadd.f32 %v4338_v50, %v1507_v4  ;;  %v1561_v34 = vadd.f32 %v4338_v50, %v1502_v5  ;;  %vm1609_vm10 = vcmp.gt.f32.partialorder %v1593_v29, 0.0  ;;  %v1625_v47 = vmul.f32 0.2, %v1593_v29  ;;  %v2902_v5 = vld [vmem:[%s4239_s21 + $0xc0] sm:$0xff] }
 0x17f   : > { %vm1608_vm11 = vcmp.gt.f32.partialorder %v1592_v30, 0.0  ;;  %v1624_v48 = vmul.f32 0.2, %v1592_v30 }
 0x180   : > { %v1595_v49 = vadd.f32 %v2901_v39, %v1562_v33  ;;  %v1594_v51 = vadd.f32 %v2900_v40, %v1561_v34  ;;  %v4399_v1 = vsel %vm1609_vm10, %v1593_v29, %v1625_v47  ;;  %v2905_v40 = vld [vmem:[%s4239_s21 + $0xd8] sm:$0xff] }
 0x181   : > { %v1144_v25 = vpop.permute.xlu1 %1143  ;;  %v1139_v26 = vpop.permute.xlu0 %1138  ;;  %v4402_v2 = vsel %vm1608_vm11, %v1592_v30, %v1624_v48  ;;  %v1655_v34 = vmax.f32 %v4391_v54, %v4399_v1  ;;  %v1211_v48 = vld [vmem:[%s4239_s21 + $0x68] sm:$0xff] }
 0x182   : > { %v1191_v42 = vadd.f32 %v4319_v23, %v1144_v25  ;;  %v1190_v44 = vadd.f32 %v4319_v23, %v1139_v26  ;;  %v1627_v7 = vmul.f32 0.2, %v1595_v49  ;;  %v1626_v10 = vmul.f32 0.2, %v1594_v51 }
 0x183   : > { %vm1611_vm14 = vcmp.gt.f32.partialorder %v1595_v49, 0.0  ;;  %vm1610_vm15 = vcmp.gt.f32.partialorder %v1594_v51, 0.0  ;;  %v1654_v35 = vmax.f32 %v4394_v56, %v4402_v2 }
 0x184   : > { %v1223_v61 = vadd.f32 %v1207_v41, %v1191_v42  ;;  %v1222_v62 = vadd.f32 %v1206_v43, %v1190_v44  ;;  %v4421_v36 = vsel %vm1611_vm14, %v1595_v49, %v1627_v7  ;;  %v4424_v37 = vsel %vm1610_vm15, %v1594_v51, %v1626_v10  ;;  %v2904_v42 = vld [vmem:[%s4239_s21 + $0xd0] sm:$0xff]  ;;  %v1210_v51 = vld [vmem:[%s4239_s21 + $0x60] sm:$0xff] }
 0x185   : > { %v1154_v45 = vpop.permute.xlu1 %1153  ;;  %v1149_v46 = vpop.permute.xlu0 %1148  ;;  %v1657_v58 = vmax.f32 %v4409_v13, %v4421_v36 }
 0x186   : > { %v1193_v52 = vadd.f32 %v4319_v23, %v1154_v45  ;;  %v1192_v53 = vadd.f32 %v4319_v23, %v1149_v46  ;;  %v1255_v24 = vmul.f32 0.2, %v1223_v61  ;;  %v1254_v25 = vmul.f32 0.2, %v1222_v62 }
 0x187   : > { %vm1239_vm0 = vcmp.gt.f32.partialorder %v1223_v61, 0.0  ;;  %vm1238_vm1 = vcmp.gt.f32.partialorder %v1222_v62, 0.0 }
 0x188   : > { %v1225_v11 = vadd.f32 %v1209_v59, %v1193_v52  ;;  %v1224_v12 = vadd.f32 %v1208_v60, %v1192_v53  ;;  %v4430_v44 = vsel %vm1239_vm0, %v1223_v61, %v1255_v24  ;;  %v4432_v45 = vsel %vm1238_vm1, %v1222_v62, %v1254_v25 }
 0x189   : > { %v1517_v63 = vpop.permute.xlu1 %1516  ;;  %v1512_v0 = vpop.permute.xlu0 %1511  ;;  %v1656_v59 = vmax.f32 %v4412_v16, %v4424_v37 }
 0x18a   : > { %v1564_v4 = vadd.f32 %v4338_v50, %v1517_v63  ;;  %v1563_v6 = vadd.f32 %v4338_v50, %v1512_v0  ;;  %v1257_v38 = vmul.f32 0.2, %v1225_v11  ;;  %v1256_v39 = vmul.f32 0.2, %v1224_v12 }
 0x18b   : > { %vm1241_vm2 = vcmp.gt.f32.partialorder %v1225_v11, 0.0  ;;  %vm1240_vm3 = vcmp.gt.f32.partialorder %v1224_v12, 0.0 }
 0x18c   : > { %v1597_v26 = vadd.f32 %v2903_v3, %v1564_v4  ;;  %v1596_v29 = vadd.f32 %v2902_v5, %v1563_v6  ;;  %v4443_v60 = vsel %vm1241_vm2, %v1225_v11, %v1257_v38  ;;  %v4446_v61 = vsel %vm1240_vm3, %v1224_v12, %v1256_v39 }
 0x18d   : > { %v1527_v30 = vpop.permute.xlu1 %1526  ;;  %v1522_v33 = vpop.permute.xlu0 %1521  ;;  %v1284_v4 = vmax.f32 %v1280_v27, %v4430_v44  ;;  %v1283_v5 = vmax.f32 %v1279_v28, %v4432_v45  ;;  %v1286_v12 = vmax.f32 %v1282_v31, %v4443_v60  ;;  %v1285_v27 = vmax.f32 %v1281_v32, %v4446_v61  ;;  %v1213_v28 = vld [vmem:[%s4239_s21 + $0x78] sm:$0xff] }
 0x18e   : > { %v1566_v41 = vadd.f32 %v4338_v50, %v1527_v30  ;;  %v1565_v43 = vadd.f32 %v4338_v50, %v1522_v33  ;;  %v1629_v46 = vmul.f32 0.2, %v1597_v26  ;;  %v1628_v47 = vmul.f32 0.2, %v1596_v29 }
 0x18f   : > { %vm1613_vm4 = vcmp.gt.f32.partialorder %v1597_v26, 0.0  ;;  %vm1612_vm5 = vcmp.gt.f32.partialorder %v1596_v29, 0.0 }
 0x190   : > { %v1599_v62 = vadd.f32 %v2905_v40, %v1566_v41  ;;  %v1598_v63 = vadd.f32 %v2904_v42, %v1565_v43  ;;  %v4456_v6 = vsel %vm1613_vm4, %v1597_v26, %v1629_v46  ;;  %v4458_v7 = vsel %vm1612_vm5, %v1596_v29, %v1628_v47  ;;  %v2907_v41 = vld [vmem:[%s4239_s21 + $0xe8] sm:$0xff]  ;;  %v2906_v43 = vld [vmem:[%s4239_s21 + $0xe0] sm:$0xff] }
 0x191   : > { %v1164_v49 = vpop.permute.xlu1 %1163  ;;  %v1159_v52 = vpop.permute.xlu0 %1158  ;;  %v4473_v29 = vmax.f32 %v1655_v34, %v4456_v6  ;;  %v4476_v31 = vmax.f32 %v1654_v35, %v4458_v7 }
 0x192   : > { %v1195_v53 = vadd.f32 %v4319_v23, %v1164_v49  ;;  %v1194_v57 = vadd.f32 %v4319_v23, %v1159_v52  ;;  %v1631_v30 = vmul.f32 0.2, %v1599_v62  ;;  %v1630_v32 = vmul.f32 0.2, %v1598_v63 }
 0x193   : > { %vm1615_vm8 = vcmp.gt.f32.partialorder %v1599_v62, 0.0  ;;  %vm1614_vm9 = vcmp.gt.f32.partialorder %v1598_v63, 0.0 }
 0x194   : > { %v1227_v0 = vadd.f32 %v1211_v48, %v1195_v53  ;;  %v1226_v3 = vadd.f32 %v1210_v51, %v1194_v57  ;;  %v4488_v53 = vsel %vm1615_vm8, %v1599_v62, %v1631_v30  ;;  %v4490_v57 = vsel %vm1614_vm9, %v1598_v63, %v1630_v32 }
 0x195   : > { %v1174_v10 = vpop.permute.xlu1 %1173  ;;  %v1169_v11 = vpop.permute.xlu0 %1168 }
 0x196   : > { %vm1243_vm6 = vcmp.gt.f32.partialorder %v1227_v0, 0.0  ;;  %v1259_v17 = vmul.f32 0.2, %v1227_v0  ;;  %vm1242_vm7 = vcmp.gt.f32.partialorder %v1226_v3, 0.0  ;;  %v1258_v24 = vmul.f32 0.2, %v1226_v3 }
 0x197   : > { %v1197_v25 = vadd.f32 %v4319_v23, %v1174_v10  ;;  %v1196_v26 = vadd.f32 %v4319_v23, %v1169_v11 }
 0x198   : > { %v4478_v33 = vsel %vm1243_vm6, %v1227_v0, %v1259_v17  ;;  %v4480_v38 = vsel %vm1242_vm7, %v1226_v3, %v1258_v24 }
 0x199   : > { %v1229_v39 = vadd.f32 %v1213_v28, %v1197_v25  ;;  %v1228_v40 = vadd.f32 %v1212_v22, %v1196_v26  ;;  %v1537_v42 = vpop.permute.xlu1 %1536  ;;  %v1532_v46 = vpop.permute.xlu0 %1531  ;;  %v1288_v48 = vmax.f32 %v1284_v4, %v4478_v33  ;;  %v1287_v49 = vmax.f32 %v1283_v5, %v4480_v38  ;;  %v2909_v5 = vld [vmem:[%s4239_s21 + $0xf8] sm:$0xff]  ;;  %v2908_v22 = vld [vmem:[%s4239_s21 + $0xf0] sm:$0xff] }
 0x19a   : > { %v1568_v23 = vadd.f32 %v4338_v50, %v1537_v42  ;;  %v1567_v34 = vadd.f32 %v4338_v50, %v1532_v46  ;;  %v4503_v25 = vld [vmem:[%s4237_s19 + $0x2] ss:$0 sm:$0xff]  ;;  %v2935_v42 = vld [vmem:[%s4239_s21 + $0x108] sm:$0xff] }
 0x19b   : > { %vm1245_vm10 = vcmp.gt.f32.partialorder %v1229_v39, 0.0  ;;  %v1261_v35 = vmul.f32 0.2, %v1229_v39  ;;  %vm1244_vm11 = vcmp.gt.f32.partialorder %v1228_v40, 0.0  ;;  %v1260_v47 = vmul.f32 0.2, %v1228_v40 }
 0x19c   : > { %v1601_v51 = vadd.f32 %v2907_v41, %v1568_v23  ;;  %v1600_v52 = vadd.f32 %v2906_v43, %v1567_v34  ;;  %v2934_v43 = vld [vmem:[%s4239_s21 + $0x100] sm:$0xff] }
 0x19d   : > { %v4492_v0 = vsel %vm1245_vm10, %v1229_v39, %v1261_v35  ;;  %v4494_v3 = vsel %vm1244_vm11, %v1228_v40, %v1260_v47  ;;  %v1547_v10 = vpop.permute.xlu1 %1546  ;;  %v1542_v11 = vpop.permute.xlu0 %1541 }
 0x19e   : > { %v1290_v17 = vmax.f32 %v1286_v12, %v4492_v0  ;;  %v1289_v28 = vmax.f32 %v1285_v27, %v4494_v3  ;;  %vm1617_vm12 = vcmp.gt.f32.partialorder %v1601_v51, 0.0  ;;  %v1633_v4 = vmul.f32 0.2, %v1601_v51 }
 0x19f   : > { %vm1616_vm13 = vcmp.gt.f32.partialorder %v1600_v52, 0.0  ;;  %v1632_v62 = vmul.f32 0.2, %v1600_v52  ;;  %v1570_v63 = vadd.f32 %v4338_v50, %v1547_v10  ;;  %v1569_v24 = vadd.f32 %v4338_v50, %v1542_v11 }
 0x1a0   : > { %v1661_v12 = vmax.f32 %v1657_v58, %v4488_v53  ;;  %v1291_v27 = vmax.f32 %v1287_v49, %v1288_v48  ;;  %v1292_v26 = vmax.f32 %v1289_v28, %v1290_v17  ;;  %v4509_v30 = vsel %vm1617_vm12, %v1601_v51, %v1633_v4 }
 0x1a1   : > { %v1663_v32 = vmax.f32 %v4473_v29, %v4509_v30  ;;  %v4513_v39 = vsel %vm1616_vm13, %v1600_v52, %v1632_v62  ;;  %v1603_v40 = vadd.f32 %v2909_v5, %v1570_v63  ;;  %v1602_v41 = vadd.f32 %v2908_v22, %v1569_v24  ;;  %v1854_v50 = vpop.permute.xlu1 %1853  ;;  %v1849_v46 = vpop.permute.xlu0 %1848  ;;  %v2937_v22 = vld [vmem:[%s4239_s21 + $0x118] sm:$0xff] }
 0x1a2   : > { %v1293_v23 = vmax.f32 %v1291_v27, %v1292_v26  ;;  %v1662_v34 = vmax.f32 %v4476_v31, %v4513_v39  ;;  %v1933_v58 = vadd.f32 %v4503_v25, %v1854_v50  ;;  %v1932_v35 = vadd.f32 %v4503_v25, %v1849_v46  ;;  %v2936_v27 = vld [vmem:[%s4239_s21 + $0x110] sm:$0xff] }
 0x1a3   : > { %vm1619_vm14 = vcmp.gt.f32.partialorder %v1603_v40, 0.0  ;;  %v1635_v47 = vmul.f32 0.2, %v1603_v40  ;;  %vm1618_vm15 = vcmp.gt.f32.partialorder %v1602_v41, 0.0  ;;  %v1634_v29 = vmul.f32 0.2, %v1602_v41 }
 0x1a4   : > { %v1660_v48 = vmax.f32 %v1656_v59, %v4490_v57  ;;  %v1294_v49 = vrot.slane %v1293_v23, 4  ;;  %v1966_v51 = vadd.f32 %v2935_v42, %v1933_v58  ;;  %v1965_v52 = vadd.f32 %v2934_v43, %v1932_v35  ;;  %v2938_v58 = vld [vmem:[%s4239_s21 + $0x120] sm:$0xff] }
 0x1a5   : > { %v4525_v10 = vsel %vm1619_vm14, %v1603_v40, %v1635_v47  ;;  %v4527_v31 = vsel %vm1618_vm15, %v1602_v41, %v1634_v29  ;;  %v1864_v11 = vpop.permute.xlu1 %1863  ;;  %v1859_v17 = vpop.permute.xlu0 %1858  ;;  %v1306_v62 = vshrl.u32 %v1305_v55, 7  ;;  %v1666_v63 = vmax.f32 %v1662_v34, %v1663_v32  ;;  %v2939_v32 = vld [vmem:[%s4239_s21 + $0x128] sm:$0xff] }
 0x1a6   : > { %v1295_v28 = vmax.f32 %v1293_v23, %v1294_v49  ;;  %v1665_v4 = vmax.f32 %v1661_v12, %v4525_v10  ;;  %v1664_v5 = vmax.f32 %v1660_v48, %v4527_v31  ;;  %v1998_v59 = vmul.f32 0.2, %v1966_v51 }
 0x1a7   : > { %v1935_v24 = vadd.f32 %v4503_v25, %v1864_v11  ;;  %v1997_v41 = vmul.f32 0.2, %v1965_v52  ;;  %v1934_v42 = vadd.f32 %v4503_v25, %v1859_v17  ;;  %vm1982_vm0 = vcmp.gt.f32.partialorder %v1966_v51, 0.0  ;;  %v4548_v17 = vld [vmem:[#allocation2] sm:$0x1] }
 0x1a8   : > { %v1296_v26 = vrot.slane %v1295_v28, 2  ;;  %v1667_v40 = vmax.f32 %v1664_v5, %v1665_v4  ;;  %vm1981_vm1 = vcmp.gt.f32.partialorder %v1965_v52, 0.0  ;;  %v4541_v35 = vsub.s32 0, %v1306_v62  ;;  %5061 = vst [vmem:[#allocation24_spill] sm:$0xff] %v4548_v17 }
 0x1a9   : > { %v1968_v12 = vadd.f32 %v2937_v22, %v1935_v24  ;;  %v1874_v50 = vpop.permute.xlu1 %1873  ;;  %v1869_v43 = vpop.permute.xlu0 %1868  ;;  %v4536_v55 = vadd.f32 %v2936_v27, %v1934_v42  ;;  %v4544_v49 = vsel %vm1982_vm0, %v1966_v51, %v1998_v59  ;;  %v4546_v11 = vsel %vm1981_vm1, %v1965_v52, %v1997_v41  ;;  %v2941_v22 = vld [vmem:[%s4239_s21 + $0x138] sm:$0xff]  ;;  %v2940_v42 = vld [vmem:[%s4239_s21 + $0x130] sm:$0xff] }
 0x1aa   : > { %v1297_v46 = vmax.f32 %v1295_v28, %v1296_v26  ;;  %v1668_v23 = vmax.f32 %v1666_v63, %v1667_v40  ;;  %v1937_v34 = vadd.f32 %v4503_v25, %v1874_v50  ;;  %5058 = vst [vmem:[#allocation21_spill] sm:$0xff] %v4541_v35  ;;  %v1936_v47 = vadd.f32 %v4503_v25, %v1869_v43  ;;  %v4559_v43 = vld [vmem:[%s4237_s19 + $0x3] ss:$0 sm:$0xff] }
 0x1ab   : > { %5059 = vst [vmem:[#allocation22_spill] sm:$0xff] %v4544_v49  ;;  %5060 = vst [vmem:[#allocation23_spill] sm:$0xff] %v4546_v11  ;;  %vm1984_vm2 = vcmp.gt.f32.partialorder %v1968_v12, 0.0  ;;  %v2000_v28 = vmul.f32 0.2, %v1968_v12  ;;  %vm1983_vm3 = vcmp.gt.f32.partialorder %v4536_v55, 0.0 }
 0x1ac   : > { %v1298_v29 = vrot.slane %v1297_v46, 1  ;;  %v1669_v48 = vrot.slane %v1668_v23, 4  ;;  %v1970_v4 = vadd.f32 %v2939_v32, %v1937_v34  ;;  %v1969_v5 = vadd.f32 %v2938_v58, %v1936_v47 }
 0x1ad   : > { %v1884_v63 = vpop.permute.xlu1 %1883  ;;  %v1879_v62 = vpop.permute.xlu0 %1878 }
 0x1ae   : > { %v1299_v24 = vmax.f32 %v1297_v46, %v1298_v29  ;;  %v1670_v27 = vmax.f32 %v1668_v23, %v1669_v48  ;;  %v1939_v51 = vadd.f32 %v4503_v25, %v1884_v63  ;;  %vm1986_vm4 = vcmp.gt.f32.partialorder %v1970_v4, 0.0 }
 0x1af   : > { %v2002_v52 = vmul.f32 0.2, %v1970_v4  ;;  %vm1985_vm5 = vcmp.gt.f32.partialorder %v1969_v5, 0.0  ;;  %v2001_v59 = vmul.f32 0.2, %v1969_v5  ;;  %v1938_v50 = vadd.f32 %v4503_v25, %v1879_v62  ;;  %v2974_v62 = vld [vmem:[%s4239_s21 + $0x180] sm:$0xff] }
 0x1b0   : > { %v4554_v26 = vmax.f32 %v4548_v17, %v1299_v24  ;;  %v1671_v40 = vrot.slane %v1670_v27, 2  ;;  %v1972_v41 = vadd.f32 %v2941_v22, %v1939_v51  ;;  %v4562_v46 = vsel %vm1984_vm2, %v1968_v12, %v2000_v28  ;;  %v2975_v22 = vld [vmem:[%s4239_s21 + $0x188] sm:$0xff] }
 0x1b1   : > { %5063 = vst [vmem:[#allocation26_spill] sm:$0xff] %v4562_v46  ;;  %v1999_v23 = vmul.f32 0.2, %v4536_v55  ;;  %v4565_v32 = vsel %vm1986_vm4, %v1970_v4, %v2002_v52  ;;  %v4567_v34 = vsel %vm1985_vm5, %v1969_v5, %v2001_v59  ;;  %v2231_v58 = vpop.permute.xlu1 %2230  ;;  %v2226_v47 = vpop.permute.xlu0 %2225  ;;  %v1971_v5 = vadd.f32 %v2940_v42, %v1938_v50  ;;  %v4584_v59 = vld [vmem:[#allocation2 + $0x1] sm:$0x1] }
 0x1b2   : > { %5062 = vst [vmem:[#allocation25_spill] sm:$0xff] %v4554_v26  ;;  %5064 = vst [vmem:[#allocation27_spill] sm:$0xff] %v4565_v32  ;;  %v4571_v29 = vrot.slane %v4554_v26, %v4541_v35  ;;  %v1672_v48 = vmax.f32 %v1670_v27, %v1671_v40  ;;  %v2032_v12 = vmax.f32 %v4544_v49, %v4565_v32  ;;  %vm1988_vm6 = vcmp.gt.f32.partialorder %v1972_v41, 0.0 }
 0x1b3   : > { %5065 = vst [vmem:[#allocation28_spill] sm:$0xff] %v4567_v34  ;;  %1449 = vst [vmem:[#allocation2] sm:$0x1] %v4554_v26  ;;  %v2031_v28 = vmax.f32 %v4546_v11, %v4567_v34  ;;  %v2004_v4 = vmul.f32 0.2, %v1972_v41  ;;  %v2310_v63 = vadd.f32 %v4559_v43, %v2231_v58  ;;  %v2309_v27 = vadd.f32 %v4559_v43, %v2226_v47 }
 0x1b4   : > { %v1324_v24 = vsub.f32 %v4494_v3, %v4571_v29  ;;  %v1673_v51 = vrot.slane %v1672_v48, 1  ;;  %vm1987_vm7 = vcmp.gt.f32.partialorder %v1971_v5, 0.0  ;;  %v2003_v17 = vmul.f32 0.2, %v1971_v5 }
 0x1b5   : > { %v2036_v52 = vmax.f32 %v2032_v12, %v2031_v28  ;;  %v4586_v40 = vsel %vm1988_vm6, %v1972_v41, %v2004_v4  ;;  %v2343_v26 = vadd.f32 %v2975_v22, %v2310_v63  ;;  %v2241_v32 = vpop.permute.xlu1 %2240  ;;  %v2236_v42 = vpop.permute.xlu0 %2235  ;;  %v2342_v3 = vadd.f32 %v2974_v62, %v2309_v27  ;;  %v2977_v12 = vld [vmem:[%s4239_s21 + $0x198] sm:$0xff] }
 0x1b6   : > { %5066 = vst [vmem:[#allocation29_spill] sm:$0xff] %v4586_v40  ;;  %v1354_v50 = vmul.f32 1.442695, %v1324_v24  ;;  %v1674_v58 = vmax.f32 %v1672_v48, %v1673_v51  ;;  %v2034_v34 = vmax.f32 %v4562_v46, %v4586_v40  ;;  %v4591_v28 = vsel %vm1987_vm7, %v1971_v5, %v2003_v17  ;;  %v2976_v24 = vld [vmem:[%s4239_s21 + $0x190] sm:$0xff] }
 0x1b7   : > { %5067 = vst [vmem:[#allocation30_spill] sm:$0xff] %v4591_v28  ;;  %vm2359_vm8 = vcmp.gt.f32.partialorder %v2343_v26, 0.0  ;;  %v2375_v47 = vmul.f32 0.2, %v2343_v26  ;;  %v2312_v41 = vadd.f32 %v4559_v43, %v2241_v32  ;;  %v4600_v48 = vsel %vm1983_vm3, %v4536_v55, %v1999_v23  ;;  %v2979_v32 = vld [vmem:[%s4239_s21 + $0x1a8] sm:$0xff] }
 0x1b8   : > { %3466 = vpow2.f32 %v1354_v50  ;;  %v4595_v22 = vmax.f32 %v4584_v59, %v1674_v58  ;;  %5068 = vst [vmem:[#allocation31_spill] sm:$0xff] %v4600_v48  ;;  %v2035_v4 = vmax.f32 %v2034_v34, %v2036_v52  ;;  %v2033_v63 = vmax.f32 %v4600_v48, %v4591_v28  ;;  %v2978_v34 = vld [vmem:[%s4239_s21 + $0x1a0] sm:$0xff] }
 0x1b9   : > { %v4604_v17 = vsel %vm2359_vm8, %v2343_v26, %v2375_v47  ;;  %v2374_v5 = vmul.f32 0.2, %v2342_v3  ;;  %v2345_v62 = vadd.f32 %v2977_v12, %v2312_v41  ;;  %v2251_v51 = vpop.permute.xlu1 %2250  ;;  %v2246_v27 = vpop.permute.xlu0 %2245  ;;  %vm2358_vm9 = vcmp.gt.f32.partialorder %v2342_v3, 0.0 }
 0x1ba   : > { %v4610_v50 = vrot.slane %v4595_v22, %v4541_v35  ;;  %1826 = vst [vmem:[#allocation2 + $0x1] sm:$0x1] %v4595_v22  ;;  %v2311_v55 = vadd.f32 %v4559_v43, %v2236_v42  ;;  %v2314_v23 = vadd.f32 %v4559_v43, %v2251_v51  ;;  %v4616_v26 = vmax.f32 %v2033_v63, %v2035_v4 }
 0x1bb   : > { %vm2361_vm10 = vcmp.gt.f32.partialorder %v2345_v62, 0.0  ;;  %v2377_v52 = vmul.f32 0.2, %v2345_v62  ;;  %v2313_v58 = vadd.f32 %v4559_v43, %v2246_v27  ;;  %v1310_v40 = vsub.f32 %v4362_v19, %v4571_v29 }
 0x1bc   : > { %v1699_v12 = vsub.f32 %v4527_v31, %v4610_v50  ;;  %v2344_v47 = vadd.f32 %v2976_v24, %v2311_v55  ;;  %v2347_v41 = vadd.f32 %v2979_v32, %v2314_v23  ;;  %v4623_v42 = vsel %vm2358_vm9, %v2342_v3, %v2374_v5  ;;  %v2981_v31 = vld [vmem:[%s4239_s21 + $0x1b8] sm:$0xff] }
 0x1bd   : > { %v4625_v51 = vsel %vm2361_vm10, %v2345_v62, %v2377_v52  ;;  %v2346_v4 = vadd.f32 %v2978_v34, %v2313_v58  ;;  %v2261_v63 = vpop.permute.xlu1 %2260  ;;  %v2256_v28 = vpop.permute.xlu0 %2255  ;;  %v1311_v46 = vsub.f32 %v4368_v21, %v4571_v29  ;;  %v1312_v24 = vsub.f32 %v4359_v18, %v4571_v29  ;;  %v2980_v62 = vld [vmem:[%s4239_s21 + $0x1b0] sm:$0xff]  ;;  %v2943_v18 = vld [vmem:[%s4239_s21 + $0x148] sm:$0xff] }
 0x1be   : > { %5069 = vst [vmem:[#allocation32_spill] sm:$0xff] %v4625_v51  ;;  %vm2360_vm11 = vcmp.gt.f32.partialorder %v2344_v47, 0.0  ;;  %v2376_v27 = vmul.f32 0.2, %v2344_v47  ;;  %vm2363_vm12 = vcmp.gt.f32.partialorder %v2347_v41, 0.0  ;;  %v2316_v5 = vadd.f32 %v4559_v43, %v2261_v63 }
 0x1bf   : > { %v2379_v19 = vmul.f32 0.2, %v2347_v41  ;;  %vm2362_vm13 = vcmp.gt.f32.partialorder %v2346_v4, 0.0  ;;  %v2378_v3 = vmul.f32 0.2, %v2346_v4  ;;  %v2315_v21 = vadd.f32 %v4559_v43, %v2256_v28  ;;  %v2942_v28 = vld [vmem:[%s4239_s21 + $0x140] sm:$0xff] }
 0x1c0   : > { %v4634_v32 = vmul.f32 1.442695, %v1699_v12  ;;  %v4636_v55 = vsel %vm2360_vm11, %v2344_v47, %v2376_v27  ;;  %v1326_v23 = vmul.f32 1.442695, %v1310_v40  ;;  %v2349_v58 = vadd.f32 %v2981_v31, %v2316_v5 }
 0x1c1   : > { %v4639_v34 = vsel %vm2363_vm12, %v2347_v41, %v2379_v19  ;;  %v4641_v52 = vsel %vm2362_vm13, %v2346_v4, %v2378_v3  ;;  %v1894_v48 = vpop.permute.xlu1 %1893  ;;  %v1889_v49 = vpop.permute.xlu0 %1888  ;;  %v1328_v11 = vmul.f32 1.442695, %v1311_v46  ;;  %v2348_v63 = vadd.f32 %v2980_v62, %v2315_v21 }
 0x1c2   : > { %5070 = vst [vmem:[#allocation33_spill] sm:$0xff] %v4639_v34  ;;  %5071 = vst [vmem:[#allocation34_spill] sm:$0xff] %v4641_v52  ;;  %v4644_v35 = vpop.eup %3466  ;;  %v2409_v12 = vmax.f32 %v4604_v17, %v4639_v34  ;;  %v2408_v47 = vmax.f32 %v4623_v42, %v4641_v52  ;;  %v1941_v40 = vadd.f32 %v4503_v25, %v1894_v48  ;;  %vm2365_vm14 = vcmp.gt.f32.partialorder %v2349_v58, 0.0 }
 0x1c3   : > { %v2381_v41 = vmul.f32 0.2, %v2349_v58  ;;  %v1940_v4 = vadd.f32 %v4503_v25, %v1889_v49  ;;  %3468 = vpow2.f32 %v1326_v23  ;;  %vm2364_vm15 = vcmp.gt.f32.partialorder %v2348_v63, 0.0 }
 0x1c4   : > { %v2413_v27 = vmax.f32 %v2409_v12, %v2408_v47  ;;  %v2380_v46 = vmul.f32 0.2, %v2348_v63  ;;  %v1974_v31 = vadd.f32 %v2943_v18, %v1941_v40  ;;  %3470 = vpow2.f32 %v1328_v11  ;;  %v2945_v12 = vld [vmem:[%s4239_s21 + $0x158] sm:$0xff]  ;;  %v2944_v47 = vld [vmem:[%s4239_s21 + $0x150] sm:$0xff] }
 0x1c5   : > { %v4653_v19 = vsel %vm2365_vm14, %v2349_v58, %v2381_v41  ;;  %v1973_v3 = vadd.f32 %v2942_v28, %v1940_v4  ;;  %v1904_v5 = vpop.permute.xlu1 %1903  ;;  %v1899_v62 = vpop.permute.xlu0 %1898  ;;  %v1313_v48 = vsub.f32 %v4365_v20, %v4571_v29  ;;  %v1330_v41 = vmul.f32 1.442695, %v1312_v24 }
 0x1c6   : > { %5072 = vst [vmem:[#allocation35_spill] sm:$0xff] %v4653_v19  ;;  %v2411_v21 = vmax.f32 %v4625_v51, %v4653_v19  ;;  %v4659_v49 = vsel %vm2364_vm15, %v2348_v63, %v2380_v46  ;;  %vm1990_vm0 = vcmp.gt.f32.partialorder %v1974_v31, 0.0  ;;  %v2006_v23 = vmul.f32 0.2, %v1974_v31 }
 0x1c7   : > { %5073 = vst [vmem:[#allocation36_spill] sm:$0xff] %v4659_v49  ;;  %v2410_v58 = vmax.f32 %v4636_v55, %v4659_v49  ;;  %vm1989_vm1 = vcmp.gt.f32.partialorder %v1973_v3, 0.0  ;;  %v2005_v18 = vmul.f32 0.2, %v1973_v3  ;;  %v1943_v11 = vadd.f32 %v4503_v25, %v1904_v5  ;;  %v2983_v49 = vld [vmem:[%s4239_s21 + $0x1c8] sm:$0xff] }
 0x1c8   : > { %v2412_v40 = vmax.f32 %v2411_v21, %v2413_v27  ;;  %v4666_v28 = vsel %vm1990_vm0, %v1974_v31, %v2006_v23  ;;  %v1942_v20 = vadd.f32 %v4503_v25, %v1899_v62  ;;  %v1332_v19 = vmul.f32 1.442695, %v1313_v48  ;;  %v2982_v62 = vld [vmem:[%s4239_s21 + $0x1c0] sm:$0xff] }
 0x1c9   : > { %v2037_v63 = vmax.f32 %v4666_v28, %v4616_v26  ;;  %v4671_v4 = vsel %vm1989_vm1, %v1973_v3, %v2005_v18  ;;  %v1976_v46 = vadd.f32 %v2945_v12, %v1943_v11  ;;  %v2271_v34 = vpop.permute.xlu1 %2270  ;;  %v2266_v52 = vpop.permute.xlu0 %2265  ;;  %3472 = vpow2.f32 %v1330_v41 }
 0x1ca   : > { %v2415_v51 = vmax.f32 %v2410_v58, %v2412_v40  ;;  %v1975_v5 = vadd.f32 %v2944_v47, %v1942_v20  ;;  %v2318_v27 = vadd.f32 %v4559_v43, %v2271_v34  ;;  %3474 = vpow2.f32 %v1332_v19 }
 0x1cb   : > { %v2040_v31 = vmax.f32 %v4671_v4, %v2037_v63  ;;  %vm1992_vm2 = vcmp.gt.f32.partialorder %v1976_v46, 0.0  ;;  %v2008_v24 = vmul.f32 0.2, %v1976_v46  ;;  %v2317_v21 = vadd.f32 %v4559_v43, %v2266_v52 }
 0x1cc   : > { %vm1991_vm3 = vcmp.gt.f32.partialorder %v1975_v5, 0.0  ;;  %v2007_v26 = vmul.f32 0.2, %v1975_v5  ;;  %v2351_v3 = vadd.f32 %v2983_v49, %v2318_v27  ;;  %v1314_v12 = vsub.f32 %v4348_v9, %v4571_v29 }
 0x1cd   : > { %v3469_v48 = vpop.eup %3468  ;;  %v4678_v23 = vsel %vm1992_vm2, %v1976_v46, %v2008_v24  ;;  %v1315_v34 = vsub.f32 %v4346_v8, %v4571_v29  ;;  %v1685_v58 = vsub.f32 %v4394_v56, %v4610_v50  ;;  %v2281_v52 = vpop.permute.xlu1 %2280  ;;  %v2350_v47 = vadd.f32 %v2982_v62, %v2317_v21  ;;  %v2984_v24 = vld [vmem:[%s4239_s21 + $0x1d0] sm:$0xff] }
 0x1ce   : > { %v2039_v19 = vmax.f32 %v4678_v23, %v2040_v31  ;;  %v4687_v18 = vsel %vm1991_vm3, %v1975_v5, %v2007_v26  ;;  %vm2367_vm4 = vcmp.gt.f32.partialorder %v2351_v3, 0.0  ;;  %v2383_v49 = vmul.f32 0.2, %v2351_v3  ;;  %v3471_v11 = vpop.eup %3470  ;;  %v2276_v8 = vpop.permute.xlu0 %2275  ;;  %v2985_v31 = vld [vmem:[%s4239_s21 + $0x1d8] sm:$0xff] }
 0x1cf   : > { %v1334_v40 = vmul.f32 1.442695, %v1314_v12  ;;  %v1336_v20 = vmul.f32 1.442695, %v1315_v34  ;;  %v1686_v9 = vsub.f32 %v4391_v54, %v4610_v50  ;;  %v3227_v41 = vpack.c.bf16 %v3471_v11, %v3469_v48 }
 0x1d0   : > { %v4692_v56 = vmax.f32 %v2039_v19, %v4687_v18  ;;  %v4694_v63 = vsel %vm2367_vm4, %v2351_v3, %v2383_v49  ;;  %v1701_v46 = vmul.f32 1.442695, %v1685_v58  ;;  %vm2366_vm5 = vcmp.gt.f32.partialorder %v2350_v47, 0.0 }
 0x1d1   : > { %v2414_v5 = vmax.f32 %v4694_v63, %v2415_v51  ;;  %v2382_v27 = vmul.f32 0.2, %v2350_v47  ;;  %3476 = vpow2.f32 %v1334_v40  ;;  %3228 = vmatprep.subr.bf16.mxu0 %v3227_v41  ;;  %v1703_v26 = vmul.f32 1.442695, %v1686_v9  ;;  %v1914_v19 = vpop.permute.xlu1 %1913  ;;  %v2947_v9 = vld [vmem:[%s4239_s21 + $0x168] sm:$0xff] }
 0x1d2   : > { %3478 = vpow2.f32 %v1336_v20  ;;  %v2320_v54 = vadd.f32 %v4559_v43, %v2281_v52  ;;  %v2319_v62 = vadd.f32 %v4559_v43, %v2276_v8  ;;  %3230 = vmatpush3.bf16.msra.mxu0 %v3227_v41  ;;  %v1316_v3 = vsub.f32 %v4354_v15, %v4571_v29  ;;  %v1909_v40 = vpop.permute.xlu0 %1908  ;;  %v2946_v8 = vld [vmem:[%s4239_s21 + $0x160] sm:$0xff] }
 0x1d3   : > { %v4701_v21 = vsel %vm2366_vm5, %v2350_v47, %v2382_v27  ;;  %3480 = vpow2.f32 %v1701_v46  ;;  %v1317_v51 = vsub.f32 %v4352_v14, %v4571_v29  ;;  %v3473_v48 = vpop.eup %3472  ;;  %v1687_v47 = vsub.f32 %v4412_v16, %v4610_v50 }
 0x1d4   : > { %v2417_v12 = vmax.f32 %v4701_v21, %v2414_v5  ;;  %3482 = vpow2.f32 %v1703_v26  ;;  %v2353_v34 = vadd.f32 %v2985_v31, %v2320_v54  ;;  %v2352_v58 = vadd.f32 %v2984_v24, %v2319_v62  ;;  %v3475_v49 = vpop.eup %3474 }
 0x1d5   : > { %v1338_v52 = vmul.f32 1.442695, %v1316_v3  ;;  %v1340_v11 = vmul.f32 1.442695, %v1317_v51  ;;  %v1688_v15 = vsub.f32 %v4409_v13, %v4610_v50  ;;  %v3231_v14 = vpack.c.bf16 %v3475_v49, %v3473_v48  ;;  %v1924_v51 = vpop.permute.xlu1 %1923 }
 0x1d6   : > { %vm2369_vm6 = vcmp.gt.f32.partialorder %v2353_v34, 0.0  ;;  %v2385_v20 = vmul.f32 0.2, %v2353_v34  ;;  %vm2368_vm7 = vcmp.gt.f32.partialorder %v2352_v58, 0.0  ;;  %v2384_v41 = vmul.f32 0.2, %v2352_v58 }
 0x1d7   : > { %3484 = vpow2.f32 %v1338_v52  ;;  %v1705_v46 = vmul.f32 1.442695, %v1687_v47  ;;  %v1707_v5 = vmul.f32 1.442695, %v1688_v15  ;;  %3232 = vmatprep.subr.bf16.mxu0 %v3231_v14  ;;  %v1945_v16 = vadd.f32 %v4503_v25, %v1914_v19 }
 0x1d8   : > { %v4714_v27 = vsel %vm2369_vm6, %v2353_v34, %v2385_v20  ;;  %3486 = vpow2.f32 %v1340_v11  ;;  %v1944_v31 = vadd.f32 %v4503_v25, %v1909_v40  ;;  %3234 = vmatpush3.bf16.msra.mxu0 %v3231_v14  ;;  %v4719_v24 = vsel %vm2368_vm7, %v2352_v58, %v2384_v41  ;;  %v2949_v14 = vld [vmem:[%s4239_s21 + $0x178] sm:$0xff]  ;;  %v2948_v41 = vld [vmem:[%s4239_s21 + $0x170] sm:$0xff] }
 0x1d9   : > { %v2416_v13 = vmax.f32 %v4714_v27, %v2417_v12  ;;  %3488 = vpow2.f32 %v1705_v46  ;;  %v1318_v26 = vsub.f32 %v4432_v45, %v4571_v29  ;;  %v1978_v54 = vadd.f32 %v2947_v9, %v1945_v16 }
 0x1da   : > { %3490 = vpow2.f32 %v1707_v5  ;;  %v1977_v62 = vadd.f32 %v2946_v8, %v1944_v31  ;;  %v1319_v3 = vsub.f32 %v4430_v44, %v4571_v29  ;;  %v1689_v12 = vsub.f32 %v4402_v2, %v4610_v50  ;;  %v1919_v44 = vpop.permute.xlu0 %1918 }
 0x1db   : > { %v3477_v48 = vpop.eup %3476  ;;  %v4726_v34 = vmax.f32 %v2416_v13, %v4719_v24  ;;  %v1342_v19 = vmul.f32 1.442695, %v1318_v26  ;;  %v1690_v58 = vsub.f32 %v4399_v1, %v4610_v50  ;;  %vm1994_vm8 = vcmp.gt.f32.partialorder %v1978_v54, 0.0 }
 0x1dc   : > { %v3479_v45 = vpop.eup %3478  ;;  %v2010_v49 = vmul.f32 0.2, %v1978_v54  ;;  %vm1993_vm9 = vcmp.gt.f32.partialorder %v1977_v62, 0.0  ;;  %v2009_v52 = vmul.f32 0.2, %v1977_v62  ;;  %v1947_v1 = vadd.f32 %v4503_v25, %v1924_v51 }
 0x1dd   : > { %v3481_v11 = vpop.eup %3480  ;;  %v3235_v47 = vpack.c.bf16 %v3479_v45, %v3477_v48  ;;  %3492 = vpow2.f32 %v1342_v19  ;;  %v1344_v15 = vmul.f32 1.442695, %v1319_v3  ;;  %v1709_v40 = vmul.f32 1.442695, %v1689_v12 }
 0x1de   : > { %v3483_v20 = vpop.eup %3482  ;;  %v4733_v9 = vsel %vm1994_vm8, %v1978_v54, %v2010_v49  ;;  %v4735_v2 = vsel %vm1993_vm9, %v1977_v62, %v2009_v52  ;;  %v1711_v8 = vmul.f32 1.442695, %v1690_v58  ;;  %v1946_v16 = vadd.f32 %v4503_v25, %v1919_v44  ;;  %v2291_v54 = vpop.permute.xlu1 %2290 }
 0x1df   : > { %3236 = vmatprep.subr.bf16.mxu0 %v3235_v47  ;;  %v3259_v46 = vpack.c.bf16 %v3483_v20, %v3481_v11  ;;  %v2042_v5 = vmax.f32 %v4733_v9, %v4692_v56  ;;  %3494 = vpow2.f32 %v1344_v15  ;;  %v1980_v31 = vadd.f32 %v2949_v14, %v1947_v1  ;;  %v2286_v49 = vpop.permute.xlu0 %2285  ;;  %v2986_v14 = vld [vmem:[%s4239_s21 + $0x1e0] sm:$0xff] }
 0x1e0   : > { %3238 = vmatpush3.bf16.msra.mxu0 %v3235_v47  ;;  %3496 = vpow2.f32 %v1709_v40  ;;  %v1320_v13 = vsub.f32 %v4446_v61, %v4571_v29  ;;  %v1321_v26 = vsub.f32 %v4443_v60, %v4571_v29  ;;  %v1979_v51 = vadd.f32 %v2948_v41, %v1946_v16 }
 0x1e1   : > { %v3485_v62 = vpop.eup %3484  ;;  %3260 = vmatprep.subr.bf16.mxu1 %v3259_v46  ;;  %v2041_v3 = vmax.f32 %v4735_v2, %v2042_v5  ;;  %3498 = vpow2.f32 %v1711_v8  ;;  %v1691_v56 = vsub.f32 %v4424_v37, %v4610_v50  ;;  %vm1996_vm10 = vcmp.gt.f32.partialorder %v1980_v31, 0.0 }
 0x1e2   : > { %v3487_v25 = vpop.eup %3486  ;;  %3262 = vmatpush3.bf16.msra.mxu1 %v3259_v46  ;;  %v2012_v48 = vmul.f32 0.2, %v1980_v31  ;;  %v1346_v19 = vmul.f32 1.442695, %v1320_v13  ;;  %v1692_v61 = vsub.f32 %v4421_v36, %v4610_v50  ;;  %vm1995_vm11 = vcmp.gt.f32.partialorder %v1979_v51, 0.0  ;;  %v2987_v36 = vld [vmem:[%s4239_s21 + $0x1e8] sm:$0xff]  ;;  %v2301_v41 = vpop.permute.xlu1 %2300 }
 0x1e3   : > { %v3489_v12 = vpop.eup %3488  ;;  %v3239_v60 = vpack.c.bf16 %v3487_v25, %v3485_v62  ;;  %v2011_v58 = vmul.f32 0.2, %v1979_v51  ;;  %v1348_v45 = vmul.f32 1.442695, %v1321_v26  ;;  %v1713_v37 = vmul.f32 1.442695, %v1691_v56 }
 0x1e4   : > { %v3491_v52 = vpop.eup %3490  ;;  %v4751_v44 = vsel %vm1996_vm10, %v1980_v31, %v2012_v48  ;;  %3500 = vpow2.f32 %v1346_v19  ;;  %v1715_v11 = vmul.f32 1.442695, %v1692_v61  ;;  %v2322_v20 = vadd.f32 %v4559_v43, %v2291_v54  ;;  %v2989_v25 = vld [vmem:[%s4239_s21 + $0x1f8] sm:$0xff] }
 0x1e5   : > { %3240 = vmatprep.subr.bf16.mxu0 %v3239_v60  ;;  %v3263_v47 = vpack.c.bf16 %v3491_v52, %v3489_v12  ;;  %v2044_v15 = vmax.f32 %v2041_v3, %v4751_v44  ;;  %v4754_v40 = vsel %vm1995_vm11, %v1979_v51, %v2011_v58  ;;  %3502 = vpow2.f32 %v1348_v45  ;;  %v2296_v45 = vpop.permute.xlu0 %2295 }
 0x1e6   : > { %3242 = vmatpush3.bf16.msra.mxu0 %v3239_v60  ;;  %3504 = vpow2.f32 %v1713_v37  ;;  %v2321_v8 = vadd.f32 %v4559_v43, %v2286_v49  ;;  %v1322_v1 = vsub.f32 %v4480_v38, %v4571_v29  ;;  %v1323_v16 = vsub.f32 %v4478_v33, %v4571_v29 }
 0x1e7   : > { %v3493_v46 = vpop.eup %3492  ;;  %3264 = vmatprep.subr.bf16.mxu1 %v3263_v47  ;;  %v2045_v5 = vmax.f32 %v4754_v40, %v2044_v15  ;;  %3506 = vpow2.f32 %v1715_v11  ;;  %v1693_v31 = vsub.f32 %v4458_v7, %v4610_v50  ;;  %v2355_v13 = vadd.f32 %v2987_v36, %v2322_v20  ;;  %v2988_v15 = vld [vmem:[%s4239_s21 + $0x1f0] sm:$0xff] }
 0x1e8   : > { %3266 = vmatpush3.bf16.msra.mxu1 %v3263_v47  ;;  %v2354_v26 = vadd.f32 %v2986_v14, %v2321_v8  ;;  %v1350_v54 = vmul.f32 1.442695, %v1322_v1  ;;  %v1694_v38 = vsub.f32 %v4456_v6, %v4610_v50  ;;  %v1352_v51 = vmul.f32 1.442695, %v1323_v16  ;;  %v4784_v16 = vld [vmem:[#allocation2 + $0x2] sm:$0x1] }
 0x1e9   : > { %v3495_v62 = vpop.eup %3494  ;;  %v2046_v3 = vrot.slane %v2045_v5, 4  ;;  %v1717_v56 = vmul.f32 1.442695, %v1693_v31  ;;  %v2324_v48 = vadd.f32 %v4559_v43, %v2301_v41  ;;  %vm2371_vm12 = vcmp.gt.f32.partialorder %v2355_v13, 0.0 }
 0x1ea   : > { %v3497_v19 = vpop.eup %3496  ;;  %v3243_v61 = vpack.c.bf16 %v3495_v62, %v3493_v46  ;;  %v2387_v33 = vmul.f32 0.2, %v2355_v13  ;;  %vm2370_vm13 = vcmp.gt.f32.partialorder %v2354_v26, 0.0  ;;  %v2386_v60 = vmul.f32 0.2, %v2354_v26 }
 0x1eb   : > { %v3499_v7 = vpop.eup %3498  ;;  %v2047_v12 = vmax.f32 %v2045_v5, %v2046_v3  ;;  %3508 = vpow2.f32 %v1350_v54  ;;  %v1719_v58 = vmul.f32 1.442695, %v1694_v38  ;;  %v2357_v52 = vadd.f32 %v2989_v25, %v2324_v48 }
 0x1ec   : > { %3244 = vmatprep.subr.bf16.mxu0 %v3243_v61  ;;  %v3267_v6 = vpack.c.bf16 %v3499_v7, %v3497_v19  ;;  %v4771_v49 = vsel %vm2371_vm12, %v2355_v13, %v2387_v33  ;;  %3510 = vpow2.f32 %v1352_v51  ;;  %v4775_v47 = vsel %vm2370_vm13, %v2354_v26, %v2386_v60 }
 0x1ed   : > { %3246 = vmatpush3.bf16.msra.mxu0 %v3243_v61  ;;  %v2048_v37 = vrot.slane %v2047_v12, 2  ;;  %v2419_v11 = vmax.f32 %v4771_v49, %v4726_v34  ;;  %3512 = vpow2.f32 %v1717_v56  ;;  %vm2373_vm14 = vcmp.gt.f32.partialorder %v2357_v52, 0.0 }
 0x1ee   : > { %v3501_v36 = vpop.eup %3500  ;;  %3268 = vmatprep.subr.bf16.mxu1 %v3267_v6  ;;  %3514 = vpow2.f32 %v1719_v58  ;;  %v2389_v14 = vmul.f32 0.2, %v2357_v52  ;;  %v2323_v20 = vadd.f32 %v4559_v43, %v2296_v45  ;;  %v1325_v46 = vsub.f32 %v4492_v0, %v4571_v29 }
 0x1ef   : > { %v3503_v8 = vpop.eup %3502  ;;  %3270 = vmatpush3.bf16.msra.mxu1 %v3267_v6  ;;  %v2049_v1 = vmax.f32 %v2047_v12, %v2048_v37  ;;  %v2418_v41 = vmax.f32 %v4775_v47, %v2419_v11  ;;  %v1695_v34 = vsub.f32 %v4490_v57, %v4610_v50  ;;  %v1696_v43 = vsub.f32 %v4488_v53, %v4610_v50  ;;  %v5074_v6 = vld [vmem:[#allocation21_spill] sm:$0xff] }
 0x1f0   : > { %v3505_v5 = vpop.eup %3504  ;;  %v3247_v31 = vpack.c.bf16 %v3503_v8, %v3501_v36  ;;  %v4786_v13 = vsel %vm2373_vm14, %v2357_v52, %v2389_v14  ;;  %v2356_v26 = vadd.f32 %v2988_v15, %v2323_v20  ;;  %v1356_v3 = vmul.f32 1.442695, %v1325_v46  ;;  %v5075_v36 = vld [vmem:[#allocation23_spill] sm:$0xff]  ;;  %v5076_v20 = vld [vmem:[#allocation22_spill] sm:$0xff] }
 0x1f1   : > { %v3507_v54 = vpop.eup %3506  ;;  %v2050_v38 = vrot.slane %v2049_v1, 1  ;;  %v2421_v62 = vmax.f32 %v2418_v41, %v4786_v13  ;;  %v1721_v51 = vmul.f32 1.442695, %v1695_v34  ;;  %v1723_v29 = vmul.f32 1.442695, %v1696_v43  ;;  %v5078_v46 = vld [vmem:[#allocation26_spill] sm:$0xff] }
 0x1f2   : > { %3248 = vmatprep.subr.bf16.mxu0 %v3247_v31  ;;  %v3271_v0 = vpack.c.bf16 %v3507_v54, %v3505_v5  ;;  %vm2372_vm15 = vcmp.gt.f32.partialorder %v2356_v26, 0.0  ;;  %v2388_v57 = vmul.f32 0.2, %v2356_v26  ;;  %3516 = vpow2.f32 %v1356_v3  ;;  %v5080_v43 = vld [vmem:[#allocation27_spill] sm:$0xff] }
 0x1f3   : > { %v2051_v56 = vmax.f32 %v2049_v1, %v2050_v38  ;;  %3250 = vmatpush3.bf16.msra.mxu0 %v3247_v31  ;;  %v1697_v25 = vsub.f32 %v4513_v39, %v4610_v50  ;;  %v1698_v53 = vsub.f32 %v4509_v30, %v4610_v50  ;;  %3518 = vpow2.f32 %v1721_v51  ;;  %v5077_v1 = vld [vmem:[#allocation31_spill] sm:$0xff]  ;;  %v5079_v31 = vld [vmem:[#allocation28_spill] sm:$0xff] }
 0x1f4   : > { %3272 = vmatprep.subr.bf16.mxu1 %v3271_v0  ;;  %v4795_v48 = vsel %vm2372_vm15, %v2356_v26, %v2388_v57  ;;  %v1700_v19 = vsub.f32 %v4525_v10, %v4610_v50  ;;  %3520 = vpow2.f32 %v1723_v29  ;;  %v1676_v58 = vsub.f32 %v4584_v59, %v4595_v22  ;;  %v2913_v22 = vld [vmem:[%s4241_s22 + $0x18] sm:$0xff] }
 0x1f5   : > { %v3509_v61 = vpop.eup %3508  ;;  %v4800_v33 = vmax.f32 %v4784_v16, %v2051_v56  ;;  %3274 = vmatpush3.bf16.msra.mxu1 %v3271_v0  ;;  %v2422_v7 = vmax.f32 %v4795_v48, %v2421_v62  ;;  %v1725_v12 = vmul.f32 1.442695, %v1697_v25  ;;  %3522 = vpow2.f32 %v4634_v32 }
 0x1f6   : > { %v3511_v39 = vpop.eup %3510  ;;  %v1727_v30 = vmul.f32 1.442695, %v1698_v53  ;;  %v1731_v60 = vmul.f32 1.442695, %v1700_v19  ;;  %v5081_v53 = vld [vmem:[#allocation30_spill] sm:$0xff] }
 0x1f7   : > { %v3513_v45 = vpop.eup %3512  ;;  %v4808_v10 = vrot.slane %v4800_v33, %v5074_v6  ;;  %2203 = vst [vmem:[#allocation2 + $0x2] sm:$0x1] %v4800_v33  ;;  %v3251_v50 = vpack.c.bf16 %v3511_v39, %v3509_v61  ;;  %v2423_v52 = vrot.slane %v2422_v7, 4  ;;  %3524 = vpow2.f32 %v1725_v12  ;;  %v5082_v39 = vld [vmem:[#allocation29_spill] sm:$0xff] }
 0x1f8   : > { %v3515_v37 = vpop.eup %3514  ;;  %3526 = vpow2.f32 %v1727_v30  ;;  %v2053_v32 = vsub.f32 %v4784_v16, %v4800_v33 }
 0x1f9   : > { %3252 = vmatprep.subr.bf16.mxu0 %v3251_v50  ;;  %v3275_v11 = vpack.c.bf16 %v3515_v37, %v3513_v45  ;;  %v2424_v15 = vmax.f32 %v2422_v7, %v2423_v52  ;;  %3528 = vpow2.f32 %v1731_v60  ;;  %v2062_v14 = vsub.f32 %v5075_v36, %v4808_v10 }
 0x1fa   : > { %3254 = vmatpush3.bf16.msra.mxu0 %v3251_v50  ;;  %v2063_v8 = vsub.f32 %v5076_v20, %v4808_v10  ;;  %v2064_v41 = vsub.f32 %v5077_v1, %v4808_v10  ;;  %v2065_v34 = vsub.f32 %v5078_v46, %v4808_v10  ;;  %v2066_v26 = vsub.f32 %v5079_v31, %v4808_v10  ;;  %v4832_v50 = vld [vmem:[#allocation2 + $0x3] sm:$0x1] }
 0x1fb   : > { %3276 = vmatprep.subr.bf16.mxu1 %v3275_v11  ;;  %v2425_v5 = vrot.slane %v2424_v15, 2  ;;  %v2067_v54 = vsub.f32 %v5080_v43, %v4808_v10  ;;  %v2078_v38 = vmul.f32 1.442695, %v2062_v14  ;;  %v2068_v19 = vsub.f32 %v5081_v53, %v4808_v10 }
 0x1fc   : > { %3278 = vmatpush3.bf16.msra.mxu1 %v3275_v11  ;;  %v2080_v62 = vmul.f32 1.442695, %v2063_v8  ;;  %v2082_v3 = vmul.f32 1.442695, %v2064_v41  ;;  %v3517_v51 = vpop.eup %3516  ;;  %v2084_v57 = vmul.f32 1.442695, %v2065_v34  ;;  %v2069_v30 = vsub.f32 %v5082_v39, %v4808_v10 }
 0x1fd   : > { %v2426_v0 = vmax.f32 %v2424_v15, %v2425_v5  ;;  %v3519_v29 = vpop.eup %3518  ;;  %v3255_v56 = vpack.c.bf16 %v3517_v51, %v4644_v35  ;;  %3530 = vpow2.f32 %v2078_v38  ;;  %v2086_v25 = vmul.f32 1.442695, %v2066_v26  ;;  %v1359_v11 = vld [vmem:[%s4233_s6 + $0x8] sm:$0xff]  ;;  %v2950_v8 = vld [vmem:[%s4233_s6 + $0x20] sm:$0xff]  ;;  %v2911_v39 = vld [vmem:[%s4233_s6 + $0x18] sm:$0xff] }
 0x1fe   : > { %v3521_v61 = vpop.eup %3520  ;;  %3532 = vpow2.f32 %v2080_v62  ;;  %v2088_v12 = vmul.f32 1.442695, %v2067_v54  ;;  %v2076_v45 = vsub.f32 %v4754_v40, %v4808_v10  ;;  %v2070_v15 = vsub.f32 %v4671_v4, %v4808_v10  ;;  %v5083_v51 = vld [vmem:[#allocation32_spill] sm:$0xff] }
 0x1ff   : > { %v2427_v7 = vrot.slane %v2426_v0, 1  ;;  %v3523_v60 = vpop.eup %3522  ;;  %3256 = vmatprep.subr.bf16.mxu0 %v3255_v56  ;;  %v3279_v35 = vpack.c.bf16 %v3521_v61, %v3519_v29  ;;  %3534 = vpow2.f32 %v2082_v3  ;;  %v2071_v36 = vsub.f32 %v4666_v28, %v4808_v10 }
 0x200   : > { %3258 = vmatpush3.bf16.msra.mxu0 %v3255_v56  ;;  %3536 = vpow2.f32 %v2084_v57  ;;  %v2090_v40 = vmul.f32 1.442695, %v2068_v19  ;;  %v2072_v20 = vsub.f32 %v4687_v18, %v4808_v10  ;;  %v2092_v34 = vmul.f32 1.442695, %v2069_v30  ;;  %v5084_v57 = vld [vmem:[#allocation34_spill] sm:$0xff] }
 0x201   : > { %v3525_v52 = vpop.eup %3524  ;;  %v2428_v37 = vmax.f32 %v2426_v0, %v2427_v7  ;;  %3280 = vmatprep.subr.bf16.mxu1 %v3279_v35  ;;  %3538 = vpow2.f32 %v2086_v25  ;;  %v2106_v4 = vmul.f32 1.442695, %v2076_v45  ;;  %v2094_v5 = vmul.f32 1.442695, %v2070_v15 }
 0x202   : > { %v3527_v14 = vpop.eup %3526  ;;  %3282 = vmatpush3.bf16.msra.mxu1 %v3279_v35  ;;  %3540 = vpow2.f32 %v2088_v12  ;;  %v2096_v18 = vmul.f32 1.442695, %v2071_v36  ;;  %v2098_v26 = vmul.f32 1.442695, %v2072_v20  ;;  %v2073_v7 = vsub.f32 %v4678_v23, %v4808_v10  ;;  %v2990_v36 = vld [vmem:[%s4233_s6 + $0x30] sm:$0xff] }
 0x203   : > { %v3529_v1 = vpop.eup %3528  ;;  %v4843_v41 = vmax.f32 %v4832_v50, %v2428_v37  ;;  %v3283_v46 = vpack.c.bf16 %v3527_v14, %v3525_v52  ;;  %3120 = vmatmul.mubr.f32.vlgmr.msra.gmra.mrb[0].mxu0 %v1359_v11  ;;  %3542 = vpow2.f32 %v2090_v40  ;;  %v5087_v11 = vld [vmem:[#allocation35_spill] sm:$0xff]  ;;  %v2074_v40 = vsub.f32 %v4735_v2, %v4808_v10 }
 0x204   : > { %3189 = vmatprep.mubr.f32.mxu0 %v2950_v8  ;;  %v3287_v31 = vpack.c.bf16 %v3529_v1, %v3523_v60  ;;  %3544 = vpow2.f32 %v2092_v34  ;;  %v5086_v60 = vld [vmem:[#allocation36_spill] sm:$0xff]  ;;  %v2100_v20 = vmul.f32 1.442695, %v2073_v7  ;;  %v2075_v8 = vsub.f32 %v4733_v9, %v4808_v10 }
 0x205   : > { %v4847_v28 = vrot.slane %v4843_v41, %v5074_v6  ;;  %2580 = vst [vmem:[#allocation2 + $0x3] sm:$0x1] %v4843_v41  ;;  %3284 = vmatprep.subr.bf16.mxu1 %v3283_v46  ;;  %v2430_v43 = vsub.f32 %v4832_v50, %v4843_v41  ;;  %3546 = vpow2.f32 %v2106_v4  ;;  %v2077_v9 = vsub.f32 %v4751_v44, %v4808_v10  ;;  %v2993_v41 = vld [vmem:[%s4241_s22 + $0x38] sm:$0xff] }
 0x206   : > { %3286 = vmatpush3.bf16.msra.mxu1 %v3283_v46  ;;  %3548 = vpow2.f32 %v2094_v5 }
 0x207   : > { %v2439_v54 = vsub.f32 %v4623_v42, %v4847_v28  ;;  %v2440_v38 = vsub.f32 %v4604_v17, %v4847_v28  ;;  %v2441_v62 = vsub.f32 %v4636_v55, %v4847_v28  ;;  %v3531_v3 = vpop.eup %3530  ;;  %3288 = vmatprep.subr.bf16.mxu1 %v3287_v31  ;;  %v2442_v0 = vsub.f32 %v5083_v51, %v4847_v28  ;;  %v5085_v17 = vld [vmem:[#allocation33_spill] sm:$0xff] }
 0x208   : > { %v2443_v29 = vsub.f32 %v5084_v57, %v4847_v28  ;;  %v3533_v56 = vpop.eup %3532  ;;  %v2444_v53 = vsub.f32 %v5085_v17, %v4847_v28  ;;  %3550 = vpow2.f32 %v2096_v18  ;;  %v2445_v45 = vsub.f32 %v5086_v60, %v4847_v28 }
 0x209   : > { %v2455_v25 = vmul.f32 1.442695, %v2439_v54  ;;  %v2457_v42 = vmul.f32 1.442695, %v2440_v38  ;;  %v3535_v19 = vpop.eup %3534  ;;  %v3291_v61 = vpack.c.bf16 %v3533_v56, %v3531_v3  ;;  %v2459_v55 = vmul.f32 1.442695, %v2441_v62 }
 0x20a   : > { %v3537_v12 = vpop.eup %3536  ;;  %3290 = vmatpush3.bf16.msra.mxu1 %v3287_v31  ;;  %v2461_v30 = vmul.f32 1.442695, %v2442_v0  ;;  %3552 = vpow2.f32 %v2098_v26  ;;  %v2463_v37 = vmul.f32 1.442695, %v2443_v29  ;;  %v2446_v15 = vsub.f32 %v5087_v11, %v4847_v28 }
 0x20b   : > { %v3539_v35 = vpop.eup %3538  ;;  %3292 = vmatprep.subr.bf16.mxu0 %v3291_v61  ;;  %v3295_v52 = vpack.c.bf16 %v3537_v12, %v3535_v19  ;;  %3554 = vpow2.f32 %v2455_v25  ;;  %v2465_v23 = vmul.f32 1.442695, %v2444_v53  ;;  %v2467_v1 = vmul.f32 1.442695, %v2445_v45 }
 0x20c   : > { %v3541_v14 = vpop.eup %3540  ;;  %3294 = vmatpush3.bf16.msra.mxu0 %v3291_v61  ;;  %3556 = vpow2.f32 %v2457_v42  ;;  %v2447_v46 = vsub.f32 %v4701_v21, %v4847_v28  ;;  %v2469_v5 = vmul.f32 1.442695, %v2446_v15  ;;  %v2448_v2 = vsub.f32 %v4694_v63, %v4847_v28 }
 0x20d   : > { %3155 = vmatmul.mubr.f32.vlgmr.msra.gmra.mrb[0].mxu1 %v2911_v39  ;;  %3296 = vmatprep.subr.bf16.mxu0 %v3295_v52  ;;  %3558 = vpow2.f32 %v2459_v55  ;;  %v3543_v34 = vpop.eup %3542  ;;  %v3299_v4 = vpack.c.bf16 %v3541_v14, %v3539_v35  ;;  %v2102_v31 = vmul.f32 1.442695, %v2074_v40  ;;  %v2104_v21 = vmul.f32 1.442695, %v2075_v8 }
 0x20e   : > { %3560 = vpow2.f32 %v2461_v30  ;;  %3224 = vmatprep.mubr.f32.mxu1 %v2990_v36  ;;  %v3545_v18 = vpop.eup %3544  ;;  %v2471_v38 = vmul.f32 1.442695, %v2447_v46  ;;  %v2473_v51 = vmul.f32 1.442695, %v2448_v2  ;;  %v2449_v63 = vsub.f32 %v4719_v24, %v4847_v28  ;;  %v2951_v46 = vld [vmem:[%s4233_s6 + $0x28] sm:$0xff] }
 0x20f   : > { %3562 = vpow2.f32 %v2463_v37  ;;  %v4882_v26 = vpop.eup %3546  ;;  %v3303_v3 = vpack.c.bf16 %v3545_v18, %v3543_v34  ;;  %v2108_v57 = vmul.f32 1.442695, %v2077_v9  ;;  %v2450_v44 = vsub.f32 %v4714_v27, %v4847_v28 }
 0x210   : > { %3298 = vmatpush3.bf16.msra.mxu0 %v3295_v52  ;;  %3564 = vpow2.f32 %v2465_v23  ;;  %v3549_v54 = vpop.eup %3548  ;;  %v2451_v56 = vsub.f32 %v4775_v47, %v4847_v28  ;;  %v2475_v24 = vmul.f32 1.442695, %v2449_v63  ;;  %v2452_v27 = vsub.f32 %v4771_v49, %v4847_v28 }
 0x211   : > { %3300 = vmatprep.subr.bf16.mxu0 %v3299_v4  ;;  %3566 = vpow2.f32 %v2100_v20  ;;  %v2477_v19 = vmul.f32 1.442695, %v2450_v44  ;;  %v2453_v47 = vsub.f32 %v4795_v48, %v4847_v28  ;;  %v2454_v49 = vsub.f32 %v4786_v13, %v4847_v28 }
 0x212   : > { %3568 = vpow2.f32 %v2467_v1  ;;  %v3551_v62 = vpop.eup %3550  ;;  %v2479_v39 = vmul.f32 1.442695, %v2451_v56  ;;  %v2481_v45 = vmul.f32 1.442695, %v2452_v27 }
 0x213   : > { %3570 = vpow2.f32 %v2469_v5  ;;  %v3307_v17 = vpack.c.bf16 %v3551_v62, %v3549_v54  ;;  %v2483_v15 = vmul.f32 1.442695, %v2453_v47  ;;  %v2485_v14 = vmul.f32 1.442695, %v2454_v49  ;;  %v5089_v54 = vld [vmem:[#allocation24_spill] sm:$0xff] }
 0x214   : > { %v3553_v0 = vpop.eup %3552  ;;  %3302 = vmatpush3.bf16.msra.mxu0 %v3299_v4  ;;  %3572 = vpow2.f32 %v2102_v31  ;;  %v2431_v47 = vmul.f32 1.442695, %v2430_v43  ;;  %v2992_v43 = vld [vmem:[%s4241_s22 + $0x30] sm:$0xff] }
 0x215   : > { %v3555_v10 = vpop.eup %3554  ;;  %3304 = vmatprep.subr.bf16.mxu0 %v3303_v3  ;;  %3574 = vpow2.f32 %v2104_v21  ;;  %v5088_v21 = vld [vmem:[#allocation25_spill] sm:$0xff] }
 0x216   : > { %v3557_v29 = vpop.eup %3556  ;;  %3576 = vpow2.f32 %v2471_v38  ;;  %v1301_v38 = vsub.f32 %v5089_v54, %v5088_v21 }
 0x217   : > { %v3559_v25 = vpop.eup %3558  ;;  %v3323_v42 = vpack.c.bf16 %v3557_v29, %v3555_v10  ;;  %3578 = vpow2.f32 %v2473_v51 }
 0x218   : > { %v3561_v53 = vpop.eup %3560  ;;  %3306 = vmatpush3.bf16.msra.mxu0 %v3303_v3  ;;  %3580 = vpow2.f32 %v2108_v57  ;;  %v1302_v62 = vmul.f32 1.442695, %v1301_v38  ;;  %v1677_v3 = vmul.f32 1.442695, %v1676_v58  ;;  %v1360_v57 = vld [vmem:[%s4241_s22] sm:$0xff]  ;;  %v2912_v58 = vld [vmem:[%s4241_s22 + $0x10] sm:$0xff] }
 0x219   : > { %v3563_v61 = vpop.eup %3562  ;;  %3324 = vmatprep.subr.bf16.mxu1 %v3323_v42  ;;  %v3327_v55 = vpack.c.bf16 %v3561_v53, %v3559_v25  ;;  %3308 = vmatprep.subr.bf16.mxu0 %v3307_v17  ;;  %3582 = vpow2.f32 %v2475_v24 }
 0x21a   : > { %v3565_v7 = vpop.eup %3564  ;;  %3326 = vmatpush3.bf16.msra.mxu1 %v3323_v42  ;;  %3584 = vpow2.f32 %v2477_v19 }
 0x21b   : > { %v3567_v12 = vpop.eup %3566  ;;  %3328 = vmatprep.subr.bf16.mxu1 %v3327_v55  ;;  %v3331_v52 = vpack.c.bf16 %v3565_v7, %v3563_v61  ;;  %3586 = vpow2.f32 %v2479_v39  ;;  %v2054_v7 = vmul.f32 1.442695, %v2053_v32 }
 0x21c   : > { %v3569_v30 = vpop.eup %3568  ;;  %3310 = vmatpush3.bf16.msra.mxu0 %v3307_v17  ;;  %v3311_v60 = vpack.c.bf16 %v3567_v12, %v3553_v0  ;;  %3588 = vpow2.f32 %v2481_v45  ;;  %v1361_v0 = vld [vmem:[%s4241_s22 + $0x8] sm:$0xff] }
 0x21d   : > { %v3571_v35 = vpop.eup %3570  ;;  %3590 = vpow2.f32 %v2483_v15 }
 0x21e   : > { %v3573_v37 = vpop.eup %3572  ;;  %3330 = vmatpush3.bf16.msra.mxu1 %v3327_v55  ;;  %3312 = vmatprep.subr.bf16.mxu0 %v3311_v60  ;;  %v3335_v40 = vpack.c.bf16 %v3571_v35, %v3569_v30  ;;  %3592 = vpow2.f32 %v2485_v14  ;;  %v2953_v30 = vld [vmem:[%s4241_s22 + $0x28] sm:$0xff] }
 0x21f   : > { %v3575_v11 = vpop.eup %3574  ;;  %3332 = vmatprep.subr.bf16.mxu1 %v3331_v52  ;;  %3594 = vpow2.f32 %v1302_v62 }
 0x220   : > { %v3577_v48 = vpop.eup %3576  ;;  %3314 = vmatpush3.bf16.msra.mxu0 %v3311_v60  ;;  %v3315_v36 = vpack.c.bf16 %v3575_v11, %v3573_v37  ;;  %3596 = vpow2.f32 %v1677_v3  ;;  %v2952_v60 = vld [vmem:[%s4241_s22 + $0x20] sm:$0xff] }
 0x221   : > { %v3579_v23 = vpop.eup %3578  ;;  %3598 = vpow2.f32 %v2054_v7 }
 0x222   : > { %v3581_v20 = vpop.eup %3580  ;;  %3334 = vmatpush3.bf16.msra.mxu1 %v3331_v52  ;;  %3316 = vmatprep.subr.bf16.mxu0 %v3315_v36  ;;  %v3339_v8 = vpack.c.bf16 %v3579_v23, %v3577_v48  ;;  %3600 = vpow2.f32 %v2431_v47 }
 0x223   : > { %3336 = vmatprep.subr.bf16.mxu1 %v3335_v40  ;;  %v3319_v13 = vpack.c.bf16 %v3581_v20, %v4882_v26  ;;  %v3583_v28 = vpop.eup %3582  ;;  %v2991_v26 = vld [vmem:[%s4233_s6 + $0x38] sm:$0xff] }
 0x224   : > { %3318 = vmatpush3.bf16.msra.mxu0 %v3315_v36  ;;  %v3585_v1 = vpop.eup %3584 }
 0x225   : > { %3320 = vmatprep.subr.bf16.mxu0 %v3319_v13  ;;  %v3587_v34 = vpop.eup %3586  ;;  %v3343_v4 = vpack.c.bf16 %v3585_v1, %v3583_v28 }
 0x226   : > { %3338 = vmatpush3.bf16.msra.mxu1 %v3335_v40  ;;  %v3589_v5 = vpop.eup %3588 }
 0x227   : > { %3340 = vmatprep.subr.bf16.mxu1 %v3339_v8  ;;  %v3591_v2 = vpop.eup %3590  ;;  %v3347_v18 = vpack.c.bf16 %v3589_v5, %v3587_v34 }
 0x228   : > { %3322 = vmatpush3.bf16.msra.mxu0 %v3319_v13  ;;  %v3593_v31 = vpop.eup %3592 }
 0x229   : > { %v3351_v9 = vpack.c.bf16 %v3593_v31, %v3591_v2  ;;  %v3595_v51 = vpop.eup %3594 }
 0x22a   : > { %3342 = vmatpush3.bf16.msra.mxu1 %v3339_v8  ;;  %v1366_v63 = vrot.slane %v3595_v51, %v5074_v6  ;;  %v3597_v42 = vpop.eup %3596 }
 0x22b   : > { %3344 = vmatprep.subr.bf16.mxu1 %v3343_v4  ;;  %3190 = vmatmul.mubr.f32.vlgmr.msra.gmra.mrb[2].mxu0 %v2951_v46  ;;  %v1743_v59 = vrot.slane %v3597_v42, %v5074_v6  ;;  %v3599_v12 = vpop.eup %3598 }
 0x22c   : > { %v1369_v44 = vmul.f32 %v1366_v63, %v1361_v0  ;;  %v1368_v29 = vmul.f32 %v1366_v63, %v1360_v57  ;;  %v2120_v39 = vrot.slane %v3599_v12, %v5074_v6  ;;  %v3601_v52 = vpop.eup %3600 }
 0x22d   : > { %v1746_v24 = vmul.f32 %v2913_v22, %v1743_v59  ;;  %v1745_v19 = vmul.f32 %v2912_v58, %v1743_v59  ;;  %v2497_v50 = vrot.slane %v3601_v52, %v5074_v6 }
 0x22e   : > { %3346 = vmatpush3.bf16.msra.mxu1 %v3343_v4  ;;  %v2123_v45 = vmul.f32 %v2953_v30, %v2120_v39  ;;  %v2122_v35 = vmul.f32 %v2952_v60, %v2120_v39 }
 0x22f   : > { %3348 = vmatprep.subr.bf16.mxu1 %v3347_v18  ;;  %v2500_v37 = vmul.f32 %v2993_v41, %v2497_v50  ;;  %v2499_v15 = vmul.f32 %v2992_v43, %v2497_v50 }
 0x232   : > { %3350 = vmatpush3.bf16.msra.mxu1 %v3347_v18 }
 0x233   : > { %3352 = vmatprep.subr.bf16.mxu1 %v3351_v9 }
 0x236   : > { %3354 = vmatpush3.bf16.msra.mxu1 %v3351_v9 }
 0x239   : > { %3225 = vmatmul.mubr.f32.vlgmr.msra.gmra.mrb[2].mxu1 %v2991_v26 }
 0x2d6   : > { %v3121_v10 = vpop.f32.mrb[0].mxu0 }
 0x2d7   : > { %v1446_v56 = vadd.f32 %v3121_v10, %v1369_v44  ;;  %v1436_v25 = vpop.f32.mrb[1].mxu0 }
 0x2d8   : > { %v1445_v17 = vadd.f32 %v1436_v25, %v1368_v29 }
 0x2d9   : > { %1448 = vst [vmem:[%s4241_s22 + $0x8] sm:$0xff] %v1446_v56 }
 0x2da   : > { %1447 = vst [vmem:[%s4241_s22] sm:$0xff] %v1445_v17 }
 0x2e0   : > { %v3156_v53 = vpop.f32.mrb[0].mxu1 }
 0x2e1   : > { %v1823_v27 = vadd.f32 %v3156_v53, %v1746_v24  ;;  %v1813_v61 = vpop.f32.mrb[1].mxu1 }
 0x2e2   : > { %v1822_v55 = vadd.f32 %v1813_v61, %v1745_v19 }
 0x2e3   : > { %2915 = vst [vmem:[%s4241_s22 + $0x18] sm:$0xff] %v1823_v27 }
 0x2e4   : > { %2914 = vst [vmem:[%s4241_s22 + $0x10] sm:$0xff] %v1822_v55 }
 0x2fe   : > { %v3191_v49 = vpop.f32.mrb[2].mxu0 }
 0x2ff   : > { %v2200_v16 = vadd.f32 %v3191_v49, %v2123_v45  ;;  %v2190_v33 = vpop.f32.mrb[3].mxu0 }
 0x300   : > { %v2199_v32 = vadd.f32 %v2190_v33, %v2122_v35 }
 0x301   : > { %2955 = vst [vmem:[%s4241_s22 + $0x28] sm:$0xff] %v2200_v16 }
 0x302   : > { %2954 = vst [vmem:[%s4241_s22 + $0x20] sm:$0xff] %v2199_v32 }
 0x30c   : > { %v3226_v11 = vpop.f32.mrb[2].mxu1 }
 0x30d   : > { %v2577_v48 = vadd.f32 %v3226_v11, %v2500_v37  ;;  %v2567_v36 = vpop.f32.mrb[3].mxu1 }
 0x30e   : > { %v2576_v14 = vadd.f32 %v2567_v36, %v2499_v15 }
 0x30f   : > { %2995 = vst [vmem:[%s4241_s22 + $0x38] sm:$0xff] %v2577_v48 }
 0x310   : > { %2994 = vst [vmem:[%s4241_s22 + $0x30] sm:$0xff] %v2576_v14 }
 0x311 PF: > { %s5090_s23 = sld [smem:[#allocation14_spill]] }
 0x317   : > { %p2996_p5 = scmp.ne.s32.totalorder %s5090_s23, 1 }
 0x318   : > { %v2586_v23 = vld [vmem:[%s4241_s22 + $0x8] sm:$0xff] (!%p2996_p5)  ;;  %v2998_v6 = vld [vmem:[%s4241_s22 + $0x18] sm:$0xff] (!%p2996_p5)  ;;  %v2593_v46 = vlaneseq (!%p2996_p5)  ;;  %v2585_v63 = vld [vmem:[%s4241_s22] sm:$0xff] (!%p2996_p5) }
 0x319   : > { %2584 = sbr.rel (%p2996_p5) target bundleno = 820 (0x334), region = 196  ;;  %vm2587_vm0 = vcmp.gt.f32.partialorder (!%p2996_p5), %v2586_v23, 0.0  ;;  %v3002_v40 = vld [vmem:[%s4241_s22 + $0x28] sm:$0xff] (!%p2996_p5)  ;;  %vm2604_vm1 = vcmp.gt.f32.partialorder (!%p2996_p5), %v2998_v6, 0.0  ;;  %v3006_v13 = vld [vmem:[%s4241_s22 + $0x38] sm:$0xff] (!%p2996_p5)  ;;  %v2997_v10 = vld [vmem:[%s4241_s22 + $0x10] sm:$0xff] (!%p2996_p5) }
 0x31a   : > { %v2588_v20 = vsel (!%p2996_p5), %vm2587_vm0, %v2586_v23, 1.0  ;;  %vm2621_vm2 = vcmp.gt.f32.partialorder (!%p2996_p5), %v3002_v40, 0.0  ;;  %v2605_v28 = vsel (!%p2996_p5), %vm2604_vm1, %v2998_v6, 1.0  ;;  %vm2638_vm3 = vcmp.gt.f32.partialorder (!%p2996_p5), %v3006_v13, 0.0  ;;  %v3001_v25 = vld [vmem:[%s4241_s22 + $0x20] sm:$0xff] (!%p2996_p5)  ;;  %v3005_v58 = vld [vmem:[%s4241_s22 + $0x30] sm:$0xff] (!%p2996_p5) }
 0x31b   : > { %3602 = vrcp.f32 (!%p2996_p5), %v2588_v20  ;;  %v2622_v8 = vsel (!%p2996_p5), %vm2621_vm2, %v3002_v40, 1.0  ;;  %v2639_v1 = vsel (!%p2996_p5), %vm2638_vm3, %v3006_v13, 1.0  ;;  %v2594_v34 = vshrl.u32 (!%p2996_p5), %v2593_v46, 7 }
 0x31c   : > { %3604 = vrcp.f32 (!%p2996_p5), %v2605_v28 }
 0x31d   : > { %3606 = vrcp.f32 (!%p2996_p5), %v2622_v8  ;;  %v2595_v21 = vsub.s32 (!%p2996_p5), 0, %v2594_v34 }
 0x31e   : > { %3608 = vrcp.f32 (!%p2996_p5), %v2639_v1 }
 0x325   : > { %v3603_v4 = vpop.eup %3602 }
 0x326   : > { %v3605_v5 = vpop.eup %3604  ;;  %v2590_v2 = vmul.f32 %v3603_v4, %v2588_v20 }
 0x327   : > { %v3607_v18 = vpop.eup %3606  ;;  %v2607_v31 = vmul.f32 %v3605_v5, %v2605_v28 }
 0x328   : > { %v3609_v9 = vpop.eup %3608  ;;  %v2591_v26 = vsub.f32 2.0, %v2590_v2  ;;  %v2624_v54 = vmul.f32 %v3607_v18, %v2622_v8 }
 0x329   : > { %v2608_v38 = vsub.f32 2.0, %v2607_v31  ;;  %v2641_v62 = vmul.f32 %v3609_v9, %v2639_v1 }
 0x32a   : > { %v2592_v3 = vmul.f32 %v3603_v4, %v2591_v26  ;;  %v2625_v51 = vsub.f32 2.0, %v2624_v54 }
 0x32b   : > { %v2609_v0 = vmul.f32 %v3605_v5, %v2608_v38  ;;  %v2642_v57 = vsub.f32 2.0, %v2641_v62 }
 0x32c   : > { %v2596_v44 = vrot.slane %v2592_v3, %v2595_v21  ;;  %v2626_v29 = vmul.f32 %v3607_v18, %v2625_v51 }
 0x32d   : > { %v2613_v56 = vrot.slane %v2609_v0, %v2595_v21  ;;  %v2643_v42 = vmul.f32 %v3609_v9, %v2642_v57 }
 0x32e   : > { %v2597_v17 = vmul.f32 %v2596_v44, %v2585_v63  ;;  %v2598_v59 = vmul.f32 %v2596_v44, %v2586_v23  ;;  %v2630_v22 = vrot.slane %v2626_v29, %v2595_v21 }
 0x32f   : > { %v2614_v24 = vmul.f32 %v2997_v10, %v2613_v56  ;;  %v2615_v53 = vmul.f32 %v2998_v6, %v2613_v56  ;;  %v2647_v19 = vrot.slane %v2643_v42, %v2595_v21 }
 0x330   : > { %2599 = vst [vmem:[%s4241_s22] sm:$0xff] %v2597_v17  ;;  %2600 = vst [vmem:[%s4241_s22 + $0x8] sm:$0xff] %v2598_v59  ;;  %v2631_v27 = vmul.f32 %v3001_v25, %v2630_v22  ;;  %v2632_v61 = vmul.f32 %v3002_v40, %v2630_v22 }
 0x331   : > { %2999 = vst [vmem:[%s4241_s22 + $0x10] sm:$0xff] %v2614_v24  ;;  %3000 = vst [vmem:[%s4241_s22 + $0x18] sm:$0xff] %v2615_v53  ;;  %v2648_v55 = vmul.f32 %v3005_v58, %v2647_v19  ;;  %v2649_v7 = vmul.f32 %v3006_v13, %v2647_v19 }
 0x332   : > { %3003 = vst [vmem:[%s4241_s22 + $0x20] sm:$0xff] %v2631_v27  ;;  %3004 = vst [vmem:[%s4241_s22 + $0x28] sm:$0xff] %v2632_v61 }
 0x333   : > { %3007 = vst [vmem:[%s4241_s22 + $0x30] sm:$0xff] %v2648_v55  ;;  %3008 = vst [vmem:[%s4241_s22 + $0x38] sm:$0xff] %v2649_v7 }
 0x334 PF: > { %2658 = sbr.rel (!%p3925_p11) target bundleno = 832 (0x340), region = 200  ;;  %s5091_s24 = sld [smem:[#allocation15_spill]] (%p3925_p11) }
 0x335   : > { %s5092_s20 = sld [smem:[#allocation38_spill]] (%p3925_p11) }
 0x337   : > { %v2702_v12 = vld [vmem:[%s4241_s22] sm:$0xff] (%p3925_p11)  ;;  %v2704_v47 = vld [vmem:[%s4241_s22 + $0x8] sm:$0xff] (%p3925_p11) }
 0x338   : > { %v2706_v39 = vld [vmem:[%s4241_s22 + $0x10] sm:$0xff] (%p3925_p11)  ;;  %v2708_v30 = vld [vmem:[%s4241_s22 + $0x18] sm:$0xff] (%p3925_p11) }
 0x339   : > { %v2710_v60 = vld [vmem:[%s4241_s22 + $0x20] sm:$0xff] (%p3925_p11)  ;;  %v2712_v45 = vld [vmem:[%s4241_s22 + $0x28] sm:$0xff] (%p3925_p11) }
 0x33a   : > { %s3010_s27 = sshll.u32 (%p3925_p11), %s5091_s24, 3  ;;  %v2714_v49 = vld [vmem:[%s4241_s22 + $0x30] sm:$0xff] (%p3925_p11)  ;;  %v2716_v35 = vld [vmem:[%s4241_s22 + $0x38] sm:$0xff] (%p3925_p11) }
 0x33b   : > { %s2660_s9 = scalar_lea.vmem %s5092_s20, %s3010_s27 }
 0x33c   : > { %2703 = vst [vmem:[%s2660_s9] sm:$0xff] %v2702_v12  ;;  %2705 = vst [vmem:[%s2660_s9 + $0x10] sm:$0xff] %v2704_v47 }
 0x33d   : > { %2707 = vst [vmem:[%s2660_s9 + $0x20] sm:$0xff] %v2706_v39  ;;  %2709 = vst [vmem:[%s2660_s9 + $0x30] sm:$0xff] %v2708_v30 }
 0x33e   : > { %2711 = vst [vmem:[%s2660_s9 + $0x40] sm:$0xff] %v2710_v60  ;;  %2713 = vst [vmem:[%s2660_s9 + $0x50] sm:$0xff] %v2712_v45 }
 0x33f   : > { %2715 = vst [vmem:[%s2660_s9 + $0x60] sm:$0xff] %v2714_v49  ;;  %2717 = vst [vmem:[%s2660_s9 + $0x70] sm:$0xff] %v2716_v35 }
 0x340 PF: > { %s26_s17 = sadd.s32 1, %s3738_s17   ;;  %s5094_s11 = sld [smem:[#allocation20_spill]] }
 0x341   : > { %p4962_p6 = scmp.ge.s32.totalorder %s26_s17, 6   ;;  %s5095_s18 = sld [smem:[#allocation19_spill]] }
 0x342   : > { %s5096_s13 = sld [smem:[#allocation16_spill]]  ;;  %s5097_s0 = sld [smem:[#allocation17_spill]] }
 0x343   : > { %s5098_s6 = sld [smem:[#allocation18_spill]]  ;;  %s5099_s1 = smov %s3694_s30 }
 0x344   : > { %s5100_s30 = smov %s3931_s29  ;;  %s5101_s7 = smov %s3702_s8 }
 0x345   : > { %s5102_s8 = smov %s3894_s15  ;;  %s5103_s9 = smov %s3710_s10 }
 0x346   : > { %s5104_s10 = smov %s5094_s11  ;;  %s5105_s11 = smov %s3718_s12 }
 0x347   : > { %s5106_s12 = smov %s5095_s18  ;;  %s5107_s14 = smov %s3734_s16 }
 0x348   : > { %s5108_s15 = smov %s5097_s0  ;;  %25 = sbr.rel (!%p4962_p6) target bundleno = 33 (0x21), region = 314 }
 0x349   : > { %s5109_s16 = smov %s5098_s6 }

</bundles_post_ra>
